<compile_context>
chip_gen: v7x
topology: tpu7x:2x2x1
jax: 0.10.0
libtpu: 0.0.40
codegen_flags: <defaults>
</compile_context>

<pallas_src>
import functools

import jax
import jax.numpy as jnp
from jax.experimental import pallas as pl
from jax.experimental.pallas import tpu as pltpu


# ---------------------------------------------------------------------------
# Pallas kernels
# ---------------------------------------------------------------------------
def _conv_bn_lrelu_kernel(a_ref, w_ref, g_ref, b_ref, o_ref, sum_ref, sq_ref,
                          *, inv_m, eps, slope):
    """Fused im2col-matmul + training-mode BatchNorm + LeakyReLU.

    grid = (2, n_m):  phase (outer, sequential) x M-tiles (inner).
      phase 0: accumulate per-channel sum / sum-of-squares of Y = A @ W.
      phase 1: recompute Y tile, normalize with global batch stats, LeakyReLU, store.
    """
    phase = pl.program_id(0)
    m_idx = pl.program_id(1)

    # MXU matmul: bf16 inputs, f32 accumulation.
    y = jnp.dot(a_ref[...], w_ref[...], preferred_element_type=jnp.float32)

    @pl.when(jnp.logical_and(phase == 0, m_idx == 0))
    def _init():
        sum_ref[...] = jnp.zeros_like(sum_ref)
        sq_ref[...] = jnp.zeros_like(sq_ref)

    @pl.when(phase == 0)
    def _accumulate_stats():
        sum_ref[...] += jnp.sum(y, axis=0, keepdims=True)
        sq_ref[...] += jnp.sum(y * y, axis=0, keepdims=True)

    @pl.when(phase == 1)
    def _normalize():
        mean = sum_ref[...] * inv_m                       # (1, C)
        var = sq_ref[...] * inv_m - mean * mean           # biased batch variance
        scale = jax.lax.rsqrt(var + eps) * g_ref[...]
        shift = b_ref[...] - mean * scale
        yn = y * scale + shift
        o_ref[...] = jnp.where(yn > 0.0, yn, slope * yn)  # LeakyReLU(0.2)


def _matmul_sigmoid_kernel(a_ref, w_ref, o_ref):
    y = jnp.dot(a_ref[...], w_ref[...], preferred_element_type=jnp.float32)
    o_ref[...] = jax.nn.sigmoid(y)


# ---------------------------------------------------------------------------
# Layout glue (NHWC im2col, bf16 cast) + pallas_call wrappers
# ---------------------------------------------------------------------------
def _pick_tile_m(m, target=1024):
    """Largest M-tile <= target that divides M exactly (keeps BN stats exact)."""
    if m <= target:
        return m
    for t in (1024, 512, 256, 128, 64, 32, 16, 8):
        if t <= target and m % t == 0:
            return t
    return m


def _im2col_nhwc(x_nhwc, k, stride, pad, dtype):
    """NHWC patches: (N*Ho*Wo, k*k*Cin), K ordered (kh, kw, ci)."""
    N, H, W, C = x_nhwc.shape
    Ho = (H + 2 * pad - k) // stride + 1
    Wo = (W + 2 * pad - k) // stride + 1
    xp = jnp.pad(x_nhwc.astype(dtype), ((0, 0), (pad, pad), (pad, pad), (0, 0)))
    cols = []
    for kh in range(k):
        for kw in range(k):
            cols.append(xp[:, kh:kh + stride * Ho:stride,
                           kw:kw + stride * Wo:stride, :])
    patches = jnp.stack(cols, axis=3)                     # (N, Ho, Wo, k*k, C)
    return patches.reshape(N * Ho * Wo, k * k * C), (N, Ho, Wo)


def _weight_matrix(w, dtype):
    """Torch OIHW weight -> (K, Cout) with K ordered (kh, kw, ci)."""
    Cout, Cin, kh, kw = w.shape
    return jnp.transpose(w, (2, 3, 1, 0)).reshape(kh * kw * Cin, Cout).astype(dtype)


_VMEM_LIMIT = 32 * 1024 * 1024  # explicit scoped-VMEM budget (safe on v5e/v6e/v7x)


def conv_bn_lrelu_pallas(x_nhwc, w, gamma, beta, *, stride, padding,
                         eps=1e-5, slope=0.2, compute_dtype=jnp.bfloat16):
    """Fused Conv2d(no bias) + BatchNorm(batch stats) + LeakyReLU.  NHWC in/out."""
    Cout, Cin, k, _ = w.shape
    a, (N, Ho, Wo) = _im2col_nhwc(x_nhwc, k, stride, padding, compute_dtype)
    wm = _weight_matrix(w, compute_dtype)                 # (K, Cout)
    M, K = a.shape
    TM = _pick_tile_m(M)
    n_m = M // TM

    gb = gamma.reshape(1, Cout).astype(jnp.float32)
    bb = beta.reshape(1, Cout).astype(jnp.float32)

    kernel = functools.partial(_conv_bn_lrelu_kernel,
                               inv_m=1.0 / M, eps=eps, slope=slope)
    flops = int(2 * 2 * M * K * Cout)                     # matmul runs in both phases
    bytes_accessed = int(2 * M * K * 2 + K * Cout * 2 + M * Cout * 4)

    out = pl.pallas_call(
        kernel,
        out_shape=jax.ShapeDtypeStruct((M, Cout), jnp.float32),
        grid=(2, n_m),
        in_specs=[
            pl.BlockSpec((TM, K), lambda p, m: (m, 0)),       # patch tile (pipelined)
            pl.BlockSpec((K, Cout), lambda p, m: (0, 0)),     # weight resident
            pl.BlockSpec((1, Cout), lambda p, m: (0, 0)),     # gamma resident
            pl.BlockSpec((1, Cout), lambda p, m: (0, 0)),     # beta resident
        ],
        # phase 0 parks all steps on block 0 (never written there -> no garbage
        # flush); phase 1 visits each M tile once and writes the final values.
        out_specs=pl.BlockSpec((TM, Cout), lambda p, m: (m * p, 0)),
        scratch_shapes=[pltpu.VMEM((1, Cout), jnp.float32),   # per-channel sum
                        pltpu.VMEM((1, Cout), jnp.float32)],  # per-channel sum-of-sq
        compiler_params=pltpu.CompilerParams(
            dimension_semantics=("arbitrary", "arbitrary"),
            vmem_limit_bytes=_VMEM_LIMIT),
        cost_estimate=pl.CostEstimate(flops=flops, transcendentals=int(Cout),
                                      bytes_accessed=bytes_accessed),
    )(a, wm, gb, bb)
    return out.reshape(N, Ho, Wo, Cout)                   # NHWC, free reshape


def conv_sigmoid_pallas(x_nhwc, w, *, stride, padding, compute_dtype=jnp.bfloat16):
    """Final Conv2d(no bias) + Sigmoid.  NHWC in/out."""
    Cout, Cin, k, _ = w.shape
    a, (N, Ho, Wo) = _im2col_nhwc(x_nhwc, k, stride, padding, compute_dtype)
    wm = _weight_matrix(w, compute_dtype)
    M, K = a.shape
    TM = _pick_tile_m(M, target=512)
    n_m = M // TM

    out = pl.pallas_call(
        _matmul_sigmoid_kernel,
        out_shape=jax.ShapeDtypeStruct((M, Cout), jnp.float32),
        grid=(n_m,),
        in_specs=[
            pl.BlockSpec((TM, K), lambda i: (i, 0)),
            pl.BlockSpec((K, Cout), lambda i: (0, 0)),
        ],
        out_specs=pl.BlockSpec((TM, Cout), lambda i: (i, 0)),
        compiler_params=pltpu.CompilerParams(
            dimension_semantics=("parallel",),
            vmem_limit_bytes=_VMEM_LIMIT),
        cost_estimate=pl.CostEstimate(
            flops=int(2 * M * K * Cout), transcendentals=int(M * Cout),
            bytes_accessed=int(M * K * 2 + K * Cout * 2 + M * Cout * 4)),
    )(a, wm)
    return out.reshape(N, Ho, Wo, Cout)


# ---------------------------------------------------------------------------
# Discriminator32
# ---------------------------------------------------------------------------
def init_params(key, ndf=32):
    ks = jax.random.split(key, 4)
    return {
        "w1": 0.02 * jax.random.normal(ks[0], (ndf, 3, 4, 4), jnp.float32),
        "g1": jnp.ones((ndf,), jnp.float32),
        "b1": jnp.zeros((ndf,), jnp.float32),
        "w2": 0.02 * jax.random.normal(ks[1], (2 * ndf, ndf, 4, 4), jnp.float32),
        "g2": jnp.ones((2 * ndf,), jnp.float32),
        "b2": jnp.zeros((2 * ndf,), jnp.float32),
        "w3": 0.02 * jax.random.normal(ks[2], (4 * ndf, 2 * ndf, 4, 4), jnp.float32),
        "g3": jnp.ones((4 * ndf,), jnp.float32),
        "b3": jnp.zeros((4 * ndf,), jnp.float32),
        "w4": 0.02 * jax.random.normal(ks[3], (1, 4 * ndf, 4, 4), jnp.float32),
    }


@jax.jit
def discriminator32_forward(params, x):
    """x: (N, 3, 32, 32) float32 NCHW -> (N, 1, 1, 1) in (0, 1)."""
    h = jnp.transpose(x, (0, 2, 3, 1))                       # single NCHW->NHWC (C=3)
    h = conv_bn_lrelu_pallas(h, params["w1"], params["g1"], params["b1"],
                             stride=2, padding=1)            # (N, 16, 16,  ndf)
    h = conv_bn_lrelu_pallas(h, params["w2"], params["g2"], params["b2"],
                             stride=2, padding=1)            # (N,  8,  8, 2ndf)
    h = conv_bn_lrelu_pallas(h, params["w3"], params["g3"], params["b3"],
                             stride=2, padding=1)            # (N,  4,  4, 4ndf)
    out = conv_sigmoid_pallas(h, params["w4"], stride=1, padding=0)  # (N, 1, 1, 1)
    return jnp.transpose(out, (0, 3, 1, 2))                  # trivial (all-1 dims)


# ---------------------------------------------------------------------------
# Reference (pure JAX/XLA, f32) for a correctness spot-check
# ---------------------------------------------------------------------------
def _ref_forward(params, x):
    def conv(h, w, s, p):
        return jax.lax.conv_general_dilated(
            h, w, window_strides=(s, s), padding=[(p, p), (p, p)],
            dimension_numbers=("NCHW", "OIHW", "NCHW"))

    def bn_lrelu(y, g, b):
        mean = jnp.mean(y, axis=(0, 2, 3), keepdims=True)
        var = jnp.mean(jnp.square(y - mean), axis=(0, 2, 3), keepdims=True)
        yn = (y - mean) / jnp.sqrt(var + 1e-5)
        yn = yn * g.reshape(1, -1, 1, 1) + b.reshape(1, -1, 1, 1)
        return jnp.where(yn > 0, yn, 0.2 * yn)

    h = bn_lrelu(conv(x, params["w1"], 2, 1), params["g1"], params["b1"])
    h = bn_lrelu(conv(h, params["w2"], 2, 1), params["g2"], params["b2"])
    h = bn_lrelu(conv(h, params["w3"], 2, 1), params["g3"], params["b3"])
    return jax.nn.sigmoid(conv(h, params["w4"], 1, 0))


if __name__ == "__main__":
    key = jax.random.PRNGKey(0)
    k_param, k_x = jax.random.split(key)
    params = init_params(k_param, ndf=32)
    # 32x32 is required by the architecture (final 4x4 valid conv); batch=2.
    x = jax.random.normal(k_x, (2, 3, 32, 32), jnp.float32)

    out = discriminator32_forward(params, x)
    out = jax.block_until_ready(out)
    assert out.shape == (2, 1, 1, 1), out.shape

    ref = jax.block_until_ready(_ref_forward(params, x))
    max_err = float(jnp.max(jnp.abs(out - ref)))
    # Kernel uses bf16 MXU inputs (f32 accumulation); sigmoid outputs agree with
    # the pure-f32 reference to well within 2e-2.
    if max_err > 2e-2:
        raise AssertionError(f"mismatch vs reference: max abs err = {max_err}")

    print("KERNEL_OK")
</pallas_src>

<mosaic_0001>
module attributes {stable_mosaic.version = 11 : i64} {
  func.func @_conv_bn_lrelu_kernel(%arg0: i32, %arg1: i32, %arg2: memref<512x48xbf16, #tpu.memory_space<vmem>>, %arg3: memref<48x32xbf16, #tpu.memory_space<vmem>>, %arg4: memref<1x32xf32, #tpu.memory_space<vmem>>, %arg5: memref<1x32xf32, #tpu.memory_space<vmem>>, %arg6: memref<512x32xf32, #tpu.memory_space<vmem>>, %arg7: memref<1x32xf32, #tpu.memory_space<vmem>>, %arg8: memref<1x32xf32, #tpu.memory_space<vmem>>) attributes {dimension_semantics = [#tpu.dimension_semantics<arbitrary>, #tpu.dimension_semantics<arbitrary>], iteration_bounds = array<i64: 2, 1>, scalar_prefetch = 0 : i64, scratch_operands = 2 : i64, tpu.core_type = #tpu.core_type<tc>, window_params = [{transform_indices = @transform_0, window_bounds = array<i64: 512, 48>}, {pipeline_mode = #tpu.pipeline_mode<synchronous>, transform_indices = @transform_1, window_bounds = array<i64: 48, 32>}, {pipeline_mode = #tpu.pipeline_mode<synchronous>, transform_indices = @transform_2, window_bounds = array<i64: 1, 32>}, {pipeline_mode = #tpu.pipeline_mode<synchronous>, transform_indices = @transform_3, window_bounds = array<i64: 1, 32>}, {transform_indices = @transform_4, window_bounds = array<i64: 512, 32>}]} {
    %c0 = arith.constant 0 : index
    %c0_0 = arith.constant 0 : index
    %0 = vector.load %arg2[%c0, %c0_0] : memref<512x48xbf16, #tpu.memory_space<vmem>>, vector<512x48xbf16>
    %c0_1 = arith.constant 0 : index
    %c0_2 = arith.constant 0 : index
    %1 = vector.load %arg3[%c0_1, %c0_2] : memref<48x32xbf16, #tpu.memory_space<vmem>>, vector<48x32xbf16>
    %cst = arith.constant dense<0.000000e+00> : vector<512x32xf32>
    %2 = tpu.matmul %0, %1, %cst {dimension_numbers = #tpu.dot_dimension_numbers<[1], [0], [0], [1], [0, 0, 1, 1], [], []>} : vector<512x48xbf16>, vector<48x32xbf16>, vector<512x32xf32> -> vector<512x32xf32>
    %c0_i32 = arith.constant 0 : i32
    %3 = arith.cmpi eq, %arg0, %c0_i32 : i32
    %c0_i32_3 = arith.constant 0 : i32
    %4 = arith.cmpi eq, %arg1, %c0_i32_3 : i32
    %5 = arith.andi %3, %4 : i1
    %6 = arith.extui %5 : i1 to i32
    %c0_i32_4 = arith.constant 0 : i32
    %7 = arith.cmpi ne, %6, %c0_i32_4 : i32
    scf.if %7 {
      %cst_8 = arith.constant 0.000000e+00 : f32
      %14 = vector.broadcast %cst_8 : f32 to vector<1x32xf32>
      %c0_9 = arith.constant 0 : index
      %c0_10 = arith.constant 0 : index
      %15 = vector.load %arg7[%c0_9, %c0_10] : memref<1x32xf32, #tpu.memory_space<vmem>>, vector<1x32xf32>
      tpu.vector_store %arg7[%c0_9, %c0_10], %14 {strides = array<i32>} : memref<1x32xf32, #tpu.memory_space<vmem>>, vector<1x32xf32>,
      %cst_11 = arith.constant 0.000000e+00 : f32
      %16 = vector.broadcast %cst_11 : f32 to vector<1x32xf32>
      %c0_12 = arith.constant 0 : index
      %c0_13 = arith.constant 0 : index
      %17 = vector.load %arg8[%c0_12, %c0_13] : memref<1x32xf32, #tpu.memory_space<vmem>>, vector<1x32xf32>
      tpu.vector_store %arg8[%c0_12, %c0_13], %16 {strides = array<i32>} : memref<1x32xf32, #tpu.memory_space<vmem>>, vector<1x32xf32>,
    } else {
    }
    %c0_i32_5 = arith.constant 0 : i32
    %8 = arith.cmpi eq, %arg0, %c0_i32_5 : i32
    %9 = arith.extui %8 : i1 to i32
    %c0_i32_6 = arith.constant 0 : i32
    %10 = arith.cmpi ne, %9, %c0_i32_6 : i32
    scf.if %10 {
      %c0_8 = arith.constant 0 : index
      %c0_9 = arith.constant 0 : index
      %14 = vector.load %arg7[%c0_8, %c0_9] : memref<1x32xf32, #tpu.memory_space<vmem>>, vector<1x32xf32>
      %cst_10 = arith.constant dense<0.000000e+00> : vector<32xf32>
      %15 = vector.multi_reduction <add>, %2, %cst_10 [0] : vector<512x32xf32> to vector<32xf32>
      %16 = vector.shape_cast %15 : vector<32xf32> to vector<1x32xf32>
      %17 = arith.addf %14, %16 : vector<1x32xf32>
      %c0_11 = arith.constant 0 : index
      %c0_12 = arith.constant 0 : index
      %18 = vector.load %arg7[%c0_11, %c0_12] : memref<1x32xf32, #tpu.memory_space<vmem>>, vector<1x32xf32>
      tpu.vector_store %arg7[%c0_11, %c0_12], %17 {strides = array<i32>} : memref<1x32xf32, #tpu.memory_space<vmem>>, vector<1x32xf32>,
      %c0_13 = arith.constant 0 : index
      %c0_14 = arith.constant 0 : index
      %19 = vector.load %arg8[%c0_13, %c0_14] : memref<1x32xf32, #tpu.memory_space<vmem>>, vector<1x32xf32>
      %20 = arith.mulf %2, %2 : vector<512x32xf32>
      %cst_15 = arith.constant dense<0.000000e+00> : vector<32xf32>
      %21 = vector.multi_reduction <add>, %20, %cst_15 [0] : vector<512x32xf32> to vector<32xf32>
      %22 = vector.shape_cast %21 : vector<32xf32> to vector<1x32xf32>
      %23 = arith.addf %19, %22 : vector<1x32xf32>
      %c0_16 = arith.constant 0 : index
      %c0_17 = arith.constant 0 : index
      %24 = vector.load %arg8[%c0_16, %c0_17] : memref<1x32xf32, #tpu.memory_space<vmem>>, vector<1x32xf32>
      tpu.vector_store %arg8[%c0_16, %c0_17], %23 {strides = array<i32>} : memref<1x32xf32, #tpu.memory_space<vmem>>, vector<1x32xf32>,
    } else {
    }
    %c1_i32 = arith.constant 1 : i32
    %11 = arith.cmpi eq, %arg0, %c1_i32 : i32
    %12 = arith.extui %11 : i1 to i32
    %c0_i32_7 = arith.constant 0 : i32
    %13 = arith.cmpi ne, %12, %c0_i32_7 : i32
    scf.if %13 {
      %c0_8 = arith.constant 0 : index
      %c0_9 = arith.constant 0 : index
      %14 = vector.load %arg7[%c0_8, %c0_9] : memref<1x32xf32, #tpu.memory_space<vmem>>, vector<1x32xf32>
      %cst_10 = arith.constant 0.001953125 : f32
      %15 = vector.broadcast %cst_10 : f32 to vector<1x32xf32>
      %16 = arith.mulf %14, %15 : vector<1x32xf32>
      %c0_11 = arith.constant 0 : index
      %c0_12 = arith.constant 0 : index
      %17 = vector.load %arg8[%c0_11, %c0_12] : memref<1x32xf32, #tpu.memory_space<vmem>>, vector<1x32xf32>
      %cst_13 = arith.constant 0.001953125 : f32
      %18 = vector.broadcast %cst_13 : f32 to vector<1x32xf32>
      %19 = arith.mulf %17, %18 : vector<1x32xf32>
      %20 = arith.mulf %16, %16 : vector<1x32xf32>
      %21 = arith.subf %19, %20 : vector<1x32xf32>
      %cst_14 = arith.constant 9.99999974E-6 : f32
      %22 = vector.broadcast %cst_14 : f32 to vector<1x32xf32>
      %23 = arith.addf %21, %22 : vector<1x32xf32>
      %24 = math.rsqrt %23 : vector<1x32xf32>
      %c0_15 = arith.constant 0 : index
      %c0_16 = arith.constant 0 : index
      %25 = vector.load %arg4[%c0_15, %c0_16] : memref<1x32xf32, #tpu.memory_space<vmem>>, vector<1x32xf32>
      %26 = arith.mulf %24, %25 : vector<1x32xf32>
      %c0_17 = arith.constant 0 : index
      %c0_18 = arith.constant 0 : index
      %27 = vector.load %arg5[%c0_17, %c0_18] : memref<1x32xf32, #tpu.memory_space<vmem>>, vector<1x32xf32>
      %28 = arith.mulf %16, %26 : vector<1x32xf32>
      %29 = arith.subf %27, %28 : vector<1x32xf32>
      %30 = vector.broadcast %26 : vector<1x32xf32> to vector<512x32xf32>
      %31 = arith.mulf %2, %30 : vector<512x32xf32>
      %32 = vector.broadcast %29 : vector<1x32xf32> to vector<512x32xf32>
      %33 = arith.addf %31, %32 : vector<512x32xf32>
      %cst_19 = arith.constant 0.000000e+00 : f32
      %34 = vector.broadcast %cst_19 : f32 to vector<512x32xf32>
      %35 = arith.cmpf ogt, %33, %34 : vector<512x32xf32>
      %cst_20 = arith.constant 2.000000e-01 : f32
      %36 = vector.broadcast %cst_20 : f32 to vector<512x32xf32>
      %37 = arith.mulf %36, %33 : vector<512x32xf32>
      %38 = arith.select %35, %33, %37 : vector<512x32xi1>, vector<512x32xf32>
      %c0_21 = arith.constant 0 : index
      %c0_22 = arith.constant 0 : index
      %39 = vector.load %arg6[%c0_21, %c0_22] : memref<512x32xf32, #tpu.memory_space<vmem>>, vector<512x32xf32>
      tpu.vector_store %arg6[%c0_21, %c0_22], %38 {strides = array<i32>} : memref<512x32xf32, #tpu.memory_space<vmem>>, vector<512x32xf32>,
    } else {
    }
    return
  }
  func.func @transform_0(%arg0: i32, %arg1: i32) -> (i32, i32) {
    %c0_i32 = arith.constant 0 : i32
    %c0_i32_0 = arith.constant 0 : i32
    return %arg1, %c0_i32 : i32, i32
  }
  func.func @transform_1(%arg0: i32, %arg1: i32) -> (i32, i32) {
    %c0_i32 = arith.constant 0 : i32
    %c0_i32_0 = arith.constant 0 : i32
    %c0_i32_1 = arith.constant 0 : i32
    return %c0_i32, %c0_i32_0 : i32, i32
  }
  func.func @transform_2(%arg0: i32, %arg1: i32) -> (i32, i32) {
    %c0_i32 = arith.constant 0 : i32
    %c0_i32_0 = arith.constant 0 : i32
    %c0_i32_1 = arith.constant 0 : i32
    return %c0_i32, %c0_i32_0 : i32, i32
  }
  func.func @transform_3(%arg0: i32, %arg1: i32) -> (i32, i32) {
    %c0_i32 = arith.constant 0 : i32
    %c0_i32_0 = arith.constant 0 : i32
    %c0_i32_1 = arith.constant 0 : i32
    return %c0_i32, %c0_i32_0 : i32, i32
  }
  func.func @transform_4(%arg0: i32, %arg1: i32) -> (i32, i32) {
    %0 = arith.muli %arg1, %arg0 : i32
    %c0_i32 = arith.constant 0 : i32
    %c0_i32_0 = arith.constant 0 : i32
    return %0, %c0_i32 : i32, i32
  }
}

module attributes {stable_mosaic.version = 11 : i64} {
  func.func @_conv_bn_lrelu_kernel(%arg0: i32, %arg1: i32, %arg2: memref<128x512xbf16, #tpu.memory_space<vmem>>, %arg3: memref<512x64xbf16, #tpu.memory_space<vmem>>, %arg4: memref<1x64xf32, #tpu.memory_space<vmem>>, %arg5: memref<1x64xf32, #tpu.memory_space<vmem>>, %arg6: memref<128x64xf32, #tpu.memory_space<vmem>>, %arg7: memref<1x64xf32, #tpu.memory_space<vmem>>, %arg8: memref<1x64xf32, #tpu.memory_space<vmem>>) attributes {dimension_semantics = [#tpu.dimension_semantics<arbitrary>, #tpu.dimension_semantics<arbitrary>], iteration_bounds = array<i64: 2, 1>, scalar_prefetch = 0 : i64, scratch_operands = 2 : i64, tpu.core_type = #tpu.core_type<tc>, window_params = [{transform_indices = @transform_0, window_bounds = array<i64: 128, 512>}, {pipeline_mode = #tpu.pipeline_mode<synchronous>, transform_indices = @transform_1, window_bounds = array<i64: 512, 64>}, {pipeline_mode = #tpu.pipeline_mode<synchronous>, transform_indices = @transform_2, window_bounds = array<i64: 1, 64>}, {pipeline_mode = #tpu.pipeline_mode<synchronous>, transform_indices = @transform_3, window_bounds = array<i64: 1, 64>}, {transform_indices = @transform_4, window_bounds = array<i64: 128, 64>}]} {
    %c0 = arith.constant 0 : index
    %c0_0 = arith.constant 0 : index
    %0 = vector.load %arg2[%c0, %c0_0] : memref<128x512xbf16, #tpu.memory_space<vmem>>, vector<128x512xbf16>
    %c0_1 = arith.constant 0 : index
    %c0_2 = arith.constant 0 : index
    %1 = vector.load %arg3[%c0_1, %c0_2] : memref<512x64xbf16, #tpu.memory_space<vmem>>, vector<512x64xbf16>
    %cst = arith.constant dense<0.000000e+00> : vector<128x64xf32>
    %2 = tpu.matmul %0, %1, %cst {dimension_numbers = #tpu.dot_dimension_numbers<[1], [0], [0], [1], [0, 0, 1, 1], [], []>} : vector<128x512xbf16>, vector<512x64xbf16>, vector<128x64xf32> -> vector<128x64xf32>
    %c0_i32 = arith.constant 0 : i32
    %3 = arith.cmpi eq, %arg0, %c0_i32 : i32
    %c0_i32_3 = arith.constant 0 : i32
    %4 = arith.cmpi eq, %arg1, %c0_i32_3 : i32
    %5 = arith.andi %3, %4 : i1
    %6 = arith.extui %5 : i1 to i32
    %c0_i32_4 = arith.constant 0 : i32
    %7 = arith.cmpi ne, %6, %c0_i32_4 : i32
    scf.if %7 {
      %cst_8 = arith.constant 0.000000e+00 : f32
      %14 = vector.broadcast %cst_8 : f32 to vector<1x64xf32>
      %c0_9 = arith.constant 0 : index
      %c0_10 = arith.constant 0 : index
      %15 = vector.load %arg7[%c0_9, %c0_10] : memref<1x64xf32, #tpu.memory_space<vmem>>, vector<1x64xf32>
      tpu.vector_store %arg7[%c0_9, %c0_10], %14 {strides = array<i32>} : memref<1x64xf32, #tpu.memory_space<vmem>>, vector<1x64xf32>,
      %cst_11 = arith.constant 0.000000e+00 : f32
      %16 = vector.broadcast %cst_11 : f32 to vector<1x64xf32>
      %c0_12 = arith.constant 0 : index
      %c0_13 = arith.constant 0 : index
      %17 = vector.load %arg8[%c0_12, %c0_13] : memref<1x64xf32, #tpu.memory_space<vmem>>, vector<1x64xf32>
      tpu.vector_store %arg8[%c0_12, %c0_13], %16 {strides = array<i32>} : memref<1x64xf32, #tpu.memory_space<vmem>>, vector<1x64xf32>,
    } else {
    }
    %c0_i32_5 = arith.constant 0 : i32
    %8 = arith.cmpi eq, %arg0, %c0_i32_5 : i32
    %9 = arith.extui %8 : i1 to i32
    %c0_i32_6 = arith.constant 0 : i32
    %10 = arith.cmpi ne, %9, %c0_i32_6 : i32
    scf.if %10 {
      %c0_8 = arith.constant 0 : index
      %c0_9 = arith.constant 0 : index
      %14 = vector.load %arg7[%c0_8, %c0_9] : memref<1x64xf32, #tpu.memory_space<vmem>>, vector<1x64xf32>
      %cst_10 = arith.constant dense<0.000000e+00> : vector<64xf32>
      %15 = vector.multi_reduction <add>, %2, %cst_10 [0] : vector<128x64xf32> to vector<64xf32>
      %16 = vector.shape_cast %15 : vector<64xf32> to vector<1x64xf32>
      %17 = arith.addf %14, %16 : vector<1x64xf32>
      %c0_11 = arith.constant 0 : index
      %c0_12 = arith.constant 0 : index
      %18 = vector.load %arg7[%c0_11, %c0_12] : memref<1x64xf32, #tpu.memory_space<vmem>>, vector<1x64xf32>
      tpu.vector_store %arg7[%c0_11, %c0_12], %17 {strides = array<i32>} : memref<1x64xf32, #tpu.memory_space<vmem>>, vector<1x64xf32>,
      %c0_13 = arith.constant 0 : index
      %c0_14 = arith.constant 0 : index
      %19 = vector.load %arg8[%c0_13, %c0_14] : memref<1x64xf32, #tpu.memory_space<vmem>>, vector<1x64xf32>
      %20 = arith.mulf %2, %2 : vector<128x64xf32>
      %cst_15 = arith.constant dense<0.000000e+00> : vector<64xf32>
      %21 = vector.multi_reduction <add>, %20, %cst_15 [0] : vector<128x64xf32> to vector<64xf32>
      %22 = vector.shape_cast %21 : vector<64xf32> to vector<1x64xf32>
      %23 = arith.addf %19, %22 : vector<1x64xf32>
      %c0_16 = arith.constant 0 : index
      %c0_17 = arith.constant 0 : index
      %24 = vector.load %arg8[%c0_16, %c0_17] : memref<1x64xf32, #tpu.memory_space<vmem>>, vector<1x64xf32>
      tpu.vector_store %arg8[%c0_16, %c0_17], %23 {strides = array<i32>} : memref<1x64xf32, #tpu.memory_space<vmem>>, vector<1x64xf32>,
    } else {
    }
    %c1_i32 = arith.constant 1 : i32
    %11 = arith.cmpi eq, %arg0, %c1_i32 : i32
    %12 = arith.extui %11 : i1 to i32
    %c0_i32_7 = arith.constant 0 : i32
    %13 = arith.cmpi ne, %12, %c0_i32_7 : i32
    scf.if %13 {
      %c0_8 = arith.constant 0 : index
      %c0_9 = arith.constant 0 : index
      %14 = vector.load %arg7[%c0_8, %c0_9] : memref<1x64xf32, #tpu.memory_space<vmem>>, vector<1x64xf32>
      %cst_10 = arith.constant 7.812500e-03 : f32
      %15 = vector.broadcast %cst_10 : f32 to vector<1x64xf32>
      %16 = arith.mulf %14, %15 : vector<1x64xf32>
      %c0_11 = arith.constant 0 : index
      %c0_12 = arith.constant 0 : index
      %17 = vector.load %arg8[%c0_11, %c0_12] : memref<1x64xf32, #tpu.memory_space<vmem>>, vector<1x64xf32>
      %cst_13 = arith.constant 7.812500e-03 : f32
      %18 = vector.broadcast %cst_13 : f32 to vector<1x64xf32>
      %19 = arith.mulf %17, %18 : vector<1x64xf32>
      %20 = arith.mulf %16, %16 : vector<1x64xf32>
      %21 = arith.subf %19, %20 : vector<1x64xf32>
      %cst_14 = arith.constant 9.99999974E-6 : f32
      %22 = vector.broadcast %cst_14 : f32 to vector<1x64xf32>
      %23 = arith.addf %21, %22 : vector<1x64xf32>
      %24 = math.rsqrt %23 : vector<1x64xf32>
      %c0_15 = arith.constant 0 : index
      %c0_16 = arith.constant 0 : index
      %25 = vector.load %arg4[%c0_15, %c0_16] : memref<1x64xf32, #tpu.memory_space<vmem>>, vector<1x64xf32>
      %26 = arith.mulf %24, %25 : vector<1x64xf32>
      %c0_17 = arith.constant 0 : index
      %c0_18 = arith.constant 0 : index
      %27 = vector.load %arg5[%c0_17, %c0_18] : memref<1x64xf32, #tpu.memory_space<vmem>>, vector<1x64xf32>
      %28 = arith.mulf %16, %26 : vector<1x64xf32>
      %29 = arith.subf %27, %28 : vector<1x64xf32>
      %30 = vector.broadcast %26 : vector<1x64xf32> to vector<128x64xf32>
      %31 = arith.mulf %2, %30 : vector<128x64xf32>
      %32 = vector.broadcast %29 : vector<1x64xf32> to vector<128x64xf32>
      %33 = arith.addf %31, %32 : vector<128x64xf32>
      %cst_19 = arith.constant 0.000000e+00 : f32
      %34 = vector.broadcast %cst_19 : f32 to vector<128x64xf32>
      %35 = arith.cmpf ogt, %33, %34 : vector<128x64xf32>
      %cst_20 = arith.constant 2.000000e-01 : f32
      %36 = vector.broadcast %cst_20 : f32 to vector<128x64xf32>
      %37 = arith.mulf %36, %33 : vector<128x64xf32>
      %38 = arith.select %35, %33, %37 : vector<128x64xi1>, vector<128x64xf32>
      %c0_21 = arith.constant 0 : index
      %c0_22 = arith.constant 0 : index
      %39 = vector.load %arg6[%c0_21, %c0_22] : memref<128x64xf32, #tpu.memory_space<vmem>>, vector<128x64xf32>
      tpu.vector_store %arg6[%c0_21, %c0_22], %38 {strides = array<i32>} : memref<128x64xf32, #tpu.memory_space<vmem>>, vector<128x64xf32>,
    } else {
    }
    return
  }
  func.func @transform_0(%arg0: i32, %arg1: i32) -> (i32, i32) {
    %c0_i32 = arith.constant 0 : i32
    %c0_i32_0 = arith.constant 0 : i32
    return %arg1, %c0_i32 : i32, i32
  }
  func.func @transform_1(%arg0: i32, %arg1: i32) -> (i32, i32) {
    %c0_i32 = arith.constant 0 : i32
    %c0_i32_0 = arith.constant 0 : i32
    %c0_i32_1 = arith.constant 0 : i32
    return %c0_i32, %c0_i32_0 : i32, i32
  }
  func.func @transform_2(%arg0: i32, %arg1: i32) -> (i32, i32) {
    %c0_i32 = arith.constant 0 : i32
    %c0_i32_0 = arith.constant 0 : i32
    %c0_i32_1 = arith.constant 0 : i32
    return %c0_i32, %c0_i32_0 : i32, i32
  }
  func.func @transform_3(%arg0: i32, %arg1: i32) -> (i32, i32) {
    %c0_i32 = arith.constant 0 : i32
    %c0_i32_0 = arith.constant 0 : i32
    %c0_i32_1 = arith.constant 0 : i32
    return %c0_i32, %c0_i32_0 : i32, i32
  }
  func.func @transform_4(%arg0: i32, %arg1: i32) -> (i32, i32) {
    %0 = arith.muli %arg1, %arg0 : i32
    %c0_i32 = arith.constant 0 : i32
    %c0_i32_0 = arith.constant 0 : i32
    return %0, %c0_i32 : i32, i32
  }
}

module attributes {stable_mosaic.version = 11 : i64} {
  func.func @_conv_bn_lrelu_kernel(%arg0: i32, %arg1: i32, %arg2: memref<32x1024xbf16, #tpu.memory_space<vmem>>, %arg3: memref<1024x128xbf16, #tpu.memory_space<vmem>>, %arg4: memref<1x128xf32, #tpu.memory_space<vmem>>, %arg5: memref<1x128xf32, #tpu.memory_space<vmem>>, %arg6: memref<32x128xf32, #tpu.memory_space<vmem>>, %arg7: memref<1x128xf32, #tpu.memory_space<vmem>>, %arg8: memref<1x128xf32, #tpu.memory_space<vmem>>) attributes {dimension_semantics = [#tpu.dimension_semantics<arbitrary>, #tpu.dimension_semantics<arbitrary>], iteration_bounds = array<i64: 2, 1>, scalar_prefetch = 0 : i64, scratch_operands = 2 : i64, tpu.core_type = #tpu.core_type<tc>, window_params = [{transform_indices = @transform_0, window_bounds = array<i64: 32, 1024>}, {pipeline_mode = #tpu.pipeline_mode<synchronous>, transform_indices = @transform_1, window_bounds = array<i64: 1024, 128>}, {pipeline_mode = #tpu.pipeline_mode<synchronous>, transform_indices = @transform_2, window_bounds = array<i64: 1, 128>}, {pipeline_mode = #tpu.pipeline_mode<synchronous>, transform_indices = @transform_3, window_bounds = array<i64: 1, 128>}, {transform_indices = @transform_4, window_bounds = array<i64: 32, 128>}]} {
    %c0 = arith.constant 0 : index
    %c0_0 = arith.constant 0 : index
    %0 = vector.load %arg2[%c0, %c0_0] : memref<32x1024xbf16, #tpu.memory_space<vmem>>, vector<32x1024xbf16>
    %c0_1 = arith.constant 0 : index
    %c0_2 = arith.constant 0 : index
    %1 = vector.load %arg3[%c0_1, %c0_2] : memref<1024x128xbf16, #tpu.memory_space<vmem>>, vector<1024x128xbf16>
    %cst = arith.constant dense<0.000000e+00> : vector<32x128xf32>
    %2 = tpu.matmul %0, %1, %cst {dimension_numbers = #tpu.dot_dimension_numbers<[1], [0], [0], [1], [0, 0, 1, 1], [], []>} : vector<32x1024xbf16>, vector<1024x128xbf16>, vector<32x128xf32> -> vector<32x128xf32>
    %c0_i32 = arith.constant 0 : i32
    %3 = arith.cmpi eq, %arg0, %c0_i32 : i32
    %c0_i32_3 = arith.constant 0 : i32
    %4 = arith.cmpi eq, %arg1, %c0_i32_3 : i32
    %5 = arith.andi %3, %4 : i1
    %6 = arith.extui %5 : i1 to i32
    %c0_i32_4 = arith.constant 0 : i32
    %7 = arith.cmpi ne, %6, %c0_i32_4 : i32
    scf.if %7 {
      %cst_8 = arith.constant 0.000000e+00 : f32
      %14 = vector.broadcast %cst_8 : f32 to vector<1x128xf32>
      %c0_9 = arith.constant 0 : index
      %c0_10 = arith.constant 0 : index
      %15 = vector.load %arg7[%c0_9, %c0_10] : memref<1x128xf32, #tpu.memory_space<vmem>>, vector<1x128xf32>
      tpu.vector_store %arg7[%c0_9, %c0_10], %14 {strides = array<i32>} : memref<1x128xf32, #tpu.memory_space<vmem>>, vector<1x128xf32>,
      %cst_11 = arith.constant 0.000000e+00 : f32
      %16 = vector.broadcast %cst_11 : f32 to vector<1x128xf32>
      %c0_12 = arith.constant 0 : index
      %c0_13 = arith.constant 0 : index
      %17 = vector.load %arg8[%c0_12, %c0_13] : memref<1x128xf32, #tpu.memory_space<vmem>>, vector<1x128xf32>
      tpu.vector_store %arg8[%c0_12, %c0_13], %16 {strides = array<i32>} : memref<1x128xf32, #tpu.memory_space<vmem>>, vector<1x128xf32>,
    } else {
    }
    %c0_i32_5 = arith.constant 0 : i32
    %8 = arith.cmpi eq, %arg0, %c0_i32_5 : i32
    %9 = arith.extui %8 : i1 to i32
    %c0_i32_6 = arith.constant 0 : i32
    %10 = arith.cmpi ne, %9, %c0_i32_6 : i32
    scf.if %10 {
      %c0_8 = arith.constant 0 : index
      %c0_9 = arith.constant 0 : index
      %14 = vector.load %arg7[%c0_8, %c0_9] : memref<1x128xf32, #tpu.memory_space<vmem>>, vector<1x128xf32>
      %cst_10 = arith.constant dense<0.000000e+00> : vector<128xf32>
      %15 = vector.multi_reduction <add>, %2, %cst_10 [0] : vector<32x128xf32> to vector<128xf32>
      %16 = vector.shape_cast %15 : vector<128xf32> to vector<1x128xf32>
      %17 = arith.addf %14, %16 : vector<1x128xf32>
      %c0_11 = arith.constant 0 : index
      %c0_12 = arith.constant 0 : index
      %18 = vector.load %arg7[%c0_11, %c0_12] : memref<1x128xf32, #tpu.memory_space<vmem>>, vector<1x128xf32>
      tpu.vector_store %arg7[%c0_11, %c0_12], %17 {strides = array<i32>} : memref<1x128xf32, #tpu.memory_space<vmem>>, vector<1x128xf32>,
      %c0_13 = arith.constant 0 : index
      %c0_14 = arith.constant 0 : index
      %19 = vector.load %arg8[%c0_13, %c0_14] : memref<1x128xf32, #tpu.memory_space<vmem>>, vector<1x128xf32>
      %20 = arith.mulf %2, %2 : vector<32x128xf32>
      %cst_15 = arith.constant dense<0.000000e+00> : vector<128xf32>
      %21 = vector.multi_reduction <add>, %20, %cst_15 [0] : vector<32x128xf32> to vector<128xf32>
      %22 = vector.shape_cast %21 : vector<128xf32> to vector<1x128xf32>
      %23 = arith.addf %19, %22 : vector<1x128xf32>
      %c0_16 = arith.constant 0 : index
      %c0_17 = arith.constant 0 : index
      %24 = vector.load %arg8[%c0_16, %c0_17] : memref<1x128xf32, #tpu.memory_space<vmem>>, vector<1x128xf32>
      tpu.vector_store %arg8[%c0_16, %c0_17], %23 {strides = array<i32>} : memref<1x128xf32, #tpu.memory_space<vmem>>, vector<1x128xf32>,
    } else {
    }
    %c1_i32 = arith.constant 1 : i32
    %11 = arith.cmpi eq, %arg0, %c1_i32 : i32
    %12 = arith.extui %11 : i1 to i32
    %c0_i32_7 = arith.constant 0 : i32
    %13 = arith.cmpi ne, %12, %c0_i32_7 : i32
    scf.if %13 {
      %c0_8 = arith.constant 0 : index
      %c0_9 = arith.constant 0 : index
      %14 = vector.load %arg7[%c0_8, %c0_9] : memref<1x128xf32, #tpu.memory_space<vmem>>, vector<1x128xf32>
      %cst_10 = arith.constant 3.125000e-02 : f32
      %15 = vector.broadcast %cst_10 : f32 to vector<1x128xf32>
      %16 = arith.mulf %14, %15 : vector<1x128xf32>
      %c0_11 = arith.constant 0 : index
      %c0_12 = arith.constant 0 : index
      %17 = vector.load %arg8[%c0_11, %c0_12] : memref<1x128xf32, #tpu.memory_space<vmem>>, vector<1x128xf32>
      %cst_13 = arith.constant 3.125000e-02 : f32
      %18 = vector.broadcast %cst_13 : f32 to vector<1x128xf32>
      %19 = arith.mulf %17, %18 : vector<1x128xf32>
      %20 = arith.mulf %16, %16 : vector<1x128xf32>
      %21 = arith.subf %19, %20 : vector<1x128xf32>
      %cst_14 = arith.constant 9.99999974E-6 : f32
      %22 = vector.broadcast %cst_14 : f32 to vector<1x128xf32>
      %23 = arith.addf %21, %22 : vector<1x128xf32>
      %24 = math.rsqrt %23 : vector<1x128xf32>
      %c0_15 = arith.constant 0 : index
      %c0_16 = arith.constant 0 : index
      %25 = vector.load %arg4[%c0_15, %c0_16] : memref<1x128xf32, #tpu.memory_space<vmem>>, vector<1x128xf32>
      %26 = arith.mulf %24, %25 : vector<1x128xf32>
      %c0_17 = arith.constant 0 : index
      %c0_18 = arith.constant 0 : index
      %27 = vector.load %arg5[%c0_17, %c0_18] : memref<1x128xf32, #tpu.memory_space<vmem>>, vector<1x128xf32>
      %28 = arith.mulf %16, %26 : vector<1x128xf32>
      %29 = arith.subf %27, %28 : vector<1x128xf32>
      %30 = vector.broadcast %26 : vector<1x128xf32> to vector<32x128xf32>
      %31 = arith.mulf %2, %30 : vector<32x128xf32>
      %32 = vector.broadcast %29 : vector<1x128xf32> to vector<32x128xf32>
      %33 = arith.addf %31, %32 : vector<32x128xf32>
      %cst_19 = arith.constant 0.000000e+00 : f32
      %34 = vector.broadcast %cst_19 : f32 to vector<32x128xf32>
      %35 = arith.cmpf ogt, %33, %34 : vector<32x128xf32>
      %cst_20 = arith.constant 2.000000e-01 : f32
      %36 = vector.broadcast %cst_20 : f32 to vector<32x128xf32>
      %37 = arith.mulf %36, %33 : vector<32x128xf32>
      %38 = arith.select %35, %33, %37 : vector<32x128xi1>, vector<32x128xf32>
      %c0_21 = arith.constant 0 : index
      %c0_22 = arith.constant 0 : index
      %39 = vector.load %arg6[%c0_21, %c0_22] : memref<32x128xf32, #tpu.memory_space<vmem>>, vector<32x128xf32>
      tpu.vector_store %arg6[%c0_21, %c0_22], %38 {strides = array<i32>} : memref<32x128xf32, #tpu.memory_space<vmem>>, vector<32x128xf32>,
    } else {
    }
    return
  }
  func.func @transform_0(%arg0: i32, %arg1: i32) -> (i32, i32) {
    %c0_i32 = arith.constant 0 : i32
    %c0_i32_0 = arith.constant 0 : i32
    return %arg1, %c0_i32 : i32, i32
  }
  func.func @transform_1(%arg0: i32, %arg1: i32) -> (i32, i32) {
    %c0_i32 = arith.constant 0 : i32
    %c0_i32_0 = arith.constant 0 : i32
    %c0_i32_1 = arith.constant 0 : i32
    return %c0_i32, %c0_i32_0 : i32, i32
  }
  func.func @transform_2(%arg0: i32, %arg1: i32) -> (i32, i32) {
    %c0_i32 = arith.constant 0 : i32
    %c0_i32_0 = arith.constant 0 : i32
    %c0_i32_1 = arith.constant 0 : i32
    return %c0_i32, %c0_i32_0 : i32, i32
  }
  func.func @transform_3(%arg0: i32, %arg1: i32) -> (i32, i32) {
    %c0_i32 = arith.constant 0 : i32
    %c0_i32_0 = arith.constant 0 : i32
    %c0_i32_1 = arith.constant 0 : i32
    return %c0_i32, %c0_i32_0 : i32, i32
  }
  func.func @transform_4(%arg0: i32, %arg1: i32) -> (i32, i32) {
    %0 = arith.muli %arg1, %arg0 : i32
    %c0_i32 = arith.constant 0 : i32
    %c0_i32_0 = arith.constant 0 : i32
    return %0, %c0_i32 : i32, i32
  }
}

module attributes {stable_mosaic.version = 11 : i64} {
  func.func @_matmul_sigmoid_kernel(%arg0: i32, %arg1: memref<2x2048xbf16, #tpu.memory_space<vmem>>, %arg2: memref<2048x1xbf16, #tpu.memory_space<vmem>>, %arg3: memref<2x1xf32, #tpu.memory_space<vmem>>) attributes {dimension_semantics = [#tpu.dimension_semantics<parallel>], iteration_bounds = array<i64: 1>, scalar_prefetch = 0 : i64, scratch_operands = 0 : i64, tpu.core_type = #tpu.core_type<tc>, window_params = [{transform_indices = @transform_0, window_bounds = array<i64: 2, 2048>}, {pipeline_mode = #tpu.pipeline_mode<synchronous>, transform_indices = @transform_1, window_bounds = array<i64: 2048, 1>}, {transform_indices = @transform_2, window_bounds = array<i64: 2, 1>}]} {
    %c0 = arith.constant 0 : index
    %c0_0 = arith.constant 0 : index
    %0 = vector.load %arg1[%c0, %c0_0] : memref<2x2048xbf16, #tpu.memory_space<vmem>>, vector<2x2048xbf16>
    %c0_1 = arith.constant 0 : index
    %c0_2 = arith.constant 0 : index
    %1 = vector.load %arg2[%c0_1, %c0_2] : memref<2048x1xbf16, #tpu.memory_space<vmem>>, vector<2048x1xbf16>
    %cst = arith.constant dense<0.000000e+00> : vector<2x1xf32>
    %2 = tpu.matmul %0, %1, %cst {dimension_numbers = #tpu.dot_dimension_numbers<[1], [0], [0], [1], [0, 0, 1, 1], [], []>} : vector<2x2048xbf16>, vector<2048x1xbf16>, vector<2x1xf32> -> vector<2x1xf32>
    %3 = arith.negf %2 : vector<2x1xf32>
    %4 = math.exp %3 : vector<2x1xf32>
    %cst_3 = arith.constant 1.000000e+00 : f32
    %5 = vector.broadcast %cst_3 : f32 to vector<2x1xf32>
    %6 = arith.addf %5, %4 : vector<2x1xf32>
    %7 = arith.divf %5, %6 : vector<2x1xf32>
    %c0_4 = arith.constant 0 : index
    %c0_5 = arith.constant 0 : index
    %8 = vector.load %arg3[%c0_4, %c0_5] : memref<2x1xf32, #tpu.memory_space<vmem>>, vector<2x1xf32>
    tpu.vector_store %arg3[%c0_4, %c0_5], %7 {strides = array<i32>} : memref<2x1xf32, #tpu.memory_space<vmem>>, vector<2x1xf32>,
    return
  }
  func.func @transform_0(%arg0: i32) -> (i32, i32) {
    %c0_i32 = arith.constant 0 : i32
    %c0_i32_0 = arith.constant 0 : i32
    return %arg0, %c0_i32 : i32, i32
  }
  func.func @transform_1(%arg0: i32) -> (i32, i32) {
    %c0_i32 = arith.constant 0 : i32
    %c0_i32_0 = arith.constant 0 : i32
    %c0_i32_1 = arith.constant 0 : i32
    return %c0_i32, %c0_i32_0 : i32, i32
  }
  func.func @transform_2(%arg0: i32) -> (i32, i32) {
    %c0_i32 = arith.constant 0 : i32
    %c0_i32_0 = arith.constant 0 : i32
    return %arg0, %c0_i32 : i32, i32
  }
}

</mosaic_0001>

<bundles_post_ra>
// kernel: discriminator32_forward.4
= control target key start
LH: loop header
LB: loop body
LE: loop exit
PB: predicated region body
PF: predicated region fallthrough
CT: control target
= control target key end

     0   :  { %s1991_s15 = smov 0   ;;  %s1993_s16 = smov 0   ;;  %s3070_s0 = inlined_call_operand.vmem [shape: bf16[512,48], index: 0, kind: input, shape index: {}]   ;;  %s3071_s1 = inlined_call_operand.vmem [shape: bf16[48,32], index: 1, kind: input, shape index: {}]   ;;  %s3072_s2 = inlined_call_operand.vmem [shape: f32[1,32], index: 2, kind: input, shape index: {}]   ;;  %s3073_s3 = inlined_call_operand.vmem [shape: f32[1,32], index: 3, kind: input, shape index: {}]   ;;  %s3074_s4 = inlined_call_operand.vmem [shape: f32[512,32], index: 4, kind: output, shape index: {}]  }
   0x1   :  { %s1995_s17 = smov 0  }
   0x2 LB: > { %s26_s18 = sadd.s32 1, %s1959_s16  ;;  %p1692_p0 = scmp.ge.s32.totalorder %s1963_s17, 1  ;;  %s1963_s17 = sphi %s1995_s17, %s14_s17   ;;  %s1959_s16 = sphi %s1993_s16, %s3192_s16   ;;  %s1955_s15 = sphi %s1991_s15, %s3191_s15  }
   0x3   : > { %p28_p1 = scmp.ge.s32.totalorder %s26_s18, 2  ;;  %p177_p2 = scmp.lt.s32.totalorder %s1963_s17, 3 }
   0x5   : > { %s3194_s18 = smov (%p28_p1, %s26_s18), 0  ;;  %p178_p3 = pnand %p1692_p0, %p177_p2 }
   0x7   : > { %181 = sbr.rel (%p178_p3) target bundleno = 588 (0x24c), region = 36 }
   0xe   : > { %v1904_v0 = vld [vmem:[%s3071_s1] sm:$0xff]   ;;  %v1905_v1 = vld [vmem:[%s3071_s1 + $0x8] sm:$0xff]   ;;  %v1906_v2 = vld [vmem:[%s3071_s1 + $0x10] sm:$0xff]   ;;  %vm467_vm0 = vcmask 392192   ;;  %p853_p4 = scmp.eq.s32.totalorder %s1955_s15, 0 }
   0xf   : > { %1803 = vmatprep.subr.bf16.mxu0 %v1904_v0  ;;  %1873 = vmatprep.subr.bf16.mxu1 %v1904_v0  ;;  %v1907_v3 = vld [vmem:[%s3070_s0] sm:$0xff]   ;;  %v1909_v5 = vld [vmem:[%s3070_s0 + $0x8] sm:$0xff]   ;;  %v1911_v7 = vld [vmem:[%s3070_s0 + $0x10] sm:$0xff]   ;;  %vm859_vm1 = vcmask (%p853_p4), 253952  }
  0x10   : > { %1804 = vmatpush3.bf16.msra.mxu0 %v1904_v0  ;;  %1876 = vmatpush3.bf16.msra.mxu1 %v1904_v0  ;;  %v1908_v4 = vld [vmem:[%s3070_s0 + $0x80] sm:$0xff]   ;;  %v1910_v6 = vld [vmem:[%s3070_s0 + $0x88] sm:$0xff]   ;;  %v1912_v8 = vld [vmem:[%s3070_s0 + $0x90] sm:$0xff]  }
  0x11   : > { %1805 = vmatprep.subr.bf16.mxu0 %v1905_v1  ;;  %1874 = vmatprep.subr.bf16.mxu1 %v1905_v1  ;;  %v1913_v9 = vld [vmem:[%s3070_s0 + $0x18] sm:$0xff]   ;;  %v1915_v11 = vld [vmem:[%s3070_s0 + $0x20] sm:$0xff]   ;;  %v1917_v13 = vld [vmem:[%s3070_s0 + $0x28] sm:$0xff]  }
  0x12   : > { %1809 = vmatprep.mubr.msk.bf16.mxu0 %vm467_vm0, %v1907_v3  ;;  %1841 = vmatprep.mubr.msk.bf16.mxu1 %vm467_vm0, %v1908_v4  ;;  %v1914_v10 = vld [vmem:[%s3070_s0 + $0x98] sm:$0xff]   ;;  %v1916_v12 = vld [vmem:[%s3070_s0 + $0xa0] sm:$0xff]   ;;  %v1918_v14 = vld [vmem:[%s3070_s0 + $0xa8] sm:$0xff]  }
  0x13   : > { %v1919_v15 = vld [vmem:[%s3070_s0 + $0x30] sm:$0xff]   ;;  %v1921_v17 = vld [vmem:[%s3070_s0 + $0x38] sm:$0xff]   ;;  %v1923_v19 = vld [vmem:[%s3070_s0 + $0x40] sm:$0xff]  }
  0x14   : > { %1806 = vmatpush3.bf16.msra.mxu0 %v1905_v1  ;;  %1877 = vmatpush3.bf16.msra.mxu1 %v1905_v1  ;;  %v1920_v16 = vld [vmem:[%s3070_s0 + $0xb0] sm:$0xff]   ;;  %v1922_v18 = vld [vmem:[%s3070_s0 + $0xb8] sm:$0xff]   ;;  %v1924_v20 = vld [vmem:[%s3070_s0 + $0xc0] sm:$0xff]  }
  0x15   : > { %1807 = vmatprep.subr.bf16.mxu0 %v1906_v2  ;;  %1875 = vmatprep.subr.bf16.mxu1 %v1906_v2  ;;  %v1925_v21 = vld [vmem:[%s3070_s0 + $0x48] sm:$0xff]   ;;  %v1927_v23 = vld [vmem:[%s3070_s0 + $0x50] sm:$0xff]   ;;  %v1929_v25 = vld [vmem:[%s3070_s0 + $0x58] sm:$0xff]  }
  0x16   : > { %v1926_v22 = vld [vmem:[%s3070_s0 + $0xc8] sm:$0xff]   ;;  %v1928_v24 = vld [vmem:[%s3070_s0 + $0xd0] sm:$0xff]   ;;  %v1930_v26 = vld [vmem:[%s3070_s0 + $0xd8] sm:$0xff]  }
  0x17   : > { %v1931_v27 = vld [vmem:[%s3070_s0 + $0x60] sm:$0xff]   ;;  %v1933_v29 = vld [vmem:[%s3070_s0 + $0x68] sm:$0xff]   ;;  %v1935_v31 = vld [vmem:[%s3070_s0 + $0x70] sm:$0xff]  }
  0x18   : > { %1808 = vmatpush3.bf16.msra.mxu0 %v1906_v2  ;;  %1878 = vmatpush3.bf16.msra.mxu1 %v1906_v2  ;;  %v1932_v28 = vld [vmem:[%s3070_s0 + $0xe0] sm:$0xff]   ;;  %v1934_v30 = vld [vmem:[%s3070_s0 + $0xe8] sm:$0xff]   ;;  %v1936_v32 = vld [vmem:[%s3070_s0 + $0xf0] sm:$0xff]  }
  0x19   : > { %v1937_v33 = vld [vmem:[%s3070_s0 + $0x78] sm:$0xff]  }
  0x1a   : > { %v1938_v34 = vld [vmem:[%s3070_s0 + $0xf8] sm:$0xff]  }
  0x1b   : > { %1810 = vmatmul.mubr.msk.bf16.vlgmr.msra.gmra.mrb[0].mxu0 %vm467_vm0, %v1909_v5  ;;  %1842 = vmatmul.mubr.msk.bf16.vlgmr.msra.gmra.mrb[0].mxu1 %vm467_vm0, %v1910_v6 }
  0x1c   : > { %1813 = vmatprep.mubr.msk.bf16.mxu0 %vm467_vm0, %v1911_v7  ;;  %1845 = vmatprep.mubr.msk.bf16.mxu1 %vm467_vm0, %v1912_v8 }
  0x23   : > { %1814 = vmatmul.mubr.msk.bf16.gmra.mrb[4].mxu0 %vm467_vm0, %v1913_v9  ;;  %1846 = vmatmul.mubr.msk.bf16.gmra.mrb[4].mxu1 %vm467_vm0, %v1914_v10 }
  0x24   : > { %1817 = vmatprep.mubr.msk.bf16.mxu0 %vm467_vm0, %v1915_v11  ;;  %1849 = vmatprep.mubr.msk.bf16.mxu1 %vm467_vm0, %v1916_v12 }
  0x2b   : > { %1818 = vmatmul.mubr.msk.bf16.gmra.mrb[8].mxu0 %vm467_vm0, %v1917_v13  ;;  %1850 = vmatmul.mubr.msk.bf16.gmra.mrb[8].mxu1 %vm467_vm0, %v1918_v14 }
  0x2c   : > { %1821 = vmatprep.mubr.msk.bf16.mxu0 %vm467_vm0, %v1919_v15  ;;  %1853 = vmatprep.mubr.msk.bf16.mxu1 %vm467_vm0, %v1920_v16 }
  0x33   : > { %1822 = vmatmul.mubr.msk.bf16.gmra.mrb[12].mxu0 %vm467_vm0, %v1921_v17  ;;  %1854 = vmatmul.mubr.msk.bf16.gmra.mrb[12].mxu1 %vm467_vm0, %v1922_v18 }
  0x34   : > { %1825 = vmatprep.mubr.msk.bf16.mxu0 %vm467_vm0, %v1923_v19  ;;  %1857 = vmatprep.mubr.msk.bf16.mxu1 %vm467_vm0, %v1924_v20 }
  0x3b   : > { %1826 = vmatmul.mubr.msk.bf16.gmra.mrb[16].mxu0 %vm467_vm0, %v1925_v21  ;;  %1858 = vmatmul.mubr.msk.bf16.gmra.mrb[16].mxu1 %vm467_vm0, %v1926_v22 }
  0x3c   : > { %1829 = vmatprep.mubr.msk.bf16.mxu0 %vm467_vm0, %v1927_v23  ;;  %1861 = vmatprep.mubr.msk.bf16.mxu1 %vm467_vm0, %v1928_v24 }
  0x43   : > { %1830 = vmatmul.mubr.msk.bf16.gmra.mrb[20].mxu0 %vm467_vm0, %v1929_v25  ;;  %1862 = vmatmul.mubr.msk.bf16.gmra.mrb[20].mxu1 %vm467_vm0, %v1930_v26 }
  0x44   : > { %1833 = vmatprep.mubr.msk.bf16.mxu0 %vm467_vm0, %v1931_v27  ;;  %1865 = vmatprep.mubr.msk.bf16.mxu1 %vm467_vm0, %v1932_v28 }
  0x4b   : > { %1834 = vmatmul.mubr.msk.bf16.gmra.mrb[24].mxu0 %vm467_vm0, %v1933_v29  ;;  %1866 = vmatmul.mubr.msk.bf16.gmra.mrb[24].mxu1 %vm467_vm0, %v1934_v30 }
  0x4c   : > { %1837 = vmatprep.mubr.msk.bf16.mxu0 %vm467_vm0, %v1935_v31  ;;  %1869 = vmatprep.mubr.msk.bf16.mxu1 %vm467_vm0, %v1936_v32 }
  0x53   : > { %1838 = vmatmul.mubr.msk.bf16.gmra.mrb[28].mxu0 %vm467_vm0, %v1937_v33  ;;  %1870 = vmatmul.mubr.msk.bf16.gmra.mrb[28].mxu1 %vm467_vm0, %v1938_v34 }
  0xee   : > { %v2149_v35 = vpop.f32.mrb[0].mxu0  ;;  %v2151_v36 = vpop.f32.mrb[0].mxu1 }
  0xef   : > { %3109 = vst [vmem:[#allocation4_spill] sm:$0xff] %v2149_v35  ;;  %3110 = vst [vmem:[#allocation5_spill] sm:$0xff] %v2151_v36  ;;  %v2153_v37 = vpop.f32.mrb[1].mxu0  ;;  %v2155_v38 = vpop.f32.mrb[1].mxu1 }
  0xf0   : > { %3111 = vst [vmem:[#allocation6_spill] sm:$0xff] %v2153_v37  ;;  %3112 = vst [vmem:[#allocation7_spill] sm:$0xff] %v2155_v38  ;;  %v2157_v39 = vpop.f32.mrb[2].mxu0  ;;  %v2159_v40 = vpop.f32.mrb[2].mxu1 }
  0xf1   : > { %3113 = vst [vmem:[#allocation8_spill] sm:$0xff] %v2157_v39  ;;  %3114 = vst [vmem:[#allocation9_spill] sm:$0xff] %v2159_v40  ;;  %v2161_v41 = vpop.f32.mrb[3].mxu0  ;;  %v2163_v42 = vpop.f32.mrb[3].mxu1 }
  0xf2   : > { %3115 = vst [vmem:[#allocation10_spill] sm:$0xff] %v2161_v41  ;;  %3116 = vst [vmem:[#allocation11_spill] sm:$0xff] %v2163_v42 }
  0xf6   : > { %v2165_v43 = vpop.f32.mrb[4].mxu0  ;;  %v2167_v44 = vpop.f32.mrb[4].mxu1 }
  0xf7   : > { %3117 = vst [vmem:[#allocation12_spill] sm:$0xff] %v2167_v44  ;;  %v2169_v45 = vpop.f32.mrb[5].mxu0  ;;  %v2171_v46 = vpop.f32.mrb[5].mxu1 }
  0xf8   : > { %3118 = vst [vmem:[#allocation13_spill] sm:$0xff] %v2169_v45  ;;  %3119 = vst [vmem:[#allocation14_spill] sm:$0xff] %v2171_v46  ;;  %v2173_v47 = vpop.f32.mrb[6].mxu0  ;;  %v2175_v48 = vpop.f32.mrb[6].mxu1 }
  0xf9   : > { %3120 = vst [vmem:[#allocation15_spill] sm:$0xff] %v2175_v48  ;;  %v2177_v49 = vpop.f32.mrb[7].mxu0  ;;  %v2179_v50 = vpop.f32.mrb[7].mxu1 }
  0xfa   : > { %3121 = vst [vmem:[#allocation16_spill] sm:$0xff] %v2179_v50 }
  0xfe   : > { %v2181_v51 = vpop.f32.mrb[8].mxu0  ;;  %v2183_v52 = vpop.f32.mrb[8].mxu1 }
  0xff   : > { %3122 = vst [vmem:[#allocation17_spill] sm:$0xff] %v2183_v52  ;;  %v2185_v53 = vpop.f32.mrb[9].mxu0  ;;  %v2187_v54 = vpop.f32.mrb[9].mxu1 }
 0x100   : > { %3123 = vst [vmem:[#allocation18_spill] sm:$0xff] %v2187_v54  ;;  %v2189_v55 = vpop.f32.mrb[10].mxu0  ;;  %v2191_v56 = vpop.f32.mrb[10].mxu1 }
 0x101   : > { %3124 = vst [vmem:[#allocation19_spill] sm:$0xff] %v2191_v56  ;;  %v2193_v57 = vpop.f32.mrb[11].mxu0  ;;  %v2195_v58 = vpop.f32.mrb[11].mxu1 }
 0x102   : > { %3125 = vst [vmem:[#allocation20_spill] sm:$0xff] %v2195_v58 }
 0x106   : > { %v2197_v59 = vpop.f32.mrb[12].mxu0  ;;  %v2199_v60 = vpop.f32.mrb[12].mxu1 }
 0x107   : > { %3126 = vst [vmem:[#allocation21_spill] sm:$0xff] %v2199_v60  ;;  %v2201_v61 = vpop.f32.mrb[13].mxu0  ;;  %v2203_v62 = vpop.f32.mrb[13].mxu1 }
 0x108   : > { %3127 = vst [vmem:[#allocation22_spill] sm:$0xff] %v2203_v62  ;;  %v2205_v63 = vpop.f32.mrb[14].mxu0  ;;  %v2207_v0 = vpop.f32.mrb[14].mxu1 }
 0x109   : > { %v2209_v1 = vpop.f32.mrb[15].mxu0  ;;  %v2211_v2 = vpop.f32.mrb[15].mxu1 }
 0x10a   : > { %3128 = vst [vmem:[#allocation23_spill] sm:$0xff] %v2211_v2 }
 0x10e   : > { %v2213_v3 = vpop.f32.mrb[16].mxu0  ;;  %v2215_v4 = vpop.f32.mrb[16].mxu1 }
 0x10f   : > { %3129 = vst [vmem:[#allocation24_spill] sm:$0xff] %v2215_v4  ;;  %v2217_v5 = vpop.f32.mrb[17].mxu0  ;;  %v2219_v6 = vpop.f32.mrb[17].mxu1 }
 0x110   : > { %v2221_v7 = vpop.f32.mrb[18].mxu0  ;;  %v2223_v8 = vpop.f32.mrb[18].mxu1 }
 0x111   : > { %3130 = vst [vmem:[#allocation25_spill] sm:$0xff] %v2223_v8  ;;  %v2225_v9 = vpop.f32.mrb[19].mxu0  ;;  %v2227_v10 = vpop.f32.mrb[19].mxu1 }
 0x116   : > { %v2229_v11 = vpop.f32.mrb[20].mxu0  ;;  %v2231_v12 = vpop.f32.mrb[20].mxu1 }
 0x117   : > { %3131 = vst [vmem:[#allocation26_spill] sm:$0xff] %v2231_v12  ;;  %v2233_v13 = vpop.f32.mrb[21].mxu0  ;;  %v2235_v14 = vpop.f32.mrb[21].mxu1 }
 0x118   : > { %3132 = vst [vmem:[#allocation27_spill] sm:$0xff] %v2235_v14  ;;  %v2237_v15 = vpop.f32.mrb[22].mxu0  ;;  %v2239_v16 = vpop.f32.mrb[22].mxu1 }
 0x119   : > { %3133 = vst [vmem:[#allocation28_spill] sm:$0xff] %v2239_v16  ;;  %v2241_v17 = vpop.f32.mrb[23].mxu0  ;;  %v2243_v18 = vpop.f32.mrb[23].mxu1 }
 0x11a   : > { %3134 = vst [vmem:[#allocation29_spill] sm:$0xff] %v2243_v18 }
 0x11e   : > { %v2245_v19 = vpop.f32.mrb[24].mxu0  ;;  %v2247_v20 = vpop.f32.mrb[24].mxu1 }
 0x11f   : > { %3135 = vst [vmem:[#allocation30_spill] sm:$0xff] %v2247_v20  ;;  %v2249_v21 = vpop.f32.mrb[25].mxu0  ;;  %v2251_v22 = vpop.f32.mrb[25].mxu1 }
 0x120   : > { %3136 = vst [vmem:[#allocation31_spill] sm:$0xff] %v2251_v22  ;;  %v2253_v23 = vpop.f32.mrb[26].mxu0  ;;  %v2255_v24 = vpop.f32.mrb[26].mxu1 }
 0x121   : > { %3137 = vst [vmem:[#allocation32_spill] sm:$0xff] %v2255_v24  ;;  %v2257_v25 = vpop.f32.mrb[27].mxu0  ;;  %v2259_v26 = vpop.f32.mrb[27].mxu1  ;;  %v1965_v24 = vmov (%p853_p4), 0.0  }
 0x122   : > { %3138 = vst [vmem:[#allocation33_spill] sm:$0xff] %v2259_v26  ;;  %860 = vst.msk [vmem:[#allocation2] sm:$0x1] (%p853_p4), %vm859_vm1, %v1965_v24 }
 0x123   : > { %861 = vst.msk [vmem:[#allocation3] sm:$0x1] (%p853_p4), %vm859_vm1, %v1965_v24 }
 0x124   : > { %858 = sbr.rel (!%p853_p4) target bundleno = 299 (0x12b), region = 40 }
 0x126   : > { %v2261_v27 = vpop.f32.mrb[28].mxu0  ;;  %v2263_v28 = vpop.f32.mrb[28].mxu1 }
 0x127   : > { %3139 = vst [vmem:[#allocation34_spill] sm:$0xff] %v2263_v28  ;;  %v2265_v29 = vpop.f32.mrb[29].mxu0  ;;  %v2267_v30 = vpop.f32.mrb[29].mxu1 }
 0x128   : > { %3140 = vst [vmem:[#allocation35_spill] sm:$0xff] %v2267_v30  ;;  %v2269_v31 = vpop.f32.mrb[30].mxu0  ;;  %v2271_v32 = vpop.f32.mrb[30].mxu1 }
 0x129   : > { %3141 = vst [vmem:[#allocation36_spill] sm:$0xff] %v2271_v32  ;;  %v2273_v33 = vpop.f32.mrb[31].mxu0  ;;  %v2275_v34 = vpop.f32.mrb[31].mxu1 }
 0x12a   : > { %3142 = vst [vmem:[#allocation37_spill] sm:$0xff] %v2275_v34 }
 0x12b PF: > { %p1761_p5 = scmp.ne.s32.totalorder %s1955_s15, 0 }
 0x12c   : > { %vm866_vm2 = vcmask (!%p1761_p5), 261120   ;;  %vm1001_vm3 = vcmask (!%p1761_p5), 253952  }
 0x12d   : > { %864 = sbr.rel (%p1761_p5) target bundleno = 475 (0x1db), region = 44  ;;  %v867_v28 = vsel (!%p1761_p5), %vm866_vm2, %v2153_v37, 0.0  ;;  %v868_v32 = vsel (!%p1761_p5), %vm866_vm2, %v2161_v41, 0.0  ;;  %v870_v34 = vsel (!%p1761_p5), %vm866_vm2, %v2149_v35, 0.0  ;;  %v872_v20 = vsel (!%p1761_p5), %vm866_vm2, %v2157_v39, 0.0 }
 0x12e   : > { %v869_v30 = vadd.f32 (!%p1761_p5), %v868_v32, %v867_v28  ;;  %v874_v24 = vsel (!%p1761_p5), %vm866_vm2, %v2169_v45, 0.0  ;;  %v876_v16 = vsel (!%p1761_p5), %vm866_vm2, %v2177_v49, 0.0  ;;  %v878_v18 = vsel (!%p1761_p5), %vm866_vm2, %v2165_v43, 0.0 }
 0x12f   : > { %v880_v8 = vsel (!%p1761_p5), %vm866_vm2, %v2173_v47, 0.0  ;;  %v882_v32 = vsel (!%p1761_p5), %vm866_vm2, %v2185_v53, 0.0 }
 0x130   : > { %v871_v26 = vadd.f32 (!%p1761_p5), %v870_v34, %v869_v30  ;;  %v884_v34 = vsel (!%p1761_p5), %vm866_vm2, %v2193_v57, 0.0 }
 0x132   : > { %v873_v22 = vadd.f32 (!%p1761_p5), %v872_v20, %v871_v26  ;;  %v886_v26 = vsel (!%p1761_p5), %vm866_vm2, %v2181_v51, 0.0 }
 0x134   : > { %v875_v12 = vadd.f32 %v874_v24, %v873_v22  ;;  %v888_v24 = vsel %vm866_vm2, %v2189_v55, 0.0 }
 0x136   : > { %v877_v14 = vadd.f32 %v876_v16, %v875_v12  ;;  %v890_v16 = vsel %vm866_vm2, %v2201_v61, 0.0 }
 0x138   : > { %v879_v28 = vadd.f32 %v878_v18, %v877_v14  ;;  %v892_v18 = vsel %vm866_vm2, %v2209_v1, 0.0 }
 0x13a   : > { %v881_v30 = vadd.f32 %v880_v8, %v879_v28  ;;  %v894_v28 = vsel %vm866_vm2, %v2197_v59, 0.0 }
 0x13c   : > { %v883_v20 = vadd.f32 %v882_v32, %v881_v30  ;;  %v896_v30 = vsel %vm866_vm2, %v2205_v63, 0.0 }
 0x13e   : > { %v885_v22 = vadd.f32 %v884_v34, %v883_v20  ;;  %v898_v20 = vsel %vm866_vm2, %v2217_v5, 0.0 }
 0x140   : > { %v887_v12 = vadd.f32 %v886_v26, %v885_v22  ;;  %v900_v22 = vsel %vm866_vm2, %v2225_v9, 0.0 }
 0x142   : > { %v889_v14 = vadd.f32 %v888_v24, %v887_v12  ;;  %v902_v12 = vsel %vm866_vm2, %v2213_v3, 0.0 }
 0x144   : > { %v891_v8 = vadd.f32 %v890_v16, %v889_v14  ;;  %v1004_v16 = vmul.f32 %v2153_v37, %v2153_v37  ;;  %v1005_v14 = vmul.f32 %v2161_v41, %v2161_v41  ;;  %v908_v37 = vsel %vm866_vm2, %v2241_v17, 0.0 }
 0x146   : > { %v893_v32 = vadd.f32 %v892_v18, %v891_v8  ;;  %v1006_v18 = vmul.f32 %v2149_v35, %v2149_v35  ;;  %v1069_v41 = vsel %vm866_vm2, %v1005_v14, 0.0 }
 0x148   : > { %v895_v34 = vadd.f32 %v894_v28, %v893_v32  ;;  %v904_v28 = vsel %vm866_vm2, %v2221_v7, 0.0  ;;  %v1007_v32 = vmul.f32 %v2157_v39, %v2157_v39  ;;  %v1071_v35 = vsel %vm866_vm2, %v1006_v18, 0.0 }
 0x14a   : > { %v897_v26 = vadd.f32 %v896_v30, %v895_v34  ;;  %v906_v34 = vsel %vm866_vm2, %v2233_v13, 0.0 }
 0x14c   : > { %v899_v24 = vadd.f32 %v898_v20, %v897_v26  ;;  %v1008_v20 = vmul.f32 %v2169_v45, %v2169_v45  ;;  %v1068_v26 = vsel %vm866_vm2, %v1004_v16, 0.0  ;;  %v910_v45 = vsel %vm866_vm2, %v2229_v11, 0.0 }
 0x14d   : > { %v1010_v16 = vmul.f32 %v2165_v43, %v2165_v43 }
 0x14e   : > { %v901_v8 = vadd.f32 %v900_v22, %v899_v24  ;;  %v1070_v24 = vadd.f32 %v1069_v41, %v1068_v26  ;;  %v1075_v14 = vsel %vm866_vm2, %v1008_v20, 0.0  ;;  %v914_v26 = vsel %vm866_vm2, %v2249_v21, 0.0 }
 0x14f   : > { %v1079_v20 = vsel %vm866_vm2, %v1010_v16, 0.0 }
 0x150   : > { %v903_v30 = vadd.f32 %v902_v12, %v901_v8  ;;  %v1009_v12 = vmul.f32 %v2177_v49, %v2177_v49  ;;  %v1073_v8 = vsel %vm866_vm2, %v1007_v32, 0.0  ;;  %v1072_v4 = vadd.f32 %v1071_v35, %v1070_v24 }
 0x151   : > { %v1013_v24 = vmul.f32 %v2193_v57, %v2193_v57 }
 0x152   : > { %v905_v22 = vadd.f32 %v904_v28, %v903_v30  ;;  %v1074_v41 = vadd.f32 %v1073_v8, %v1072_v4  ;;  %v912_v28 = vsel %vm866_vm2, %v2237_v15, 0.0  ;;  %v1011_v30 = vmul.f32 %v2173_v47, %v2173_v47 }
 0x153   : > { %v1077_v32 = vsel %vm866_vm2, %v1009_v12, 0.0  ;;  %v916_v4 = vsel %vm866_vm2, %v2257_v25, 0.0 }
 0x154   : > { %v907_v39 = vadd.f32 %v906_v34, %v905_v22  ;;  %v1076_v35 = vadd.f32 %v1075_v14, %v1074_v41  ;;  %v1012_v22 = vmul.f32 %v2185_v53, %v2185_v53  ;;  %v1081_v12 = vsel %vm866_vm2, %v1011_v30, 0.0 }
 0x155   : > { %v918_v14 = vsel %vm866_vm2, %v2245_v19, 0.0  ;;  %v1085_v30 = vsel %vm866_vm2, %v1013_v24, 0.0 }
 0x156   : > { %v909_v18 = vadd.f32 %v908_v37, %v907_v39  ;;  %v1078_v39 = vadd.f32 %v1077_v32, %v1076_v35  ;;  %v1083_v16 = vsel %vm866_vm2, %v1012_v22, 0.0  ;;  %v920_v32 = vsel %vm866_vm2, %v2253_v23, 0.0 }
 0x158   : > { %v911_v34 = vadd.f32 %v910_v45, %v909_v18  ;;  %v1080_v8 = vadd.f32 %v1079_v20, %v1078_v39  ;;  %v1014_v18 = vmul.f32 %v2181_v51, %v2181_v51  ;;  %v922_v20 = vsel %vm866_vm2, %v2265_v29, 0.0 }
 0x15a   : > { %v913_v37 = vadd.f32 %v912_v28, %v911_v34  ;;  %v1082_v28 = vadd.f32 %v1081_v12, %v1080_v8  ;;  %v1015_v34 = vmul.f32 %v2189_v55, %v2189_v55  ;;  %v1087_v22 = vsel %vm866_vm2, %v1014_v18, 0.0 }
 0x15b   : > { %v924_v12 = vsel %vm866_vm2, %v2273_v33, 0.0 }
 0x15c   : > { %v915_v45 = vadd.f32 %v914_v26, %v913_v37  ;;  %v1084_v26 = vadd.f32 %v1083_v16, %v1082_v28  ;;  %v1016_v37 = vmul.f32 %v2201_v61, %v2201_v61  ;;  %v1089_v24 = vsel %vm866_vm2, %v1015_v34, 0.0 }
 0x15d   : > { %v926_v16 = vsel %vm866_vm2, %v2261_v27, 0.0 }
 0x15e   : > { %v917_v41 = vadd.f32 %v916_v4, %v915_v45  ;;  %v1086_v4 = vadd.f32 %v1085_v30, %v1084_v26  ;;  %v1017_v45 = vmul.f32 %v2209_v1, %v2209_v1  ;;  %v1091_v18 = vsel %vm866_vm2, %v1016_v37, 0.0 }
 0x15f   : > { %v928_v30 = vsel %vm866_vm2, %v2269_v31, 0.0 }
 0x160   : > { %v919_v35 = vadd.f32 %v918_v14, %v917_v41  ;;  %v1088_v14 = vadd.f32 %v1087_v22, %v1086_v4  ;;  %v1018_v41 = vmul.f32 %v2197_v59, %v2197_v59  ;;  %v1093_v34 = vsel %vm866_vm2, %v1017_v45, 0.0 }
 0x161   : > { %v930_v22 = vsel %vm866_vm2, %v2155_v38, 0.0 }
 0x162   : > { %v921_v39 = vadd.f32 %v920_v32, %v919_v35  ;;  %v1090_v32 = vadd.f32 %v1089_v24, %v1088_v14  ;;  %v1019_v35 = vmul.f32 %v2205_v63, %v2205_v63  ;;  %v1095_v37 = vsel %vm866_vm2, %v1018_v41, 0.0 }
 0x163   : > { %v932_v24 = vsel %vm866_vm2, %v2163_v42, 0.0 }
 0x164   : > { %v923_v8 = vadd.f32 %v922_v20, %v921_v39  ;;  %v1092_v20 = vadd.f32 %v1091_v18, %v1090_v32  ;;  %v1020_v39 = vmul.f32 %v2217_v5, %v2217_v5  ;;  %v1097_v45 = vsel %vm866_vm2, %v1019_v35, 0.0 }
 0x165   : > { %v934_v18 = vsel %vm866_vm2, %v2151_v36, 0.0 }
 0x166   : > { %v925_v28 = vadd.f32 %v924_v12, %v923_v8  ;;  %v1094_v12 = vadd.f32 %v1093_v34, %v1092_v20  ;;  %v1021_v8 = vmul.f32 %v2225_v9, %v2225_v9  ;;  %v1099_v41 = vsel %vm866_vm2, %v1020_v39, 0.0 }
 0x167   : > { %v936_v34 = vsel %vm866_vm2, %v2159_v40, 0.0 }
 0x168   : > { %v927_v26 = vadd.f32 %v926_v16, %v925_v28  ;;  %v1096_v16 = vadd.f32 %v1095_v37, %v1094_v12  ;;  %v1022_v28 = vmul.f32 %v2213_v3, %v2213_v3  ;;  %v1101_v35 = vsel %vm866_vm2, %v1021_v8, 0.0 }
 0x169   : > { %v938_v37 = vsel %vm866_vm2, %v2171_v46, 0.0 }
 0x16a   : > { %v929_v4 = vadd.f32 %v928_v30, %v927_v26  ;;  %v1098_v30 = vadd.f32 %v1097_v45, %v1096_v16  ;;  %v1023_v26 = vmul.f32 %v2221_v7, %v2221_v7  ;;  %v1103_v39 = vsel %vm866_vm2, %v1022_v28, 0.0 }
 0x16b   : > { %v940_v45 = vsel %vm866_vm2, %v2179_v50, 0.0 }
 0x16c   : > { %v931_v14 = vadd.f32 %v930_v22, %v929_v4  ;;  %v1100_v22 = vadd.f32 %v1099_v41, %v1098_v30  ;;  %v1024_v4 = vmul.f32 %v2233_v13, %v2233_v13  ;;  %v1105_v8 = vsel %vm866_vm2, %v1023_v26, 0.0 }
 0x16d   : > { %v942_v41 = vsel %vm866_vm2, %v2167_v44, 0.0 }
 0x16e   : > { %v933_v32 = vadd.f32 %v932_v24, %v931_v14  ;;  %v1102_v24 = vadd.f32 %v1101_v35, %v1100_v22  ;;  %v1025_v14 = vmul.f32 %v2241_v17, %v2241_v17  ;;  %v1107_v28 = vsel %vm866_vm2, %v1024_v4, 0.0 }
 0x16f   : > { %v944_v35 = vsel %vm866_vm2, %v2175_v48, 0.0 }
 0x170   : > { %v935_v20 = vadd.f32 %v934_v18, %v933_v32  ;;  %v1104_v18 = vadd.f32 %v1103_v39, %v1102_v24  ;;  %v1026_v32 = vmul.f32 %v2229_v11, %v2229_v11  ;;  %v1109_v26 = vsel %vm866_vm2, %v1025_v14, 0.0 }
 0x171   : > { %v946_v39 = vsel %vm866_vm2, %v2187_v54, 0.0 }
 0x172   : > { %v937_v12 = vadd.f32 %v936_v34, %v935_v20  ;;  %v1106_v34 = vadd.f32 %v1105_v8, %v1104_v18  ;;  %v1027_v20 = vmul.f32 %v2237_v15, %v2237_v15  ;;  %v1111_v4 = vsel %vm866_vm2, %v1026_v32, 0.0 }
 0x173   : > { %v948_v8 = vsel %vm866_vm2, %v2195_v58, 0.0 }
 0x174   : > { %v939_v16 = vadd.f32 %v938_v37, %v937_v12  ;;  %v1108_v37 = vadd.f32 %v1107_v28, %v1106_v34  ;;  %v1028_v12 = vmul.f32 %v2249_v21, %v2249_v21  ;;  %v1113_v14 = vsel %vm866_vm2, %v1027_v20, 0.0 }
 0x175   : > { %v950_v28 = vsel %vm866_vm2, %v2183_v52, 0.0 }
 0x176   : > { %v941_v30 = vadd.f32 %v940_v45, %v939_v16  ;;  %v1110_v45 = vadd.f32 %v1109_v26, %v1108_v37  ;;  %v1029_v16 = vmul.f32 %v2257_v25, %v2257_v25  ;;  %v1115_v32 = vsel %vm866_vm2, %v1028_v12, 0.0 }
 0x177   : > { %v952_v26 = vsel %vm866_vm2, %v2191_v56, 0.0 }
 0x178   : > { %v943_v22 = vadd.f32 %v942_v41, %v941_v30  ;;  %v1112_v41 = vadd.f32 %v1111_v4, %v1110_v45  ;;  %v1030_v30 = vmul.f32 %v2245_v19, %v2245_v19  ;;  %v1117_v20 = vsel %vm866_vm2, %v1029_v16, 0.0 }
 0x179   : > { %v954_v4 = vsel %vm866_vm2, %v2203_v62, 0.0 }
 0x17a   : > { %v945_v24 = vadd.f32 %v944_v35, %v943_v22  ;;  %v1114_v35 = vadd.f32 %v1113_v14, %v1112_v41  ;;  %v1031_v22 = vmul.f32 %v2253_v23, %v2253_v23  ;;  %v1119_v12 = vsel %vm866_vm2, %v1030_v30, 0.0 }
 0x17b   : > { %v956_v14 = vsel %vm866_vm2, %v2211_v2, 0.0 }
 0x17c   : > { %v947_v18 = vadd.f32 %v946_v39, %v945_v24  ;;  %v1116_v39 = vadd.f32 %v1115_v32, %v1114_v35  ;;  %v1032_v24 = vmul.f32 %v2265_v29, %v2265_v29  ;;  %v1121_v16 = vsel %vm866_vm2, %v1031_v22, 0.0 }
 0x17d   : > { %v958_v32 = vsel %vm866_vm2, %v2199_v60, 0.0 }
 0x17e   : > { %v949_v34 = vadd.f32 %v948_v8, %v947_v18  ;;  %v1118_v8 = vadd.f32 %v1117_v20, %v1116_v39  ;;  %v1033_v18 = vmul.f32 %v2273_v33, %v2273_v33  ;;  %v1123_v30 = vsel %vm866_vm2, %v1032_v24, 0.0 }
 0x17f   : > { %v960_v20 = vsel %vm866_vm2, %v2207_v0, 0.0 }
 0x180   : > { %v951_v37 = vadd.f32 %v950_v28, %v949_v34  ;;  %v1120_v28 = vadd.f32 %v1119_v12, %v1118_v8  ;;  %v1034_v34 = vmul.f32 %v2261_v27, %v2261_v27  ;;  %v1125_v22 = vsel %vm866_vm2, %v1033_v18, 0.0 }
 0x181   : > { %v962_v12 = vsel %vm866_vm2, %v2219_v6, 0.0 }
 0x182   : > { %v953_v45 = vadd.f32 %v952_v26, %v951_v37  ;;  %v1122_v26 = vadd.f32 %v1121_v16, %v1120_v28  ;;  %v1035_v37 = vmul.f32 %v2269_v31, %v2269_v31  ;;  %v1127_v24 = vsel %vm866_vm2, %v1034_v34, 0.0 }
 0x183   : > { %v964_v16 = vsel %vm866_vm2, %v2227_v10, 0.0 }
 0x184   : > { %v955_v41 = vadd.f32 %v954_v4, %v953_v45  ;;  %v1124_v4 = vadd.f32 %v1123_v30, %v1122_v26  ;;  %v1036_v45 = vmul.f32 %v2155_v38, %v2155_v38  ;;  %v1129_v18 = vsel %vm866_vm2, %v1035_v37, 0.0  ;;  %v3143_v30 = vld [vmem:[#allocation24_spill] sm:$0xff] }
 0x185   : > { %v1038_v26 = vmul.f32 %v2151_v36, %v2151_v36  ;;  %v1040_v36 = vmul.f32 %v2171_v46, %v2171_v46  ;;  %v1042_v46 = vmul.f32 %v2167_v44, %v2167_v44  ;;  %v1044_v44 = vmul.f32 %v2187_v54, %v2187_v54 }
 0x186   : > { %v957_v35 = vadd.f32 %v956_v14, %v955_v41  ;;  %v1126_v14 = vadd.f32 %v1125_v22, %v1124_v4  ;;  %v1037_v41 = vmul.f32 %v2163_v42, %v2163_v42  ;;  %v1131_v34 = vsel %vm866_vm2, %v1036_v45, 0.0 }
 0x187   : > { %v1039_v42 = vmul.f32 %v2159_v40, %v2159_v40  ;;  %v1135_v45 = vsel %vm866_vm2, %v1038_v26, 0.0  ;;  %v1041_v40 = vmul.f32 %v2179_v50, %v2179_v50  ;;  %v1139_v26 = vsel %vm866_vm2, %v1040_v36, 0.0 }
 0x188   : > { %v959_v39 = vadd.f32 %v958_v32, %v957_v35  ;;  %v1128_v32 = vadd.f32 %v1127_v24, %v1126_v14  ;;  %v966_v35 = vsel %vm866_vm2, %v3143_v30, 0.0  ;;  %v1133_v37 = vsel %vm866_vm2, %v1037_v41, 0.0 }
 0x189   : > { %v1137_v41 = vsel %vm866_vm2, %v1039_v42, 0.0  ;;  %v1043_v50 = vmul.f32 %v2175_v48, %v2175_v48  ;;  %v1141_v42 = vsel %vm866_vm2, %v1041_v40, 0.0  ;;  %v1143_v36 = vsel %vm866_vm2, %v1042_v46, 0.0 }
 0x18a   : > { %v961_v8 = vadd.f32 %v960_v20, %v959_v39  ;;  %v1130_v22 = vadd.f32 %v1129_v18, %v1128_v32  ;;  %v3144_v39 = vld [vmem:[#allocation25_spill] sm:$0xff]  ;;  %v1045_v48 = vmul.f32 %v2195_v58, %v2195_v58  ;;  %v1046_v54 = vmul.f32 %v2183_v52, %v2183_v52 }
 0x18b   : > { %v968_v4 = vsel %vm866_vm2, %v3144_v39, 0.0  ;;  %v1145_v40 = vsel %vm866_vm2, %v1043_v50, 0.0  ;;  %v1147_v46 = vsel %vm866_vm2, %v1044_v44, 0.0  ;;  %v1047_v58 = vmul.f32 %v2191_v56, %v2191_v56 }
 0x18c   : > { %v963_v28 = vadd.f32 %v962_v12, %v961_v8  ;;  %v1132_v24 = vadd.f32 %v1131_v34, %v1130_v22  ;;  %v3145_v8 = vld [vmem:[#allocation27_spill] sm:$0xff]  ;;  %v1149_v50 = vsel %vm866_vm2, %v1045_v48, 0.0  ;;  %v1048_v52 = vmul.f32 %v2203_v62, %v2203_v62 }
 0x18d   : > { %v970_v14 = vsel %vm866_vm2, %v3145_v8, 0.0  ;;  %v1151_v44 = vsel %vm866_vm2, %v1046_v54, 0.0  ;;  %v1049_v56 = vmul.f32 %v2211_v2, %v2211_v2  ;;  %v1153_v48 = vsel %vm866_vm2, %v1047_v58, 0.0 }
 0x18e   : > { %v965_v20 = vadd.f32 %v964_v16, %v963_v28  ;;  %v1134_v18 = vadd.f32 %v1133_v37, %v1132_v24  ;;  %v3146_v28 = vld [vmem:[#allocation29_spill] sm:$0xff]  ;;  %v1050_v62 = vmul.f32 %v2199_v60, %v2199_v60  ;;  %v1155_v54 = vsel %vm866_vm2, %v1048_v52, 0.0 }
 0x18f   : > { %v972_v32 = vsel %vm866_vm2, %v3146_v28, 0.0  ;;  %v1051_v2 = vmul.f32 %v2207_v0, %v2207_v0  ;;  %v1157_v58 = vsel %vm866_vm2, %v1049_v56, 0.0  ;;  %v1053_v52 = vmul.f32 %v2227_v10, %v2227_v10 }
 0x190   : > { %v967_v12 = vadd.f32 %v966_v35, %v965_v20  ;;  %v1136_v34 = vadd.f32 %v1135_v45, %v1134_v18  ;;  %v3147_v20 = vld [vmem:[#allocation26_spill] sm:$0xff] }
 0x191   : > { %v974_v22 = vsel %vm866_vm2, %v3147_v20, 0.0 }
 0x192   : > { %v969_v16 = vadd.f32 %v968_v4, %v967_v12  ;;  %v1138_v37 = vadd.f32 %v1137_v41, %v1136_v34  ;;  %v3148_v12 = vld [vmem:[#allocation28_spill] sm:$0xff] }
 0x193   : > { %v976_v24 = vsel %vm866_vm2, %v3148_v12, 0.0 }
 0x194   : > { %v971_v35 = vadd.f32 %v970_v14, %v969_v16  ;;  %v1140_v45 = vadd.f32 %v1139_v26, %v1138_v37  ;;  %v3149_v16 = vld [vmem:[#allocation31_spill] sm:$0xff] }
 0x195   : > { %v978_v18 = vsel %vm866_vm2, %v3149_v16, 0.0 }
 0x196   : > { %v973_v4 = vadd.f32 %v972_v32, %v971_v35  ;;  %v1142_v41 = vadd.f32 %v1141_v42, %v1140_v45  ;;  %v3150_v35 = vld [vmem:[#allocation33_spill] sm:$0xff] }
 0x197   : > { %v980_v34 = vsel %vm866_vm2, %v3150_v35, 0.0 }
 0x198   : > { %v975_v14 = vadd.f32 %v974_v22, %v973_v4  ;;  %v1144_v26 = vadd.f32 %v1143_v36, %v1142_v41  ;;  %v3151_v4 = vld [vmem:[#allocation30_spill] sm:$0xff] }
 0x199   : > { %v982_v37 = vsel %vm866_vm2, %v3151_v4, 0.0 }
 0x19a   : > { %v977_v32 = vadd.f32 %v976_v24, %v975_v14  ;;  %v1146_v42 = vadd.f32 %v1145_v40, %v1144_v26  ;;  %v3152_v14 = vld [vmem:[#allocation32_spill] sm:$0xff] }
 0x19b   : > { %v984_v45 = vsel %vm866_vm2, %v3152_v14, 0.0 }
 0x19c   : > { %v979_v22 = vadd.f32 %v978_v18, %v977_v32  ;;  %v1148_v36 = vadd.f32 %v1147_v46, %v1146_v42  ;;  %v3153_v32 = vld [vmem:[#allocation35_spill] sm:$0xff] }
 0x19d   : > { %v986_v41 = vsel %vm866_vm2, %v3153_v32, 0.0 }
 0x19e   : > { %v981_v24 = vadd.f32 %v980_v34, %v979_v22  ;;  %v1150_v40 = vadd.f32 %v1149_v50, %v1148_v36  ;;  %v3154_v22 = vld [vmem:[#allocation37_spill] sm:$0xff] }
 0x19f   : > { %v988_v26 = vsel %vm866_vm2, %v3154_v22, 0.0 }
 0x1a0   : > { %v983_v18 = vadd.f32 %v982_v37, %v981_v24  ;;  %v1152_v46 = vadd.f32 %v1151_v44, %v1150_v40  ;;  %v3155_v24 = vld [vmem:[#allocation34_spill] sm:$0xff]  ;;  %v1159_v40 = vsel %vm866_vm2, %v1050_v62, 0.0  ;;  %v1165_v62 = vsel %vm866_vm2, %v1053_v52, 0.0 }
 0x1a1   : > { %v990_v42 = vsel %vm866_vm2, %v3155_v24, 0.0 }
 0x1a2   : > { %v985_v34 = vadd.f32 %v984_v45, %v983_v18  ;;  %v1154_v50 = vadd.f32 %v1153_v48, %v1152_v46  ;;  %v3156_v18 = vld [vmem:[#allocation36_spill] sm:$0xff]  ;;  %v1054_v46 = vmul.f32 %v3143_v30, %v3143_v30  ;;  %v1057_v30 = vmul.f32 %v3146_v28, %v3146_v28 }
 0x1a3   : > { %v992_v36 = vsel %vm866_vm2, %v3156_v18, 0.0 }
 0x1a4   : > { %v987_v37 = vadd.f32 %v986_v41, %v985_v34  ;;  %v1156_v44 = vadd.f32 %v1155_v54, %v1154_v50  ;;  %v1052_v34 = vmul.f32 %v2219_v6, %v2219_v6 }
 0x1a6   : > { %v989_v45 = vadd.f32 %v988_v26, %v987_v37  ;;  %v1158_v38 = vadd.f32 %v1157_v58, %v1156_v44  ;;  %v1161_v26 = vsel %vm866_vm2, %v1051_v2, 0.0  ;;  %v1163_v56 = vsel %vm866_vm2, %v1052_v34, 0.0 }
 0x1a7   : > { %v1056_v58 = vmul.f32 %v3145_v8, %v3145_v8  ;;  %v1167_v2 = vsel %vm866_vm2, %v1054_v46, 0.0  ;;  %v1059_v8 = vmul.f32 %v3148_v12, %v3148_v12  ;;  %v1062_v12 = vmul.f32 %v3151_v4, %v3151_v4 }
 0x1a8   : > { %v991_v41 = vadd.f32 %v990_v42, %v989_v45  ;;  %v1160_v37 = vadd.f32 %v1159_v40, %v1158_v38  ;;  %v1055_v45 = vmul.f32 %v3144_v39, %v3144_v39  ;;  %v865_v40 = vld [vmem:[#allocation2] sm:$0x1]  ;;  %v1058_v39 = vmul.f32 %v3147_v20, %v3147_v20 }
 0x1a9   : > { %v1171_v52 = vsel %vm866_vm2, %v1056_v58, 0.0 }
 0x1aa   : > { %v993_v60 = vadd.f32 %v992_v36, %v991_v41  ;;  %v1162_v54 = vadd.f32 %v1161_v26, %v1160_v37  ;;  %v1173_v37 = vsel %vm866_vm2, %v1057_v30, 0.0  ;;  %v1065_v30 = vmul.f32 %v3154_v22, %v3154_v22 }
 0x1ac   : > { %v994_v48 = vrot.slane %v993_v60, 4  ;;  %v1164_v36 = vadd.f32 %v1163_v56, %v1162_v54  ;;  %v1060_v56 = vmul.f32 %v3149_v16, %v3149_v16  ;;  %v1061_v54 = vmul.f32 %v3150_v35, %v3150_v35 }
 0x1ad   : > { %v1063_v16 = vmul.f32 %v3152_v14, %v3152_v14  ;;  %v1183_v35 = vsel %vm866_vm2, %v1062_v12, 0.0 }
 0x1ae   : > { %v995_v42 = vadd.f32 %v994_v48, %v993_v60  ;;  %v1166_v41 = vadd.f32 %v1165_v62, %v1164_v36  ;;  %v1169_v60 = vsel %vm866_vm2, %v1055_v45, 0.0  ;;  %v1177_v45 = vsel %vm866_vm2, %v1059_v8, 0.0 }
 0x1af   : > { %v1181_v58 = vsel %vm866_vm2, %v1061_v54, 0.0  ;;  %v1185_v4 = vsel %vm866_vm2, %v1063_v16, 0.0 }
 0x1b0   : > { %v996_v50 = vrot.slane %v995_v42, 2  ;;  %v1168_v34 = vadd.f32 %v1167_v2, %v1166_v41 }
 0x1b2   : > { %v997_v38 = vadd.f32 %v996_v50, %v995_v42  ;;  %v1170_v48 = vadd.f32 %v1169_v60, %v1168_v34  ;;  %v1175_v42 = vsel %vm866_vm2, %v1058_v39, 0.0  ;;  %v1179_v50 = vsel %vm866_vm2, %v1060_v56, 0.0 }
 0x1b4   : > { %v998_v44 = vrot.slane %v997_v38, 1  ;;  %v1172_v28 = vadd.f32 %v1171_v52, %v1170_v48 }
 0x1b6   : > { %v999_v26 = vadd.f32 %v998_v44, %v997_v38  ;;  %v1174_v20 = vadd.f32 %v1173_v37, %v1172_v28  ;;  %v1064_v38 = vmul.f32 %v3153_v32, %v3153_v32  ;;  %v1066_v44 = vmul.f32 %v3155_v24, %v3155_v24 }
 0x1b7   : > { %v1189_v32 = vsel %vm866_vm2, %v1065_v30, 0.0 }
 0x1b8   : > { %v1000_v46 = vadd.f32 %v999_v26, %v865_v40  ;;  %v1176_v62 = vadd.f32 %v1175_v42, %v1174_v20  ;;  %v1187_v14 = vsel %vm866_vm2, %v1064_v38, 0.0  ;;  %v1067_v40 = vmul.f32 %v3156_v18, %v3156_v18  ;;  %v1003_v42 = vld [vmem:[#allocation3] sm:$0x1] }
 0x1b9   : > { %v1191_v52 = vsel %vm866_vm2, %v1066_v44, 0.0 }
 0x1ba   : > { %1002 = vst.msk [vmem:[#allocation2] sm:$0x1] %vm1001_vm3, %v1000_v46  ;;  %v1178_v36 = vadd.f32 %v1177_v45, %v1176_v62  ;;  %v1193_v22 = vsel %vm866_vm2, %v1067_v40, 0.0 }
 0x1bc   : > { %v1180_v2 = vadd.f32 %v1179_v50, %v1178_v36 }
 0x1be   : > { %v1182_v41 = vadd.f32 %v1181_v58, %v1180_v2 }
 0x1c0   : > { %v1184_v60 = vadd.f32 %v1183_v35, %v1182_v41 }
 0x1c2   : > { %v1186_v34 = vadd.f32 %v1185_v4, %v1184_v60 }
 0x1c4   : > { %v1188_v39 = vadd.f32 %v1187_v14, %v1186_v34 }
 0x1c6   : > { %v1190_v26 = vadd.f32 %v1189_v32, %v1188_v39 }
 0x1c8   : > { %v1192_v48 = vadd.f32 %v1191_v52, %v1190_v26 }
 0x1ca   : > { %v1194_v8 = vadd.f32 %v1193_v22, %v1192_v48 }
 0x1cc   : > { %v1195_v37 = vrot.slane %v1194_v8, 4 }
 0x1ce   : > { %v1196_v46 = vadd.f32 %v1195_v37, %v1194_v8 }
 0x1d0   : > { %v1197_v28 = vrot.slane %v1196_v46, 2 }
 0x1d2   : > { %v1198_v24 = vadd.f32 %v1197_v28, %v1196_v46 }
 0x1d4   : > { %v1199_v56 = vrot.slane %v1198_v24, 1 }
 0x1d6   : > { %v1200_v20 = vadd.f32 %v1199_v56, %v1198_v24 }
 0x1d8   : > { %v1201_v54 = vadd.f32 %v1200_v20, %v1003_v42 }
 0x1da   : > { %1202 = vst.msk [vmem:[#allocation3] sm:$0x1] %vm1001_vm3, %v1201_v54 }
 0x1db PF: > { %p1762_p6 = scmp.ne.s32.totalorder %s1955_s15, 1 }
 0x1dc   : > { %v1207_v18 = vld [vmem:[#allocation2] sm:$0x1] (!%p1762_p6)  ;;  %v1221_v58 = vlaneseq (!%p1762_p6)  ;;  %vm1552_vm4 = vcmask (!%p1762_p6), 261120   ;;  %v3157_v34 = vld [vmem:[#allocation6_spill] sm:$0xff] (!%p1762_p6)  ;;  %v3159_v52 = vld [vmem:[#allocation4_spill] sm:$0xff] (!%p1762_p6) }
 0x1dd   : > { %1206 = sbr.rel (%p1762_p6) target bundleno = 588 (0x24c), region = 48  ;;  %v1208_v62 = vmul.f32 (!%p1762_p6), 0.001953125, %v1207_v18  ;;  %v1215_v38 = vld [vmem:[%s3072_s2] sm:$0x1] (!%p1762_p6)  ;;  %v3158_v32 = vld [vmem:[#allocation10_spill] sm:$0xff] (!%p1762_p6)  ;;  %v3160_v22 = vld [vmem:[#allocation8_spill] sm:$0xff] (!%p1762_p6) }
 0x1de   : > { %v1222_v2 = vshrl.u32 (!%p1762_p6), %v1221_v58, 7  ;;  %v1217_v4 = vld [vmem:[%s3073_s3] sm:$0x1] (!%p1762_p6)  ;;  %v3161_v8 = vld [vmem:[#allocation13_spill] sm:$0xff] (!%p1762_p6) }
 0x1df   : > { %v1211_v50 = vmul.f32 (!%p1762_p6), %v1208_v62, %v1208_v62 }
 0x1e0   : > { %v1223_v35 = vsub.s32 (!%p1762_p6), 0, %v1222_v2 }
 0x1e1   : > { %v1209_v45 = vld [vmem:[#allocation3] sm:$0x1] (!%p1762_p6) }
 0x1e2   : > { %v1210_v12 = vmul.f32 (!%p1762_p6), 0.001953125, %v1209_v45 }
 0x1e4   : > { %v1212_v36 = vsub.f32 %v1210_v12, %v1211_v50 }
 0x1e6   : > { %v1213_v16 = vadd.f32 1e-05, %v1212_v36 }
 0x1e8   : > { %1939 = vrsqrt.f32 %v1213_v16 }
 0x1f2   : > { %v1940_v41 = vpop.eup %1939 }
 0x1f3   : > { %v1216_v30 = vmul.f32 %v1940_v41, %v1215_v38 }
 0x1f5   : > { %v1218_v60 = vmul.f32 %v1216_v30, %v1208_v62  ;;  %v2609_v44 = vrot.slane %v1216_v30, %v1223_v35 }
 0x1f7   : > { %v1219_v14 = vsub.f32 %v1217_v4, %v1218_v60  ;;  %v1226_v40 = vmul.f32 %v2609_v44, %v3157_v34  ;;  %v1227_v39 = vmul.f32 %v2609_v44, %v3158_v32  ;;  %v1228_v26 = vmul.f32 %v3159_v52, %v2609_v44 }
 0x1f8   : > { %v1229_v48 = vmul.f32 %v3160_v22, %v2609_v44  ;;  %v1230_v37 = vmul.f32 %v2609_v44, %v3161_v8  ;;  %v1231_v46 = vmul.f32 %v2609_v44, %v2177_v49  ;;  %v1232_v28 = vmul.f32 %v2165_v43, %v2609_v44 }
 0x1f9   : > { %v2625_v24 = vrot.slane %v1219_v14, %v1223_v35  ;;  %v1233_v56 = vmul.f32 %v2173_v47, %v2609_v44  ;;  %v1234_v42 = vmul.f32 %v2609_v44, %v2185_v53  ;;  %v1235_v20 = vmul.f32 %v2609_v44, %v2193_v57 }
 0x1fa   : > { %v1236_v54 = vmul.f32 %v2181_v51, %v2609_v44  ;;  %v1237_v49 = vmul.f32 %v2189_v55, %v2609_v44  ;;  %v1238_v43 = vmul.f32 %v2609_v44, %v2201_v61  ;;  %v1239_v18 = vmul.f32 %v2609_v44, %v2209_v1 }
 0x1fb   : > { %v1296_v47 = vadd.f32 %v2625_v24, %v1226_v40  ;;  %v1297_v45 = vadd.f32 %v2625_v24, %v1227_v39  ;;  %v1298_v53 = vadd.f32 %v2625_v24, %v1228_v26  ;;  %v1299_v57 = vadd.f32 %v2625_v24, %v1229_v48 }
 0x1fc   : > { %v1300_v62 = vadd.f32 %v2625_v24, %v1230_v37  ;;  %v1301_v51 = vadd.f32 %v2625_v24, %v1231_v46  ;;  %v1302_v55 = vadd.f32 %v2625_v24, %v1232_v28  ;;  %v1303_v12 = vadd.f32 %v2625_v24, %v1233_v56 }
 0x1fd   : > { %vm1360_vm5 = vcmp.gt.f32.partialorder %v1296_v47, 0.0  ;;  %v1424_v61 = vmul.f32 0.2, %v1296_v47  ;;  %vm1361_vm6 = vcmp.gt.f32.partialorder %v1297_v45, 0.0  ;;  %v1425_v1 = vmul.f32 0.2, %v1297_v45 }
 0x1fe   : > { %vm1362_vm7 = vcmp.gt.f32.partialorder %v1298_v53, 0.0  ;;  %v1426_v50 = vmul.f32 0.2, %v1298_v53  ;;  %vm1363_vm8 = vcmp.gt.f32.partialorder %v1299_v57, 0.0  ;;  %v1427_v36 = vmul.f32 0.2, %v1299_v57 }
 0x1ff   : > { %v1488_v16 = vsel %vm1360_vm5, %v1296_v47, %v1424_v61  ;;  %v1489_v58 = vsel %vm1361_vm6, %v1297_v45, %v1425_v1  ;;  %vm1364_vm9 = vcmp.gt.f32.partialorder %v1300_v62, 0.0  ;;  %v1428_v2 = vmul.f32 0.2, %v1300_v62 }
 0x200   : > { %1553 = vst.msk [vmem:[%s3074_s4] sm:$0xff] %vm1552_vm4, %v1488_v16  ;;  %1554 = vst.msk [vmem:[%s3074_s4 + $0x8] sm:$0xff] %vm1552_vm4, %v1489_v58  ;;  %v1490_v38 = vsel %vm1362_vm7, %v1298_v53, %v1426_v50  ;;  %v1491_v35 = vsel %vm1363_vm8, %v1299_v57, %v1427_v36  ;;  %vm1365_vm10 = vcmp.gt.f32.partialorder %v1301_v51, 0.0  ;;  %v1429_v41 = vmul.f32 0.2, %v1301_v51 }
 0x201   : > { %1555 = vst.msk [vmem:[%s3074_s4 + $0x10] sm:$0xff] %vm1552_vm4, %v1490_v38  ;;  %1556 = vst.msk [vmem:[%s3074_s4 + $0x18] sm:$0xff] %vm1552_vm4, %v1491_v35  ;;  %v1492_v30 = vsel %vm1364_vm9, %v1300_v62, %v1428_v2  ;;  %vm1366_vm11 = vcmp.gt.f32.partialorder %v1302_v55, 0.0  ;;  %v1430_v4 = vmul.f32 0.2, %v1302_v55  ;;  %vm1367_vm12 = vcmp.gt.f32.partialorder %v1303_v12, 0.0 }
 0x202   : > { %1557 = vst.msk [vmem:[%s3074_s4 + $0x20] sm:$0xff] %vm1552_vm4, %v1492_v30  ;;  %v1493_v60 = vsel %vm1365_vm10, %v1301_v51, %v1429_v41  ;;  %v1431_v14 = vmul.f32 0.2, %v1303_v12  ;;  %v1304_v34 = vadd.f32 %v2625_v24, %v1234_v42  ;;  %v1305_v40 = vadd.f32 %v2625_v24, %v1235_v20 }
 0x203   : > { %1558 = vst.msk [vmem:[%s3074_s4 + $0x28] sm:$0xff] %vm1552_vm4, %v1493_v60  ;;  %v1494_v32 = vsel %vm1366_vm11, %v1302_v55, %v1430_v4  ;;  %v1306_v39 = vadd.f32 %v2625_v24, %v1236_v54  ;;  %v1307_v52 = vadd.f32 %v2625_v24, %v1237_v49  ;;  %v1308_v26 = vadd.f32 %v2625_v24, %v1238_v43 }
 0x204   : > { %1559 = vst.msk [vmem:[%s3074_s4 + $0x30] sm:$0xff] %vm1552_vm4, %v1494_v32  ;;  %v1495_v22 = vsel %vm1367_vm12, %v1303_v12, %v1431_v14  ;;  %vm1368_vm13 = vcmp.gt.f32.partialorder %v1304_v34, 0.0  ;;  %v1432_v48 = vmul.f32 0.2, %v1304_v34  ;;  %vm1369_vm14 = vcmp.gt.f32.partialorder %v1305_v40, 0.0 }
 0x205   : > { %1560 = vst.msk [vmem:[%s3074_s4 + $0x38] sm:$0xff] %vm1552_vm4, %v1495_v22  ;;  %v1433_v8 = vmul.f32 0.2, %v1305_v40  ;;  %vm1370_vm15 = vcmp.gt.f32.partialorder %v1306_v39, 0.0  ;;  %v1434_v37 = vmul.f32 0.2, %v1306_v39  ;;  %v1309_v54 = vadd.f32 %v2625_v24, %v1239_v18 }
 0x206   : > { %vm1371_vm0 = vcmp.gt.f32.partialorder %v1307_v52, 0.0  ;;  %v1496_v46 = vsel %vm1368_vm13, %v1304_v34, %v1432_v48  ;;  %v1435_v28 = vmul.f32 0.2, %v1307_v52  ;;  %vm1372_vm1 = vcmp.gt.f32.partialorder %v1308_v26, 0.0 }
 0x207   : > { %v1436_v56 = vmul.f32 0.2, %v1308_v26  ;;  %1561 = vst.msk [vmem:[%s3074_s4 + $0x40] sm:$0xff] %vm1552_vm4, %v1496_v46  ;;  %v1497_v42 = vsel %vm1369_vm14, %v1305_v40, %v1433_v8  ;;  %v1498_v20 = vsel %vm1370_vm15, %v1306_v39, %v1434_v37  ;;  %v1240_v49 = vmul.f32 %v2197_v59, %v2609_v44 }
 0x208   : > { %1562 = vst.msk [vmem:[%s3074_s4 + $0x48] sm:$0xff] %vm1552_vm4, %v1497_v42  ;;  %1563 = vst.msk [vmem:[%s3074_s4 + $0x50] sm:$0xff] %vm1552_vm4, %v1498_v20  ;;  %v1499_v43 = vsel %vm1371_vm0, %v1307_v52, %v1435_v28  ;;  %v1241_v45 = vmul.f32 %v2205_v63, %v2609_v44  ;;  %v1242_v18 = vmul.f32 %v2609_v44, %v2217_v5  ;;  %vm1373_vm2 = vcmp.gt.f32.partialorder %v1309_v54, 0.0 }
 0x209   : > { %v1500_v47 = vsel %vm1372_vm1, %v1308_v26, %v1436_v56  ;;  %1564 = vst.msk [vmem:[%s3074_s4 + $0x58] sm:$0xff] %vm1552_vm4, %v1499_v43  ;;  %v1437_v59 = vmul.f32 0.2, %v1309_v54  ;;  %v1310_v53 = vadd.f32 %v2625_v24, %v1240_v49  ;;  %v1243_v63 = vmul.f32 %v2609_v44, %v2225_v9 }
 0x20a   : > { %1565 = vst.msk [vmem:[%s3074_s4 + $0x60] sm:$0xff] %vm1552_vm4, %v1500_v47  ;;  %v1311_v57 = vadd.f32 %v2625_v24, %v1241_v45  ;;  %v1312_v5 = vadd.f32 %v2625_v24, %v1242_v18  ;;  %v1244_v62 = vmul.f32 %v2213_v3, %v2609_v44  ;;  %v1245_v51 = vmul.f32 %v2221_v7, %v2609_v44 }
 0x20b   : > { %v1501_v55 = vsel %vm1373_vm2, %v1309_v54, %v1437_v59  ;;  %vm1374_vm3 = vcmp.gt.f32.partialorder %v1310_v53, 0.0  ;;  %v1438_v12 = vmul.f32 0.2, %v1310_v53  ;;  %v1313_v61 = vadd.f32 %v2625_v24, %v1243_v63 }
 0x20c   : > { %1566 = vst.msk [vmem:[%s3074_s4 + $0x68] sm:$0xff] %vm1552_vm4, %v1501_v55  ;;  %vm1375_vm5 = vcmp.gt.f32.partialorder %v1311_v57, 0.0  ;;  %v1439_v9 = vmul.f32 0.2, %v1311_v57  ;;  %vm1376_vm6 = vcmp.gt.f32.partialorder %v1312_v5, 0.0  ;;  %v1314_v36 = vadd.f32 %v2625_v24, %v1244_v62  ;;  %v3162_v55 = vld [vmem:[#allocation7_spill] sm:$0xff] }
 0x20d   : > { %v1440_v1 = vmul.f32 0.2, %v1312_v5  ;;  %v1502_v50 = vsel %vm1374_vm3, %v1310_v53, %v1438_v12  ;;  %vm1377_vm7 = vcmp.gt.f32.partialorder %v1313_v61, 0.0  ;;  %v1441_v3 = vmul.f32 0.2, %v1313_v61 }
 0x20e   : > { %1567 = vst.msk [vmem:[%s3074_s4 + $0x70] sm:$0xff] %vm1552_vm4, %v1502_v50  ;;  %v1503_v7 = vsel %vm1375_vm5, %v1311_v57, %v1439_v9  ;;  %v1315_v58 = vadd.f32 %v2625_v24, %v1245_v51  ;;  %v1246_v2 = vmul.f32 %v2609_v44, %v2233_v13  ;;  %vm1378_vm8 = vcmp.gt.f32.partialorder %v1314_v36, 0.0 }
 0x20f   : > { %v1504_v16 = vsel %vm1376_vm6, %v1312_v5, %v1440_v1  ;;  %1568 = vst.msk [vmem:[%s3074_s4 + $0x78] sm:$0xff] %vm1552_vm4, %v1503_v7  ;;  %v1505_v38 = vsel %vm1377_vm7, %v1313_v61, %v1441_v3  ;;  %v1442_v35 = vmul.f32 0.2, %v1314_v36  ;;  %v1247_v41 = vmul.f32 %v2609_v44, %v2241_v17  ;;  %v3163_v1 = vld [vmem:[#allocation11_spill] sm:$0xff]  ;;  %v3164_v7 = vld [vmem:[#allocation5_spill] sm:$0xff] }
 0x210   : > { %1569 = vst.msk [vmem:[%s3074_s4 + $0x80] sm:$0xff] %vm1552_vm4, %v1504_v16  ;;  %1570 = vst.msk [vmem:[%s3074_s4 + $0x88] sm:$0xff] %vm1552_vm4, %v1505_v38  ;;  %vm1379_vm9 = vcmp.gt.f32.partialorder %v1315_v58, 0.0  ;;  %v1443_v13 = vmul.f32 0.2, %v1315_v58  ;;  %v1316_v30 = vadd.f32 %v2625_v24, %v1246_v2  ;;  %v1248_v4 = vmul.f32 %v2229_v11, %v2609_v44  ;;  %v3165_v38 = vld [vmem:[#allocation9_spill] sm:$0xff] }
 0x211   : > { %v1506_v60 = vsel %vm1378_vm8, %v1314_v36, %v1442_v35  ;;  %v1317_v14 = vadd.f32 %v2625_v24, %v1247_v41  ;;  %v1249_v34 = vmul.f32 %v2237_v15, %v2609_v44  ;;  %v1250_v17 = vmul.f32 %v2609_v44, %v2249_v21  ;;  %v3166_v41 = vld [vmem:[#allocation14_spill] sm:$0xff] }
 0x212   : > { %1571 = vst.msk [vmem:[%s3074_s4 + $0x90] sm:$0xff] %vm1552_vm4, %v1506_v60  ;;  %v1507_v40 = vsel %vm1379_vm9, %v1315_v58, %v1443_v13  ;;  %vm1380_vm10 = vcmp.gt.f32.partialorder %v1316_v30, 0.0  ;;  %v1444_v32 = vmul.f32 0.2, %v1316_v30  ;;  %v1318_v39 = vadd.f32 %v2625_v24, %v1248_v4 }
 0x213   : > { %1572 = vst.msk [vmem:[%s3074_s4 + $0x98] sm:$0xff] %vm1552_vm4, %v1507_v40  ;;  %vm1381_vm11 = vcmp.gt.f32.partialorder %v1317_v14, 0.0  ;;  %v1445_v11 = vmul.f32 0.2, %v1317_v14  ;;  %v1319_v15 = vadd.f32 %v2625_v24, %v1249_v34  ;;  %v1320_v21 = vadd.f32 %v2625_v24, %v1250_v17 }
 0x214   : > { %v1508_v52 = vsel %vm1380_vm10, %v1316_v30, %v1444_v32  ;;  %vm1382_vm12 = vcmp.gt.f32.partialorder %v1318_v39, 0.0  ;;  %v1446_v26 = vmul.f32 0.2, %v1318_v39  ;;  %v1251_v22 = vmul.f32 %v2609_v44, %v2257_v25 }
 0x215   : > { %1573 = vst.msk [vmem:[%s3074_s4 + $0xa0] sm:$0xff] %vm1552_vm4, %v1508_v52  ;;  %v1509_v48 = vsel %vm1381_vm11, %v1317_v14, %v1445_v11  ;;  %vm1383_vm13 = vcmp.gt.f32.partialorder %v1319_v15, 0.0  ;;  %v1447_v8 = vmul.f32 0.2, %v1319_v15  ;;  %vm1384_vm14 = vcmp.gt.f32.partialorder %v1320_v21, 0.0 }
 0x216   : > { %1574 = vst.msk [vmem:[%s3074_s4 + $0xa8] sm:$0xff] %vm1552_vm4, %v1509_v48  ;;  %v1510_v37 = vsel %vm1382_vm12, %v1318_v39, %v1446_v26  ;;  %v1448_v46 = vmul.f32 0.2, %v1320_v21  ;;  %v1321_v28 = vadd.f32 %v2625_v24, %v1251_v22  ;;  %v1252_v25 = vmul.f32 %v2245_v19, %v2609_v44  ;;  %v3167_v39 = vld [vmem:[#allocation16_spill] sm:$0xff] }
 0x217   : > { %1575 = vst.msk [vmem:[%s3074_s4 + $0xb0] sm:$0xff] %vm1552_vm4, %v1510_v37  ;;  %v1511_v56 = vsel %vm1383_vm13, %v1319_v15, %v1447_v8  ;;  %v1253_v42 = vmul.f32 %v2253_v23, %v2609_v44  ;;  %v1254_v20 = vmul.f32 %v2609_v44, %v2265_v29  ;;  %v1255_v54 = vmul.f32 %v2609_v44, %v2273_v33  ;;  %v3168_v48 = vld [vmem:[#allocation12_spill] sm:$0xff] }
 0x218   : > { %1576 = vst.msk [vmem:[%s3074_s4 + $0xb8] sm:$0xff] %vm1552_vm4, %v1511_v56  ;;  %v1512_v19 = vsel %vm1384_vm14, %v1320_v21, %v1448_v46  ;;  %vm1385_vm15 = vcmp.gt.f32.partialorder %v1321_v28, 0.0  ;;  %v1449_v49 = vmul.f32 0.2, %v1321_v28  ;;  %v1322_v43 = vadd.f32 %v2625_v24, %v1252_v25  ;;  %v3169_v46 = vld [vmem:[#allocation15_spill] sm:$0xff]  ;;  %v3170_v25 = vld [vmem:[#allocation18_spill] sm:$0xff] }
 0x219   : > { %1577 = vst.msk [vmem:[%s3074_s4 + $0xc0] sm:$0xff] %vm1552_vm4, %v1512_v19  ;;  %v1323_v23 = vadd.f32 %v2625_v24, %v1253_v42  ;;  %v1324_v29 = vadd.f32 %v2625_v24, %v1254_v20  ;;  %v1325_v33 = vadd.f32 %v2625_v24, %v1255_v54  ;;  %v1256_v47 = vmul.f32 %v2261_v27, %v2609_v44  ;;  %v3171_v42 = vld [vmem:[#allocation20_spill] sm:$0xff] }
 0x21a   : > { %v1513_v45 = vsel %vm1385_vm15, %v1321_v28, %v1449_v49  ;;  %vm1386_vm0 = vcmp.gt.f32.partialorder %v1322_v43, 0.0  ;;  %v1450_v18 = vmul.f32 0.2, %v1322_v43  ;;  %v1257_v59 = vmul.f32 %v2269_v31, %v2609_v44 }
 0x21b   : > { %1578 = vst.msk [vmem:[%s3074_s4 + $0xc8] sm:$0xff] %vm1552_vm4, %v1513_v45  ;;  %vm1387_vm1 = vcmp.gt.f32.partialorder %v1323_v23, 0.0  ;;  %v1451_v53 = vmul.f32 0.2, %v1323_v23  ;;  %vm1388_vm2 = vcmp.gt.f32.partialorder %v1324_v29, 0.0  ;;  %vm1389_vm3 = vcmp.gt.f32.partialorder %v1325_v33, 0.0 }
 0x21c   : > { %v1452_v63 = vmul.f32 0.2, %v1324_v29  ;;  %v1514_v57 = vsel %vm1386_vm0, %v1322_v43, %v1450_v18  ;;  %v1453_v5 = vmul.f32 0.2, %v1325_v33  ;;  %v1326_v27 = vadd.f32 %v2625_v24, %v1256_v47 }
 0x21d   : > { %1579 = vst.msk [vmem:[%s3074_s4 + $0xd0] sm:$0xff] %vm1552_vm4, %v1514_v57  ;;  %v1515_v31 = vsel %vm1387_vm1, %v1323_v23, %v1451_v53  ;;  %v1327_v51 = vadd.f32 %v2625_v24, %v1257_v59  ;;  %v1258_v12 = vmul.f32 %v2609_v44, %v3162_v55  ;;  %v1259_v50 = vmul.f32 %v2609_v44, %v3163_v1  ;;  %v3173_v59 = vld [vmem:[#allocation19_spill] sm:$0xff] }
 0x21e   : > { %v1516_v62 = vsel %vm1388_vm2, %v1324_v29, %v1452_v63  ;;  %1580 = vst.msk [vmem:[%s3074_s4 + $0xd8] sm:$0xff] %vm1552_vm4, %v1515_v31  ;;  %v1517_v61 = vsel %vm1389_vm3, %v1325_v33, %v1453_v5  ;;  %vm1390_vm5 = vcmp.gt.f32.partialorder %v1326_v27, 0.0  ;;  %v1454_v9 = vmul.f32 0.2, %v1326_v27  ;;  %v3172_v33 = vld [vmem:[#allocation17_spill] sm:$0xff] }
 0x21f   : > { %1581 = vst.msk [vmem:[%s3074_s4 + $0xe0] sm:$0xff] %vm1552_vm4, %v1516_v62  ;;  %1582 = vst.msk [vmem:[%s3074_s4 + $0xe8] sm:$0xff] %vm1552_vm4, %v1517_v61  ;;  %vm1391_vm6 = vcmp.gt.f32.partialorder %v1327_v51, 0.0  ;;  %v1455_v3 = vmul.f32 0.2, %v1327_v51  ;;  %v1328_v36 = vadd.f32 %v2625_v24, %v1258_v12  ;;  %v1260_v16 = vmul.f32 %v3164_v7, %v2609_v44  ;;  %v3174_v12 = vld [vmem:[#allocation22_spill] sm:$0xff] }
 0x220   : > { %v1518_v58 = vsel %vm1390_vm5, %v1326_v27, %v1454_v9  ;;  %v1329_v2 = vadd.f32 %v2625_v24, %v1259_v50  ;;  %v1261_v35 = vmul.f32 %v3165_v38, %v2609_v44  ;;  %v1262_v13 = vmul.f32 %v2609_v44, %v3166_v41  ;;  %v3175_v50 = vld [vmem:[#allocation23_spill] sm:$0xff] }
 0x221   : > { %1583 = vst.msk [vmem:[%s3074_s4 + $0xf0] sm:$0xff] %vm1552_vm4, %v1518_v58  ;;  %v1519_v30 = vsel %vm1391_vm6, %v1327_v51, %v1455_v3  ;;  %vm1392_vm7 = vcmp.gt.f32.partialorder %v1328_v36, 0.0  ;;  %v1456_v4 = vmul.f32 0.2, %v1328_v36  ;;  %v1330_v60 = vadd.f32 %v2625_v24, %v1260_v16  ;;  %v3176_v16 = vld [vmem:[#allocation21_spill] sm:$0xff] }
 0x222   : > { %1584 = vst.msk [vmem:[%s3074_s4 + $0xf8] sm:$0xff] %vm1552_vm4, %v1519_v30  ;;  %vm1393_vm8 = vcmp.gt.f32.partialorder %v1329_v2, 0.0  ;;  %v1457_v14 = vmul.f32 0.2, %v1329_v2  ;;  %v1331_v34 = vadd.f32 %v2625_v24, %v1261_v35  ;;  %v1332_v17 = vadd.f32 %v2625_v24, %v1262_v13 }
 0x223   : > { %v1520_v40 = vsel %vm1392_vm7, %v1328_v36, %v1456_v4  ;;  %vm1394_vm9 = vcmp.gt.f32.partialorder %v1330_v60, 0.0  ;;  %v1458_v32 = vmul.f32 0.2, %v1330_v60  ;;  %v1263_v11 = vmul.f32 %v2609_v44, %v3167_v39 }
 0x224   : > { %1585 = vst.msk [vmem:[%s3074_s4 + $0x100] sm:$0xff] %vm1552_vm4, %v1520_v40  ;;  %v1521_v15 = vsel %vm1393_vm8, %v1329_v2, %v1457_v14  ;;  %vm1395_vm10 = vcmp.gt.f32.partialorder %v1331_v34, 0.0  ;;  %v1459_v21 = vmul.f32 0.2, %v1331_v34  ;;  %vm1396_vm11 = vcmp.gt.f32.partialorder %v1332_v17, 0.0 }
 0x225   : > { %1586 = vst.msk [vmem:[%s3074_s4 + $0x108] sm:$0xff] %vm1552_vm4, %v1521_v15  ;;  %v1522_v52 = vsel %vm1394_vm9, %v1330_v60, %v1458_v32  ;;  %v1460_v26 = vmul.f32 0.2, %v1332_v17  ;;  %v1333_v22 = vadd.f32 %v2625_v24, %v1263_v11  ;;  %v1264_v8 = vmul.f32 %v3168_v48, %v2609_v44  ;;  %v3179_v48 = vld [vmem:[#allocation27_spill] sm:$0xff] }
 0x226   : > { %1587 = vst.msk [vmem:[%s3074_s4 + $0x110] sm:$0xff] %vm1552_vm4, %v1522_v52  ;;  %v1523_v37 = vsel %vm1395_vm10, %v1331_v34, %v1459_v21  ;;  %v1265_v28 = vmul.f32 %v3169_v46, %v2609_v44  ;;  %v1266_v56 = vmul.f32 %v2609_v44, %v3170_v25  ;;  %v1267_v20 = vmul.f32 %v2609_v44, %v3171_v42 }
 0x227   : > { %1588 = vst.msk [vmem:[%s3074_s4 + $0x118] sm:$0xff] %vm1552_vm4, %v1523_v37  ;;  %v1524_v54 = vsel %vm1396_vm11, %v1332_v17, %v1460_v26  ;;  %vm1397_vm12 = vcmp.gt.f32.partialorder %v1333_v22, 0.0  ;;  %v1461_v19 = vmul.f32 0.2, %v1333_v22  ;;  %v1334_v49 = vadd.f32 %v2625_v24, %v1264_v8  ;;  %v3178_v26 = vld [vmem:[#allocation25_spill] sm:$0xff] }
 0x228   : > { %1589 = vst.msk [vmem:[%s3074_s4 + $0x120] sm:$0xff] %vm1552_vm4, %v1524_v54  ;;  %v1335_v43 = vadd.f32 %v2625_v24, %v1265_v28  ;;  %v1336_v23 = vadd.f32 %v2625_v24, %v1266_v56  ;;  %v1337_v29 = vadd.f32 %v2625_v24, %v1267_v20  ;;  %v1268_v47 = vmul.f32 %v3172_v33, %v2609_v44  ;;  %v3180_v37 = vld [vmem:[#allocation29_spill] sm:$0xff] }
 0x229   : > { %v1525_v45 = vsel %vm1397_vm12, %v1333_v22, %v1461_v19  ;;  %vm1398_vm13 = vcmp.gt.f32.partialorder %v1334_v49, 0.0  ;;  %v1462_v18 = vmul.f32 0.2, %v1334_v49  ;;  %v1269_v53 = vmul.f32 %v3173_v59, %v2609_v44  ;;  %v3181_v19 = vld [vmem:[#allocation26_spill] sm:$0xff] }
 0x22a   : > { %1590 = vst.msk [vmem:[%s3074_s4 + $0x128] sm:$0xff] %vm1552_vm4, %v1525_v45  ;;  %vm1399_vm14 = vcmp.gt.f32.partialorder %v1335_v43, 0.0  ;;  %v1463_v63 = vmul.f32 0.2, %v1335_v43  ;;  %vm1400_vm15 = vcmp.gt.f32.partialorder %v1336_v23, 0.0  ;;  %vm1401_vm0 = vcmp.gt.f32.partialorder %v1337_v29, 0.0 }
 0x22b   : > { %v1464_v57 = vmul.f32 0.2, %v1336_v23  ;;  %v1526_v5 = vsel %vm1398_vm13, %v1334_v49, %v1462_v18  ;;  %v1465_v27 = vmul.f32 0.2, %v1337_v29  ;;  %v1338_v31 = vadd.f32 %v2625_v24, %v1268_v47 }
 0x22c   : > { %1591 = vst.msk [vmem:[%s3074_s4 + $0x130] sm:$0xff] %vm1552_vm4, %v1526_v5  ;;  %v1527_v62 = vsel %vm1399_vm14, %v1335_v43, %v1463_v63  ;;  %v1339_v55 = vadd.f32 %v2625_v24, %v1269_v53  ;;  %v1270_v61 = vmul.f32 %v2609_v44, %v3174_v12  ;;  %v1271_v3 = vmul.f32 %v2609_v44, %v3175_v50 }
 0x22d   : > { %v1528_v51 = vsel %vm1400_vm15, %v1336_v23, %v1464_v57  ;;  %1592 = vst.msk [vmem:[%s3074_s4 + $0x138] sm:$0xff] %vm1552_vm4, %v1527_v62  ;;  %v1529_v9 = vsel %vm1401_vm0, %v1337_v29, %v1465_v27  ;;  %vm1402_vm1 = vcmp.gt.f32.partialorder %v1338_v31, 0.0  ;;  %v1466_v1 = vmul.f32 0.2, %v1338_v31  ;;  %v3182_v29 = vld [vmem:[#allocation28_spill] sm:$0xff]  ;;  %v3183_v27 = vld [vmem:[#allocation31_spill] sm:$0xff] }
 0x22e   : > { %1593 = vst.msk [vmem:[%s3074_s4 + $0x140] sm:$0xff] %vm1552_vm4, %v1528_v51  ;;  %1594 = vst.msk [vmem:[%s3074_s4 + $0x148] sm:$0xff] %vm1552_vm4, %v1529_v9  ;;  %vm1403_vm2 = vcmp.gt.f32.partialorder %v1339_v55, 0.0  ;;  %v1467_v36 = vmul.f32 0.2, %v1339_v55  ;;  %v1340_v7 = vadd.f32 %v2625_v24, %v1270_v61  ;;  %v1272_v58 = vmul.f32 %v3176_v16, %v2609_v44 }
 0x22f   : > { %v1530_v2 = vsel %vm1402_vm1, %v1338_v31, %v1466_v1  ;;  %v1341_v38 = vadd.f32 %v2625_v24, %v1271_v3  ;;  %v1273_v35 = vmul.f32 %v2207_v0, %v2609_v44  ;;  %v1274_v41 = vmul.f32 %v2609_v44, %v2219_v6  ;;  %v3185_v1 = vld [vmem:[#allocation30_spill] sm:$0xff] }
 0x230   : > { %1595 = vst.msk [vmem:[%s3074_s4 + $0x150] sm:$0xff] %vm1552_vm4, %v1530_v2  ;;  %v1531_v13 = vsel %vm1403_vm2, %v1339_v55, %v1467_v36  ;;  %vm1404_vm3 = vcmp.gt.f32.partialorder %v1340_v7, 0.0  ;;  %v1468_v30 = vmul.f32 0.2, %v1340_v7  ;;  %v1342_v4 = vadd.f32 %v2625_v24, %v1272_v58  ;;  %v3184_v55 = vld [vmem:[#allocation33_spill] sm:$0xff]  ;;  %v3187_v58 = vld [vmem:[#allocation35_spill] sm:$0xff] }
 0x231   : > { %1596 = vst.msk [vmem:[%s3074_s4 + $0x158] sm:$0xff] %vm1552_vm4, %v1531_v13  ;;  %vm1405_vm5 = vcmp.gt.f32.partialorder %v1341_v38, 0.0  ;;  %v1469_v0 = vmul.f32 0.2, %v1341_v38  ;;  %v1343_v60 = vadd.f32 %v2625_v24, %v1273_v35  ;;  %v1344_v6 = vadd.f32 %v2625_v24, %v1274_v41 }
 0x232   : > { %v1532_v14 = vsel %vm1404_vm3, %v1340_v7, %v1468_v30  ;;  %vm1406_vm6 = vcmp.gt.f32.partialorder %v1342_v4, 0.0  ;;  %v1470_v34 = vmul.f32 0.2, %v1342_v4  ;;  %v1275_v17 = vmul.f32 %v2609_v44, %v2227_v10  ;;  %v3177_v10 = vld [vmem:[#allocation24_spill] sm:$0xff] }
 0x233   : > { %1597 = vst.msk [vmem:[%s3074_s4 + $0x160] sm:$0xff] %vm1552_vm4, %v1532_v14  ;;  %v1533_v40 = vsel %vm1405_vm5, %v1341_v38, %v1469_v0  ;;  %vm1407_vm7 = vcmp.gt.f32.partialorder %v1343_v60, 0.0  ;;  %v1471_v32 = vmul.f32 0.2, %v1343_v60  ;;  %vm1408_vm8 = vcmp.gt.f32.partialorder %v1344_v6, 0.0  ;;  %v3186_v7 = vld [vmem:[#allocation32_spill] sm:$0xff] }
 0x234   : > { %1598 = vst.msk [vmem:[%s3074_s4 + $0x168] sm:$0xff] %vm1552_vm4, %v1533_v40  ;;  %v1534_v39 = vsel %vm1406_vm6, %v1342_v4, %v1470_v34  ;;  %v1472_v11 = vmul.f32 0.2, %v1344_v6  ;;  %v1345_v15 = vadd.f32 %v2625_v24, %v1275_v17  ;;  %v1276_v21 = vmul.f32 %v3177_v10, %v2609_v44 }
 0x235   : > { %1599 = vst.msk [vmem:[%s3074_s4 + $0x170] sm:$0xff] %vm1552_vm4, %v1534_v39  ;;  %v1535_v52 = vsel %vm1407_vm7, %v1343_v60, %v1471_v32  ;;  %v1277_v22 = vmul.f32 %v3178_v26, %v2609_v44  ;;  %v1278_v8 = vmul.f32 %v2609_v44, %v3179_v48  ;;  %v1279_v46 = vmul.f32 %v2609_v44, %v3180_v37 }
 0x236   : > { %1600 = vst.msk [vmem:[%s3074_s4 + $0x178] sm:$0xff] %vm1552_vm4, %v1535_v52  ;;  %v1536_v28 = vsel %vm1408_vm8, %v1344_v6, %v1472_v11  ;;  %vm1409_vm9 = vcmp.gt.f32.partialorder %v1345_v15, 0.0  ;;  %v1473_v25 = vmul.f32 0.2, %v1345_v15  ;;  %v1346_v56 = vadd.f32 %v2625_v24, %v1276_v21  ;;  %v3188_v6 = vld [vmem:[#allocation37_spill] sm:$0xff]  ;;  %v3189_v11 = vld [vmem:[#allocation34_spill] sm:$0xff] }
 0x237   : > { %1601 = vst.msk [vmem:[%s3074_s4 + $0x180] sm:$0xff] %vm1552_vm4, %v1536_v28  ;;  %v1347_v42 = vadd.f32 %v2625_v24, %v1277_v22  ;;  %v1348_v20 = vadd.f32 %v2625_v24, %v1278_v8  ;;  %v1349_v54 = vadd.f32 %v2625_v24, %v1279_v46  ;;  %v1280_v49 = vmul.f32 %v3181_v19, %v2609_v44  ;;  %v3190_v21 = vld [vmem:[#allocation36_spill] sm:$0xff] }
 0x238   : > { %v1537_v43 = vsel %vm1409_vm9, %v1345_v15, %v1473_v25  ;;  %vm1410_vm10 = vcmp.gt.f32.partialorder %v1346_v56, 0.0  ;;  %v1474_v23 = vmul.f32 0.2, %v1346_v56  ;;  %v1281_v33 = vmul.f32 %v3182_v29, %v2609_v44 }
 0x239   : > { %1602 = vst.msk [vmem:[%s3074_s4 + $0x188] sm:$0xff] %vm1552_vm4, %v1537_v43  ;;  %vm1411_vm11 = vcmp.gt.f32.partialorder %v1347_v42, 0.0  ;;  %v1475_v47 = vmul.f32 0.2, %v1347_v42  ;;  %vm1412_vm12 = vcmp.gt.f32.partialorder %v1348_v20, 0.0  ;;  %vm1413_vm13 = vcmp.gt.f32.partialorder %v1349_v54, 0.0 }
 0x23a   : > { %v1476_v45 = vmul.f32 0.2, %v1348_v20  ;;  %v1538_v18 = vsel %vm1410_vm10, %v1346_v56, %v1474_v23  ;;  %v1477_v59 = vmul.f32 0.2, %v1349_v54  ;;  %v1350_v53 = vadd.f32 %v2625_v24, %v1280_v49 }
 0x23b   : > { %1603 = vst.msk [vmem:[%s3074_s4 + $0x190] sm:$0xff] %vm1552_vm4, %v1538_v18  ;;  %v1539_v63 = vsel %vm1411_vm11, %v1347_v42, %v1475_v47  ;;  %v1351_v5 = vadd.f32 %v2625_v24, %v1281_v33  ;;  %v1282_v31 = vmul.f32 %v2609_v44, %v3183_v27  ;;  %v1283_v12 = vmul.f32 %v2609_v44, %v3184_v55 }
 0x23c   : > { %v1540_v57 = vsel %vm1412_vm12, %v1348_v20, %v1476_v45  ;;  %1604 = vst.msk [vmem:[%s3074_s4 + $0x198] sm:$0xff] %vm1552_vm4, %v1539_v63  ;;  %v1541_v62 = vsel %vm1413_vm13, %v1349_v54, %v1477_v59  ;;  %vm1414_vm14 = vcmp.gt.f32.partialorder %v1350_v53, 0.0  ;;  %v1478_v51 = vmul.f32 0.2, %v1350_v53 }
 0x23d   : > { %1605 = vst.msk [vmem:[%s3074_s4 + $0x1a0] sm:$0xff] %vm1552_vm4, %v1540_v57  ;;  %1606 = vst.msk [vmem:[%s3074_s4 + $0x1a8] sm:$0xff] %vm1552_vm4, %v1541_v62  ;;  %vm1415_vm15 = vcmp.gt.f32.partialorder %v1351_v5, 0.0  ;;  %v1479_v61 = vmul.f32 0.2, %v1351_v5  ;;  %v1352_v9 = vadd.f32 %v2625_v24, %v1282_v31  ;;  %v1284_v50 = vmul.f32 %v3185_v1, %v2609_v44 }
 0x23e   : > { %v1542_v3 = vsel %vm1414_vm14, %v1350_v53, %v1478_v51  ;;  %v1353_v36 = vadd.f32 %v2625_v24, %v1283_v12  ;;  %v1285_v16 = vmul.f32 %v3186_v7, %v2609_v44  ;;  %v1286_v2 = vmul.f32 %v2609_v44, %v3187_v58 }
 0x23f   : > { %1607 = vst.msk [vmem:[%s3074_s4 + $0x1b0] sm:$0xff] %vm1552_vm4, %v1542_v3  ;;  %v1543_v38 = vsel %vm1415_vm15, %v1351_v5, %v1479_v61  ;;  %vm1416_vm0 = vcmp.gt.f32.partialorder %v1352_v9, 0.0  ;;  %v1480_v35 = vmul.f32 0.2, %v1352_v9  ;;  %v1354_v41 = vadd.f32 %v2625_v24, %v1284_v50 }
 0x240   : > { %1608 = vst.msk [vmem:[%s3074_s4 + $0x1b8] sm:$0xff] %vm1552_vm4, %v1543_v38  ;;  %vm1417_vm1 = vcmp.gt.f32.partialorder %v1353_v36, 0.0  ;;  %v1481_v13 = vmul.f32 0.2, %v1353_v36  ;;  %v1355_v30 = vadd.f32 %v2625_v24, %v1285_v16  ;;  %v1356_v4 = vadd.f32 %v2625_v24, %v1286_v2 }
 0x241   : > { %v1544_v0 = vsel %vm1416_vm0, %v1352_v9, %v1480_v35  ;;  %vm1418_vm2 = vcmp.gt.f32.partialorder %v1354_v41, 0.0  ;;  %v1482_v60 = vmul.f32 0.2, %v1354_v41  ;;  %v1287_v14 = vmul.f32 %v2609_v44, %v3188_v6 }
 0x242   : > { %1609 = vst.msk [vmem:[%s3074_s4 + $0x1c0] sm:$0xff] %vm1552_vm4, %v1544_v0  ;;  %v1545_v34 = vsel %vm1417_vm1, %v1353_v36, %v1481_v13  ;;  %vm1419_vm3 = vcmp.gt.f32.partialorder %v1355_v30, 0.0  ;;  %v1483_v17 = vmul.f32 0.2, %v1355_v30  ;;  %vm1420_vm5 = vcmp.gt.f32.partialorder %v1356_v4, 0.0 }
 0x243   : > { %1610 = vst.msk [vmem:[%s3074_s4 + $0x1c8] sm:$0xff] %vm1552_vm4, %v1545_v34  ;;  %v1546_v40 = vsel %vm1418_vm2, %v1354_v41, %v1482_v60  ;;  %v1484_v32 = vmul.f32 0.2, %v1356_v4  ;;  %v1357_v39 = vadd.f32 %v2625_v24, %v1287_v14  ;;  %v1288_v15 = vmul.f32 %v3189_v11, %v2609_v44 }
 0x244   : > { %1611 = vst.msk [vmem:[%s3074_s4 + $0x1d0] sm:$0xff] %vm1552_vm4, %v1546_v40  ;;  %v1547_v10 = vsel %vm1419_vm3, %v1355_v30, %v1483_v17  ;;  %v1289_v52 = vmul.f32 %v3190_v21, %v2609_v44 }
 0x245   : > { %1612 = vst.msk [vmem:[%s3074_s4 + $0x1d8] sm:$0xff] %vm1552_vm4, %v1547_v10  ;;  %v1548_v26 = vsel %vm1420_vm5, %v1356_v4, %v1484_v32  ;;  %vm1421_vm6 = vcmp.gt.f32.partialorder %v1357_v39, 0.0  ;;  %v1485_v22 = vmul.f32 0.2, %v1357_v39  ;;  %v1358_v48 = vadd.f32 %v2625_v24, %v1288_v15 }
 0x246   : > { %1613 = vst.msk [vmem:[%s3074_s4 + $0x1e0] sm:$0xff] %vm1552_vm4, %v1548_v26  ;;  %v1359_v8 = vadd.f32 %v2625_v24, %v1289_v52 }
 0x247   : > { %v1549_v37 = vsel %vm1421_vm6, %v1357_v39, %v1485_v22  ;;  %vm1422_vm7 = vcmp.gt.f32.partialorder %v1358_v48, 0.0  ;;  %v1486_v44 = vmul.f32 0.2, %v1358_v48 }
 0x248   : > { %1614 = vst.msk [vmem:[%s3074_s4 + $0x1e8] sm:$0xff] %vm1552_vm4, %v1549_v37  ;;  %vm1423_vm8 = vcmp.gt.f32.partialorder %v1359_v8, 0.0  ;;  %v1487_v46 = vmul.f32 0.2, %v1359_v8 }
 0x249   : > { %v1550_v28 = vsel %vm1422_vm7, %v1358_v48, %v1486_v44 }
 0x24a   : > { %1615 = vst.msk [vmem:[%s3074_s4 + $0x1f0] sm:$0xff] %vm1552_vm4, %v1550_v28  ;;  %v1551_v25 = vsel %vm1423_vm8, %v1359_v8, %v1487_v46 }
 0x24b   : > { %1616 = vst.msk [vmem:[%s3074_s4 + $0x1f8] sm:$0xff] %vm1552_vm4, %v1551_v25 }
 0x24c PF: > { %s14_s17 = sadd.s32 1, %s1963_s17   ;;  %s3191_s15 = smov %s1959_s16 }
 0x24d   : > { %p11_p7 = scmp.ge.s32.totalorder %s14_s17, 4   ;;  %s3192_s16 = smov %s3194_s18 }
 0x24f   :  { %13 = sbr.rel (!%p11_p7) target bundleno = 2 (0x2), region = 78 }

// kernel: discriminator32_forward.5
= control target key start
LH: loop header
LB: loop body
LE: loop exit
PB: predicated region body
PF: predicated region fallthrough
CT: control target
= control target key end

     0   :  { %s1533_s15 = smov 0   ;;  %s1535_s16 = smov 0   ;;  %s1993_s0 = inlined_call_operand.vmem [shape: bf16[128,512], index: 0, kind: input, shape index: {}]   ;;  %s1994_s1 = inlined_call_operand.vmem [shape: bf16[512,64], index: 1, kind: input, shape index: {}]   ;;  %s1995_s2 = inlined_call_operand.vmem [shape: f32[1,64], index: 2, kind: input, shape index: {}]   ;;  %s1996_s3 = inlined_call_operand.vmem [shape: f32[1,64], index: 3, kind: input, shape index: {}]   ;;  %s1997_s4 = inlined_call_operand.vmem [shape: f32[128,64], index: 4, kind: output, shape index: {}]  }
   0x1   :  { %s1537_s17 = smov 0  }
   0x2 LB: > { %s26_s18 = sadd.s32 1, %s1501_s16  ;;  %p1175_p0 = scmp.ge.s32.totalorder %s1505_s17, 1  ;;  %s1505_s17 = sphi %s1537_s17, %s14_s17   ;;  %s1501_s16 = sphi %s1535_s16, %s1999_s16   ;;  %s1497_s15 = sphi %s1533_s15, %s1998_s15  }
   0x3   : > { %p28_p1 = scmp.ge.s32.totalorder %s26_s18, 2  ;;  %p178_p2 = scmp.lt.s32.totalorder %s1505_s17, 3 }
   0x5   : > { %s2001_s18 = smov (%p28_p1, %s26_s18), 0  ;;  %p179_p3 = pnand %p1175_p0, %p178_p2 }
   0x6   : > { %v1401_v0 = vld [vmem:[%s1994_s1 + $0x40] sm:$0xff] (!%p179_p3)   ;;  %v1405_v4 = vld [vmem:[%s1994_s1 + $0x48] sm:$0xff] (!%p179_p3)   ;;  %v1409_v8 = vld [vmem:[%s1994_s1 + $0x50] sm:$0xff] (!%p179_p3)   ;;  %p864_p4 = scmp.eq.s32.totalorder (!%p179_p3), %s1497_s15, 0 }
   0x7   : > { %182 = sbr.rel (%p179_p3) target bundleno = 418 (0x1a2), region = 36  ;;  %v1402_v1 = vld [vmem:[%s1994_s1 + $0xc0] sm:$0xff] (!%p179_p3)   ;;  %1248 = vmatprep.subr.bf16.mxu0 (!%p179_p3), %v1401_v0  ;;  %v1406_v5 = vld [vmem:[%s1994_s1 + $0xc8] sm:$0xff] (!%p179_p3)   ;;  %v1410_v9 = vld [vmem:[%s1994_s1 + $0xd0] sm:$0xff] (!%p179_p3)  }
   0x8   : > { %v1403_v2 = vld [vmem:[%s1994_s1] sm:$0xff] (!%p179_p3)   ;;  %1312 = vmatprep.subr.bf16.mxu1 (!%p179_p3), %v1402_v1  ;;  %v1407_v6 = vld [vmem:[%s1994_s1 + $0x8] sm:$0xff] (!%p179_p3)   ;;  %v1411_v10 = vld [vmem:[%s1994_s1 + $0x10] sm:$0xff] (!%p179_p3)  }
   0x9   : > { %v1404_v3 = vld [vmem:[%s1994_s1 + $0x80] sm:$0xff] (!%p179_p3)   ;;  %1249 = vmatpush3.bf16.msra.mxu0 (!%p179_p3), %v1403_v2  ;;  %v1408_v7 = vld [vmem:[%s1994_s1 + $0x88] sm:$0xff] (!%p179_p3)   ;;  %v1412_v11 = vld [vmem:[%s1994_s1 + $0x90] sm:$0xff] (!%p179_p3)  }
   0xa   : > { %1313 = vmatpush3.bf16.msra.mxu1 (!%p179_p3), %v1404_v3  ;;  %1250 = vmatprep.subr.bf16.mxu0 (!%p179_p3), %v1405_v4  ;;  %v1413_v12 = vld [vmem:[%s1994_s1 + $0x58] sm:$0xff] (!%p179_p3)   ;;  %v1417_v16 = vld [vmem:[%s1994_s1 + $0x60] sm:$0xff] (!%p179_p3)   ;;  %v1421_v20 = vld [vmem:[%s1994_s1 + $0x68] sm:$0xff] (!%p179_p3)  }
   0xb   : > { %1314 = vmatprep.subr.bf16.mxu1 (!%p179_p3), %v1406_v5  ;;  %v1414_v13 = vld [vmem:[%s1994_s1 + $0xd8] sm:$0xff] (!%p179_p3)   ;;  %v1418_v17 = vld [vmem:[%s1994_s1 + $0xe0] sm:$0xff] (!%p179_p3)   ;;  %v1422_v21 = vld [vmem:[%s1994_s1 + $0xe8] sm:$0xff] (!%p179_p3)  }
   0xc   : > { %v1415_v14 = vld [vmem:[%s1994_s1 + $0x18] sm:$0xff] (!%p179_p3)   ;;  %v1419_v18 = vld [vmem:[%s1994_s1 + $0x20] sm:$0xff] (!%p179_p3)   ;;  %v1423_v22 = vld [vmem:[%s1994_s1 + $0x28] sm:$0xff] (!%p179_p3)  }
   0xd   : > { %1251 = vmatpush3.bf16.msra.mxu0 (!%p179_p3), %v1407_v6  ;;  %v1416_v15 = vld [vmem:[%s1994_s1 + $0x98] sm:$0xff] (!%p179_p3)   ;;  %v1420_v19 = vld [vmem:[%s1994_s1 + $0xa0] sm:$0xff] (!%p179_p3)   ;;  %v1424_v23 = vld [vmem:[%s1994_s1 + $0xa8] sm:$0xff] (!%p179_p3)  }
   0xe   : > { %1315 = vmatpush3.bf16.msra.mxu1 %v1408_v7  ;;  %1252 = vmatprep.subr.bf16.mxu0 %v1409_v8  ;;  %v1425_v24 = vld [vmem:[%s1994_s1 + $0x70] sm:$0xff]   ;;  %v1429_v28 = vld [vmem:[%s1994_s1 + $0x78] sm:$0xff]   ;;  %vm870_vm0 = vcmask (%p864_p4), 516096  }
   0xf   : > { %1316 = vmatprep.subr.bf16.mxu1 %v1410_v9  ;;  %v1426_v25 = vld [vmem:[%s1994_s1 + $0xf0] sm:$0xff]   ;;  %v1430_v29 = vld [vmem:[%s1994_s1 + $0xf8] sm:$0xff]  }
  0x10   : > { %v1427_v26 = vld [vmem:[%s1994_s1 + $0x30] sm:$0xff]   ;;  %v1431_v30 = vld [vmem:[%s1994_s1 + $0x38] sm:$0xff]  }
  0x11   : > { %1253 = vmatpush3.bf16.msra.mxu0 %v1411_v10  ;;  %v1428_v27 = vld [vmem:[%s1994_s1 + $0xb0] sm:$0xff]   ;;  %v1432_v31 = vld [vmem:[%s1994_s1 + $0xb8] sm:$0xff]  }
  0x12   : > { %1317 = vmatpush3.bf16.msra.mxu1 %v1412_v11  ;;  %1254 = vmatprep.subr.bf16.mxu0 %v1413_v12  ;;  %v1433_v32 = vld [vmem:[%s1993_s0] ss:$16 sps:$4 sm:$0xff]   ;;  %v1435_v33 = vld [vmem:[%s1993_s0 + $0x4] ss:$16 sps:$4 sm:$0xff]   ;;  %v1436_v34 = vld [vmem:[%s1993_s0 + $0x8] ss:$16 sps:$4 sm:$0xff]  }
  0x13   : > { %1318 = vmatprep.subr.bf16.mxu1 %v1414_v13  ;;  %v1438_v35 = vld [vmem:[%s1993_s0 + $0xc] ss:$16 sps:$4 sm:$0xff]   ;;  %702 = vmatprep.mubr.bf16.mxu0 %v1435_v33  ;;  %v1439_v36 = vld [vmem:[%s1993_s0 + $0x24] ss:$16 sps:$4 sm:$0xff]   ;;  %v1443_v38 = vld [vmem:[%s1993_s0 + $0x20] ss:$16 sps:$4 sm:$0xff]  }
  0x14   : > { %799 = vmatprep.mubr.bf16.mxu1 %v1438_v35  ;;  %v1441_v37 = vld [vmem:[%s1993_s0 + $0x2c] ss:$16 sps:$4 sm:$0xff]   ;;  %v1444_v39 = vld [vmem:[%s1993_s0 + $0x28] ss:$16 sps:$4 sm:$0xff]   ;;  %v1445_v40 = vld [vmem:[%s1993_s0 + $0x44] ss:$16 sps:$4 sm:$0xff]  }
  0x15   : > { %1255 = vmatpush3.bf16.msra.mxu0 %v1415_v14  ;;  %v1447_v41 = vld [vmem:[%s1993_s0 + $0x4c] ss:$16 sps:$4 sm:$0xff]   ;;  %v1449_v42 = vld [vmem:[%s1993_s0 + $0x40] ss:$16 sps:$4 sm:$0xff]   ;;  %v1450_v43 = vld [vmem:[%s1993_s0 + $0x48] ss:$16 sps:$4 sm:$0xff]  }
  0x16   : > { %1319 = vmatpush3.bf16.msra.mxu1 %v1416_v15  ;;  %1256 = vmatprep.subr.bf16.mxu0 %v1417_v16  ;;  %v1451_v44 = vld [vmem:[%s1993_s0 + $0x64] ss:$16 sps:$4 sm:$0xff]   ;;  %v1453_v45 = vld [vmem:[%s1993_s0 + $0x6c] ss:$16 sps:$4 sm:$0xff]   ;;  %v1455_v46 = vld [vmem:[%s1993_s0 + $0x60] ss:$16 sps:$4 sm:$0xff]  }
  0x17   : > { %1320 = vmatprep.subr.bf16.mxu1 %v1418_v17  ;;  %v1456_v47 = vld [vmem:[%s1993_s0 + $0x68] ss:$16 sps:$4 sm:$0xff]   ;;  %v1457_v48 = vld [vmem:[%s1993_s0 + $0x84] ss:$16 sps:$4 sm:$0xff]   ;;  %v1459_v49 = vld [vmem:[%s1993_s0 + $0x8c] ss:$16 sps:$4 sm:$0xff]  }
  0x18   : > { %v1461_v50 = vld [vmem:[%s1993_s0 + $0x80] ss:$16 sps:$4 sm:$0xff]   ;;  %v1462_v51 = vld [vmem:[%s1993_s0 + $0x88] ss:$16 sps:$4 sm:$0xff]   ;;  %v1463_v52 = vld [vmem:[%s1993_s0 + $0xa4] ss:$16 sps:$4 sm:$0xff]  }
  0x19   : > { %1257 = vmatpush3.bf16.msra.mxu0 %v1419_v18  ;;  %v1465_v53 = vld [vmem:[%s1993_s0 + $0xac] ss:$16 sps:$4 sm:$0xff]   ;;  %v1467_v54 = vld [vmem:[%s1993_s0 + $0xa0] ss:$16 sps:$4 sm:$0xff]   ;;  %v1468_v55 = vld [vmem:[%s1993_s0 + $0xa8] ss:$16 sps:$4 sm:$0xff]  }
  0x1a   : > { %1321 = vmatpush3.bf16.msra.mxu1 %v1420_v19  ;;  %1258 = vmatprep.subr.bf16.mxu0 %v1421_v20  ;;  %v1469_v56 = vld [vmem:[%s1993_s0 + $0xc4] ss:$16 sps:$4 sm:$0xff]   ;;  %v1471_v57 = vld [vmem:[%s1993_s0 + $0xcc] ss:$16 sps:$4 sm:$0xff]   ;;  %v1473_v58 = vld [vmem:[%s1993_s0 + $0xc0] ss:$16 sps:$4 sm:$0xff]  }
  0x1b   : > { %1322 = vmatprep.subr.bf16.mxu1 %v1422_v21  ;;  %v1474_v59 = vld [vmem:[%s1993_s0 + $0xc8] ss:$16 sps:$4 sm:$0xff]   ;;  %v1475_v60 = vld [vmem:[%s1993_s0 + $0xe4] ss:$16 sps:$4 sm:$0xff]   ;;  %v1477_v61 = vld [vmem:[%s1993_s0 + $0xec] ss:$16 sps:$4 sm:$0xff]  }
  0x1c   : > { %v1479_v62 = vld [vmem:[%s1993_s0 + $0xe0] ss:$16 sps:$4 sm:$0xff]   ;;  %v1480_v63 = vld [vmem:[%s1993_s0 + $0xe8] ss:$16 sps:$4 sm:$0xff]  }
  0x1d   : > { %1259 = vmatpush3.bf16.msra.mxu0 %v1423_v22 }
  0x1e   : > { %1323 = vmatpush3.bf16.msra.mxu1 %v1424_v23  ;;  %1260 = vmatprep.subr.bf16.mxu0 %v1425_v24 }
  0x1f   : > { %1324 = vmatprep.subr.bf16.mxu1 %v1426_v25 }
  0x21   : > { %1261 = vmatpush3.bf16.msra.mxu0 %v1427_v26 }
  0x22   : > { %1325 = vmatpush3.bf16.msra.mxu1 %v1428_v27  ;;  %1262 = vmatprep.subr.bf16.mxu0 %v1429_v28 }
  0x23   : > { %1326 = vmatprep.subr.bf16.mxu1 %v1430_v29 }
  0x25   : > { %1263 = vmatpush3.bf16.msra.mxu0 %v1431_v30 }
  0x26   : > { %1327 = vmatpush3.bf16.msra.mxu1 %v1432_v31 }
  0x28   : > { %703 = vmatmul.mubr.bf16.vlgmr.msra.gmra.mrb[0].mxu0 %v1433_v32 }
  0x29   : > { %800 = vmatmul.mubr.bf16.vlgmr.msra.gmra.mrb[0].mxu1 %v1436_v34  ;;  %710 = vmatprep.mubr.bf16.mxu0 %v1439_v36 }
  0x2a   : > { %807 = vmatprep.mubr.bf16.mxu1 %v1441_v37 }
  0x30   : > { %711 = vmatmul.mubr.bf16.gmra.mrb[4].mxu0 %v1443_v38 }
  0x31   : > { %808 = vmatmul.mubr.bf16.gmra.mrb[4].mxu1 %v1444_v39  ;;  %718 = vmatprep.mubr.bf16.mxu0 %v1445_v40 }
  0x32   : > { %815 = vmatprep.mubr.bf16.mxu1 %v1447_v41 }
  0x38   : > { %719 = vmatmul.mubr.bf16.gmra.mrb[8].mxu0 %v1449_v42 }
  0x39   : > { %816 = vmatmul.mubr.bf16.gmra.mrb[8].mxu1 %v1450_v43  ;;  %726 = vmatprep.mubr.bf16.mxu0 %v1451_v44 }
  0x3a   : > { %823 = vmatprep.mubr.bf16.mxu1 %v1453_v45 }
  0x40   : > { %727 = vmatmul.mubr.bf16.gmra.mrb[12].mxu0 %v1455_v46 }
  0x41   : > { %824 = vmatmul.mubr.bf16.gmra.mrb[12].mxu1 %v1456_v47  ;;  %734 = vmatprep.mubr.bf16.mxu0 %v1457_v48 }
  0x42   : > { %831 = vmatprep.mubr.bf16.mxu1 %v1459_v49 }
  0x48   : > { %735 = vmatmul.mubr.bf16.gmra.mrb[16].mxu0 %v1461_v50 }
  0x49   : > { %832 = vmatmul.mubr.bf16.gmra.mrb[16].mxu1 %v1462_v51  ;;  %742 = vmatprep.mubr.bf16.mxu0 %v1463_v52 }
  0x4a   : > { %839 = vmatprep.mubr.bf16.mxu1 %v1465_v53 }
  0x50   : > { %743 = vmatmul.mubr.bf16.gmra.mrb[20].mxu0 %v1467_v54 }
  0x51   : > { %840 = vmatmul.mubr.bf16.gmra.mrb[20].mxu1 %v1468_v55  ;;  %750 = vmatprep.mubr.bf16.mxu0 %v1469_v56 }
  0x52   : > { %847 = vmatprep.mubr.bf16.mxu1 %v1471_v57 }
  0x58   : > { %751 = vmatmul.mubr.bf16.gmra.mrb[24].mxu0 %v1473_v58 }
  0x59   : > { %848 = vmatmul.mubr.bf16.gmra.mrb[24].mxu1 %v1474_v59  ;;  %758 = vmatprep.mubr.bf16.mxu0 %v1475_v60 }
  0x5a   : > { %855 = vmatprep.mubr.bf16.mxu1 %v1477_v61 }
  0x60   : > { %759 = vmatmul.mubr.bf16.gmra.mrb[28].mxu0 %v1479_v62 }
  0x61   : > { %856 = vmatmul.mubr.bf16.gmra.mrb[28].mxu1 %v1480_v63 }
  0xfb   : > { %v1264_v0 = vpop.f32.mrb[0].mxu0 }
  0xfc   : > { %v1328_v1 = vpop.f32.mrb[0].mxu1  ;;  %v1265_v2 = vpop.f32.mrb[1].mxu0 }
  0xfd   : > { %v1266_v3 = vadd.f32 %v1265_v2, %v1264_v0  ;;  %v1329_v4 = vpop.f32.mrb[1].mxu1  ;;  %v1267_v5 = vpop.f32.mrb[2].mxu0 }
  0xfe   : > { %v1330_v6 = vadd.f32 %v1329_v4, %v1328_v1  ;;  %v1331_v7 = vpop.f32.mrb[2].mxu1  ;;  %v1268_v8 = vpop.f32.mrb[3].mxu0 }
  0xff   : > { %v1269_v9 = vadd.f32 %v1268_v8, %v1267_v5  ;;  %v1332_v10 = vpop.f32.mrb[3].mxu1 }
 0x100   : > { %v1746_v11 = vadd.f32 %v1330_v6, %v1266_v3  ;;  %v1333_v12 = vadd.f32 %v1332_v10, %v1331_v7 }
 0x102   : > { %v1748_v13 = vadd.f32 %v1333_v12, %v1269_v9 }
 0x103   : > { %v1270_v14 = vpop.f32.mrb[4].mxu0 }
 0x104   : > { %v1334_v15 = vpop.f32.mrb[4].mxu1  ;;  %v1271_v16 = vpop.f32.mrb[5].mxu0 }
 0x105   : > { %v1272_v17 = vadd.f32 %v1271_v16, %v1270_v14  ;;  %v1335_v18 = vpop.f32.mrb[5].mxu1  ;;  %v1273_v19 = vpop.f32.mrb[6].mxu0 }
 0x106   : > { %v1336_v20 = vadd.f32 %v1335_v18, %v1334_v15  ;;  %v1337_v21 = vpop.f32.mrb[6].mxu1  ;;  %v1274_v22 = vpop.f32.mrb[7].mxu0 }
 0x107   : > { %v1275_v23 = vadd.f32 %v1274_v22, %v1273_v19  ;;  %v1338_v24 = vpop.f32.mrb[7].mxu1 }
 0x108   : > { %v1750_v25 = vadd.f32 %v1336_v20, %v1272_v17  ;;  %v1339_v26 = vadd.f32 %v1338_v24, %v1337_v21 }
 0x10a   : > { %v1752_v27 = vadd.f32 %v1339_v26, %v1275_v23 }
 0x10b   : > { %v1276_v28 = vpop.f32.mrb[8].mxu0 }
 0x10c   : > { %v1340_v29 = vpop.f32.mrb[8].mxu1  ;;  %v1277_v30 = vpop.f32.mrb[9].mxu0 }
 0x10d   : > { %v1278_v31 = vadd.f32 %v1277_v30, %v1276_v28  ;;  %v1341_v32 = vpop.f32.mrb[9].mxu1  ;;  %v1279_v33 = vpop.f32.mrb[10].mxu0 }
 0x10e   : > { %v1342_v34 = vadd.f32 %v1341_v32, %v1340_v29  ;;  %v1343_v35 = vpop.f32.mrb[10].mxu1  ;;  %v1280_v36 = vpop.f32.mrb[11].mxu0 }
 0x10f   : > { %v1281_v37 = vadd.f32 %v1280_v36, %v1279_v33  ;;  %v1344_v38 = vpop.f32.mrb[11].mxu1 }
 0x110   : > { %v1754_v39 = vadd.f32 %v1342_v34, %v1278_v31  ;;  %v1345_v40 = vadd.f32 %v1344_v38, %v1343_v35 }
 0x112   : > { %v1756_v41 = vadd.f32 %v1345_v40, %v1281_v37 }
 0x113   : > { %v1282_v42 = vpop.f32.mrb[12].mxu0 }
 0x114   : > { %v1346_v43 = vpop.f32.mrb[12].mxu1  ;;  %v1283_v44 = vpop.f32.mrb[13].mxu0 }
 0x115   : > { %v1284_v45 = vadd.f32 %v1283_v44, %v1282_v42  ;;  %v1347_v46 = vpop.f32.mrb[13].mxu1  ;;  %v1285_v47 = vpop.f32.mrb[14].mxu0 }
 0x116   : > { %v1348_v48 = vadd.f32 %v1347_v46, %v1346_v43  ;;  %v1349_v49 = vpop.f32.mrb[14].mxu1  ;;  %v1286_v50 = vpop.f32.mrb[15].mxu0 }
 0x117   : > { %v1287_v51 = vadd.f32 %v1286_v50, %v1285_v47  ;;  %v1350_v52 = vpop.f32.mrb[15].mxu1 }
 0x118   : > { %v1758_v53 = vadd.f32 %v1348_v48, %v1284_v45  ;;  %v1351_v54 = vadd.f32 %v1350_v52, %v1349_v49 }
 0x11a   : > { %v1760_v55 = vadd.f32 %v1351_v54, %v1287_v51 }
 0x11b   : > { %v1288_v56 = vpop.f32.mrb[16].mxu0 }
 0x11c   : > { %v1352_v57 = vpop.f32.mrb[16].mxu1  ;;  %v1289_v58 = vpop.f32.mrb[17].mxu0 }
 0x11d   : > { %v1290_v59 = vadd.f32 %v1289_v58, %v1288_v56  ;;  %v1353_v60 = vpop.f32.mrb[17].mxu1  ;;  %v1291_v61 = vpop.f32.mrb[18].mxu0  ;;  %v1507_v56 = vmov (%p864_p4), 0.0  }
 0x11e   : > { %v1354_v62 = vadd.f32 %v1353_v60, %v1352_v57  ;;  %v1355_v63 = vpop.f32.mrb[18].mxu1  ;;  %v1292_v0 = vpop.f32.mrb[19].mxu0  ;;  %871 = vst.msk [vmem:[#allocation2] sm:$0x1] (%p864_p4), %vm870_vm0, %v1507_v56  ;;  %872 = vst.msk [vmem:[#allocation3] sm:$0x1] (%p864_p4), %vm870_vm0, %v1507_v56 }
 0x11f   : > { %v1293_v1 = vadd.f32 %v1292_v0, %v1291_v61  ;;  %v1356_v2 = vpop.f32.mrb[19].mxu1 }
 0x120   : > { %v1762_v3 = vadd.f32 %v1354_v62, %v1290_v59  ;;  %v1357_v4 = vadd.f32 %v1356_v2, %v1355_v63 }
 0x122   : > { %v1764_v5 = vadd.f32 %v1357_v4, %v1293_v1 }
 0x123   : > { %v1294_v6 = vpop.f32.mrb[20].mxu0 }
 0x124   : > { %v1358_v7 = vpop.f32.mrb[20].mxu1  ;;  %v1295_v8 = vpop.f32.mrb[21].mxu0 }
 0x125   : > { %v1296_v9 = vadd.f32 %v1295_v8, %v1294_v6  ;;  %v1359_v10 = vpop.f32.mrb[21].mxu1  ;;  %v1297_v12 = vpop.f32.mrb[22].mxu0 }
 0x126   : > { %v1360_v14 = vadd.f32 %v1359_v10, %v1358_v7  ;;  %v1361_v15 = vpop.f32.mrb[22].mxu1  ;;  %v1298_v16 = vpop.f32.mrb[23].mxu0 }
 0x127   : > { %v1299_v17 = vadd.f32 %v1298_v16, %v1297_v12  ;;  %v1362_v18 = vpop.f32.mrb[23].mxu1 }
 0x128   : > { %v1766_v19 = vadd.f32 %v1360_v14, %v1296_v9  ;;  %v1363_v20 = vadd.f32 %v1362_v18, %v1361_v15 }
 0x12a   : > { %v1768_v21 = vadd.f32 %v1363_v20, %v1299_v17 }
 0x12b   : > { %v1300_v22 = vpop.f32.mrb[24].mxu0 }
 0x12c   : > { %v1364_v23 = vpop.f32.mrb[24].mxu1  ;;  %v1301_v24 = vpop.f32.mrb[25].mxu0 }
 0x12d   : > { %v1302_v26 = vadd.f32 %v1301_v24, %v1300_v22  ;;  %v1365_v28 = vpop.f32.mrb[25].mxu1  ;;  %v1303_v29 = vpop.f32.mrb[26].mxu0 }
 0x12e   : > { %v1366_v30 = vadd.f32 %v1365_v28, %v1364_v23  ;;  %v1367_v31 = vpop.f32.mrb[26].mxu1  ;;  %v1304_v32 = vpop.f32.mrb[27].mxu0 }
 0x12f   : > { %v1305_v33 = vadd.f32 %v1304_v32, %v1303_v29  ;;  %v1368_v34 = vpop.f32.mrb[27].mxu1 }
 0x130   : > { %v1770_v35 = vadd.f32 %v1366_v30, %v1302_v26  ;;  %v1369_v36 = vadd.f32 %v1368_v34, %v1367_v31 }
 0x132   : > { %v1772_v37 = vadd.f32 %v1369_v36, %v1305_v33 }
 0x133   : > { %v1306_v38 = vpop.f32.mrb[28].mxu0 }
 0x134   : > { %v1370_v40 = vpop.f32.mrb[28].mxu1  ;;  %v1307_v42 = vpop.f32.mrb[29].mxu0  ;;  %869 = sbr.rel (!%p864_p4) target bundleno = 315 (0x13b), region = 40 }
 0x135   : > { %v1308_v43 = vadd.f32 %v1307_v42, %v1306_v38  ;;  %v1371_v44 = vpop.f32.mrb[29].mxu1  ;;  %v1309_v45 = vpop.f32.mrb[30].mxu0 }
 0x136   : > { %v1372_v46 = vadd.f32 %v1371_v44, %v1370_v40  ;;  %v1373_v47 = vpop.f32.mrb[30].mxu1  ;;  %v1310_v48 = vpop.f32.mrb[31].mxu0 }
 0x137   : > { %v1311_v49 = vadd.f32 %v1310_v48, %v1309_v45  ;;  %v1374_v50 = vpop.f32.mrb[31].mxu1 }
 0x138   : > { %v1774_v51 = vadd.f32 %v1372_v46, %v1308_v43  ;;  %v1375_v52 = vadd.f32 %v1374_v50, %v1373_v47 }
 0x13a   : > { %v1776_v54 = vadd.f32 %v1375_v52, %v1311_v49 }
 0x13b PF: > { %p1241_p5 = scmp.ne.s32.totalorder %s1497_s15, 0 }
 0x13c   : > { %vm877_vm1 = vcmask (!%p1241_p5), 523264   ;;  %v919_v0 = vmul.f32 (!%p1241_p5), %v1746_v11, %v1746_v11  ;;  %v920_v1 = vmul.f32 (!%p1241_p5), %v1748_v13, %v1748_v13  ;;  %v921_v4 = vmul.f32 (!%p1241_p5), %v1750_v25, %v1750_v25 }
 0x13d   : > { %875 = sbr.rel (%p1241_p5) target bundleno = 365 (0x16d), region = 44  ;;  %v878_v57 = vsel (!%p1241_p5), %vm877_vm1, %v1746_v11, 0.0  ;;  %v879_v58 = vsel (!%p1241_p5), %vm877_vm1, %v1748_v13, 0.0  ;;  %v881_v59 = vsel (!%p1241_p5), %vm877_vm1, %v1750_v25, 0.0  ;;  %v883_v61 = vsel (!%p1241_p5), %vm877_vm1, %v1752_v27, 0.0 }
 0x13e   : > { %v880_v60 = vadd.f32 (!%p1241_p5), %v879_v58, %v878_v57  ;;  %v885_v63 = vsel (!%p1241_p5), %vm877_vm1, %v1754_v39, 0.0  ;;  %v887_v6 = vsel (!%p1241_p5), %vm877_vm1, %v1756_v41, 0.0  ;;  %v922_v7 = vmul.f32 (!%p1241_p5), %v1752_v27, %v1752_v27 }
 0x13f   : > { %v889_v9 = vsel (!%p1241_p5), %vm877_vm1, %v1758_v53, 0.0  ;;  %v923_v10 = vmul.f32 (!%p1241_p5), %v1754_v39, %v1754_v39  ;;  %v935_v12 = vsel (!%p1241_p5), %vm877_vm1, %v919_v0, 0.0  ;;  %v936_v14 = vsel (!%p1241_p5), %vm877_vm1, %v920_v1, 0.0 }
 0x140   : > { %v882_v62 = vadd.f32 (!%p1241_p5), %v881_v59, %v880_v60  ;;  %v937_v16 = vadd.f32 (!%p1241_p5), %v936_v14, %v935_v12  ;;  %v938_v17 = vsel (!%p1241_p5), %vm877_vm1, %v921_v4, 0.0  ;;  %v891_v18 = vsel (!%p1241_p5), %vm877_vm1, %v1760_v55, 0.0 }
 0x141   : > { %v924_v20 = vmul.f32 (!%p1241_p5), %v1756_v41, %v1756_v41  ;;  %v940_v22 = vsel (!%p1241_p5), %vm877_vm1, %v922_v7, 0.0  ;;  %v893_v26 = vsel (!%p1241_p5), %vm877_vm1, %v1762_v3, 0.0  ;;  %v925_v28 = vmul.f32 (!%p1241_p5), %v1758_v53, %v1758_v53 }
 0x142   : > { %v884_v2 = vadd.f32 (!%p1241_p5), %v883_v61, %v882_v62  ;;  %v939_v24 = vadd.f32 (!%p1241_p5), %v938_v17, %v937_v16  ;;  %v942_v29 = vsel (!%p1241_p5), %vm877_vm1, %v923_v10, 0.0  ;;  %v895_v32 = vsel (!%p1241_p5), %vm877_vm1, %v1764_v5, 0.0 }
 0x143   : > { %v926_v33 = vmul.f32 (!%p1241_p5), %v1760_v55, %v1760_v55  ;;  %v944_v34 = vsel (!%p1241_p5), %vm877_vm1, %v924_v20, 0.0  ;;  %v897_v40 = vsel (!%p1241_p5), %vm877_vm1, %v1766_v19, 0.0  ;;  %v927_v42 = vmul.f32 (!%p1241_p5), %v1762_v3, %v1762_v3 }
 0x144   : > { %v886_v8 = vadd.f32 %v885_v63, %v884_v2  ;;  %v941_v31 = vadd.f32 %v940_v22, %v939_v24  ;;  %v946_v43 = vsel %vm877_vm1, %v925_v28, 0.0  ;;  %v899_v46 = vsel %vm877_vm1, %v1768_v21, 0.0 }
 0x145   : > { %v928_v47 = vmul.f32 %v1764_v5, %v1764_v5  ;;  %v948_v48 = vsel %vm877_vm1, %v926_v33, 0.0  ;;  %v901_v52 = vsel %vm877_vm1, %v1770_v35, 0.0  ;;  %v929_v56 = vmul.f32 %v1766_v19, %v1766_v19 }
 0x146   : > { %v888_v15 = vadd.f32 %v887_v6, %v886_v8  ;;  %v943_v38 = vadd.f32 %v942_v29, %v941_v31  ;;  %v950_v57 = vsel %vm877_vm1, %v927_v42, 0.0  ;;  %v903_v60 = vsel %vm877_vm1, %v1772_v37, 0.0 }
 0x147   : > { %v930_v61 = vmul.f32 %v1768_v21, %v1768_v21  ;;  %v952_v62 = vsel %vm877_vm1, %v928_v47, 0.0  ;;  %v905_v1 = vsel %vm877_vm1, %v1774_v51, 0.0  ;;  %v931_v2 = vmul.f32 %v1770_v35, %v1770_v35 }
 0x148   : > { %v890_v23 = vadd.f32 %v889_v9, %v888_v15  ;;  %v945_v45 = vadd.f32 %v944_v34, %v943_v38  ;;  %v954_v4 = vsel %vm877_vm1, %v929_v56, 0.0  ;;  %v907_v8 = vsel %vm877_vm1, %v1776_v54, 0.0 }
 0x149   : > { %v932_v9 = vmul.f32 %v1772_v37, %v1772_v37  ;;  %v956_v10 = vsel %vm877_vm1, %v930_v61, 0.0  ;;  %v933_v15 = vmul.f32 %v1774_v51, %v1774_v51  ;;  %v958_v16 = vsel %vm877_vm1, %v931_v2, 0.0 }
 0x14a   : > { %v892_v30 = vadd.f32 %v891_v18, %v890_v23  ;;  %v947_v50 = vadd.f32 %v946_v43, %v945_v45  ;;  %v934_v20 = vmul.f32 %v1776_v54, %v1776_v54  ;;  %vm916_vm2 = vcmask 516096  }
 0x14b   : > { %v960_v22 = vsel %vm877_vm1, %v932_v9, 0.0 }
 0x14c   : > { %v894_v36 = vadd.f32 %v893_v26, %v892_v30  ;;  %v949_v59 = vadd.f32 %v948_v48, %v947_v50  ;;  %v962_v26 = vsel %vm877_vm1, %v933_v15, 0.0  ;;  %v964_v30 = vsel %vm877_vm1, %v934_v20, 0.0  ;;  %v918_v48 = vld [vmem:[#allocation3] sm:$0x1] }
 0x14e   : > { %v896_v44 = vadd.f32 %v895_v32, %v894_v36  ;;  %v951_v0 = vadd.f32 %v950_v57, %v949_v59 }
 0x150   : > { %v898_v49 = vadd.f32 %v897_v40, %v896_v44  ;;  %v953_v7 = vadd.f32 %v952_v62, %v951_v0  ;;  %v876_v40 = vld [vmem:[#allocation2] sm:$0x1] }
 0x152   : > { %v900_v58 = vadd.f32 %v899_v46, %v898_v49  ;;  %v955_v14 = vadd.f32 %v954_v4, %v953_v7 }
 0x154   : > { %v902_v63 = vadd.f32 %v901_v52, %v900_v58  ;;  %v957_v18 = vadd.f32 %v956_v10, %v955_v14 }
 0x156   : > { %v904_v6 = vadd.f32 %v903_v60, %v902_v63  ;;  %v959_v24 = vadd.f32 %v958_v16, %v957_v18 }
 0x158   : > { %v906_v12 = vadd.f32 %v905_v1, %v904_v6  ;;  %v961_v29 = vadd.f32 %v960_v22, %v959_v24 }
 0x15a   : > { %v908_v17 = vadd.f32 %v907_v8, %v906_v12  ;;  %v963_v32 = vadd.f32 %v962_v26, %v961_v29 }
 0x15c   : > { %v909_v23 = vrot.slane %v908_v17, 4  ;;  %v965_v34 = vadd.f32 %v964_v30, %v963_v32 }
 0x15e   : > { %v910_v28 = vadd.f32 %v909_v23, %v908_v17  ;;  %v966_v38 = vrot.slane %v965_v34, 4 }
 0x160   : > { %v911_v31 = vrot.slane %v910_v28, 2  ;;  %v967_v43 = vadd.f32 %v966_v38, %v965_v34 }
 0x162   : > { %v912_v33 = vadd.f32 %v911_v31, %v910_v28  ;;  %v968_v45 = vrot.slane %v967_v43, 2 }
 0x164   : > { %v913_v36 = vrot.slane %v912_v33, 1  ;;  %v969_v46 = vadd.f32 %v968_v45, %v967_v43 }
 0x166   : > { %v914_v42 = vadd.f32 %v913_v36, %v912_v33  ;;  %v970_v47 = vrot.slane %v969_v46, 1 }
 0x168   : > { %v915_v44 = vadd.f32 %v914_v42, %v876_v40  ;;  %v971_v49 = vadd.f32 %v970_v47, %v969_v46 }
 0x16a   : > { %917 = vst.msk [vmem:[#allocation2] sm:$0x1] %vm916_vm2, %v915_v44  ;;  %v972_v50 = vadd.f32 %v971_v49, %v918_v48 }
 0x16c   : > { %973 = vst.msk [vmem:[#allocation3] sm:$0x1] %vm916_vm2, %v972_v50 }
 0x16d PF: > { %p1242_p6 = scmp.ne.s32.totalorder %s1497_s15, 1 }
 0x16e   : > { %v992_v62 = vlaneseq (!%p1242_p6)  ;;  %v986_v0 = vld [vmem:[%s1995_s2] sm:$0x1] (!%p1242_p6)  ;;  %vm1083_vm3 = vcmask (!%p1242_p6), 523264  }
 0x16f   : > { %977 = sbr.rel (%p1242_p6) target bundleno = 418 (0x1a2), region = 48  ;;  %v988_v6 = vld [vmem:[%s1996_s3] sm:$0x1] (!%p1242_p6) }
 0x170   : > { %v993_v63 = vshrl.u32 (!%p1242_p6), %v992_v62, 7 }
 0x171   : > { %v978_v52 = vld [vmem:[#allocation2] sm:$0x1] (!%p1242_p6) }
 0x172   : > { %v979_v57 = vmul.f32 (!%p1242_p6), 0.0078125, %v978_v52  ;;  %v994_v1 = vsub.s32 (!%p1242_p6), 0, %v993_v63 }
 0x173   : > { %v980_v56 = vld [vmem:[#allocation3] sm:$0x1] (!%p1242_p6) }
 0x174   : > { %v981_v58 = vmul.f32 (!%p1242_p6), 0.0078125, %v980_v56  ;;  %v982_v59 = vmul.f32 (!%p1242_p6), %v979_v57, %v979_v57 }
 0x176   : > { %v983_v60 = vsub.f32 %v981_v58, %v982_v59 }
 0x178   : > { %v984_v61 = vadd.f32 1e-05, %v983_v60 }
 0x17a   : > { %1481 = vrsqrt.f32 %v984_v61 }
 0x184   : > { %v1482_v2 = vpop.eup %1481 }
 0x185   : > { %v987_v4 = vmul.f32 %v1482_v2, %v986_v0 }
 0x187   : > { %v989_v7 = vmul.f32 %v987_v4, %v979_v57  ;;  %v1868_v8 = vrot.slane %v987_v4, %v994_v1 }
 0x189   : > { %v990_v9 = vsub.f32 %v988_v6, %v989_v7  ;;  %v997_v10 = vmul.f32 %v1868_v8, %v1746_v11  ;;  %v998_v12 = vmul.f32 %v1868_v8, %v1748_v13  ;;  %v999_v14 = vmul.f32 %v1868_v8, %v1750_v25 }
 0x18a   : > { %v1000_v15 = vmul.f32 %v1868_v8, %v1752_v27  ;;  %v1001_v16 = vmul.f32 %v1868_v8, %v1754_v39  ;;  %v1002_v17 = vmul.f32 %v1868_v8, %v1756_v41  ;;  %v1003_v18 = vmul.f32 %v1868_v8, %v1758_v53 }
 0x18b   : > { %v1884_v20 = vrot.slane %v990_v9, %v994_v1  ;;  %v1004_v11 = vmul.f32 %v1868_v8, %v1760_v55  ;;  %v1005_v13 = vmul.f32 %v1868_v8, %v1762_v3  ;;  %v1006_v25 = vmul.f32 %v1868_v8, %v1764_v5 }
 0x18c   : > { %v1007_v27 = vmul.f32 %v1868_v8, %v1766_v19  ;;  %v1008_v39 = vmul.f32 %v1868_v8, %v1768_v21  ;;  %v1009_v41 = vmul.f32 %v1868_v8, %v1770_v35  ;;  %v1010_v53 = vmul.f32 %v1868_v8, %v1772_v37 }
 0x18d   : > { %v1019_v55 = vadd.f32 %v1884_v20, %v997_v10  ;;  %v1020_v22 = vadd.f32 %v1884_v20, %v998_v12  ;;  %v1021_v3 = vadd.f32 %v1884_v20, %v999_v14  ;;  %v1022_v5 = vadd.f32 %v1884_v20, %v1000_v15 }
 0x18e   : > { %v1023_v23 = vadd.f32 %v1884_v20, %v1001_v16  ;;  %v1024_v19 = vadd.f32 %v1884_v20, %v1002_v17  ;;  %v1025_v21 = vadd.f32 %v1884_v20, %v1003_v18  ;;  %v1026_v24 = vadd.f32 %v1884_v20, %v1004_v11 }
 0x18f   : > { %vm1035_vm4 = vcmp.gt.f32.partialorder %v1019_v55, 0.0  ;;  %v1051_v35 = vmul.f32 0.2, %v1019_v55  ;;  %vm1036_vm5 = vcmp.gt.f32.partialorder %v1020_v22, 0.0  ;;  %v1052_v37 = vmul.f32 0.2, %v1020_v22 }
 0x190   : > { %vm1037_vm6 = vcmp.gt.f32.partialorder %v1021_v3, 0.0  ;;  %v1053_v26 = vmul.f32 0.2, %v1021_v3  ;;  %vm1038_vm7 = vcmp.gt.f32.partialorder %v1022_v5, 0.0  ;;  %v1054_v28 = vmul.f32 0.2, %v1022_v5 }
 0x191   : > { %v1067_v29 = vsel %vm1035_vm4, %v1019_v55, %v1051_v35  ;;  %v1068_v30 = vsel %vm1036_vm5, %v1020_v22, %v1052_v37  ;;  %vm1039_vm8 = vcmp.gt.f32.partialorder %v1023_v23, 0.0  ;;  %v1055_v31 = vmul.f32 0.2, %v1023_v23 }
 0x192   : > { %1084 = vst.msk [vmem:[%s1997_s4] sm:$0xff] %vm1083_vm3, %v1067_v29  ;;  %1085 = vst.msk [vmem:[%s1997_s4 + $0x8] sm:$0xff] %vm1083_vm3, %v1068_v30  ;;  %v1069_v32 = vsel %vm1037_vm6, %v1021_v3, %v1053_v26  ;;  %v1070_v33 = vsel %vm1038_vm7, %v1022_v5, %v1054_v28  ;;  %vm1040_vm9 = vcmp.gt.f32.partialorder %v1024_v19, 0.0  ;;  %v1056_v34 = vmul.f32 0.2, %v1024_v19 }
 0x193   : > { %1086 = vst.msk [vmem:[%s1997_s4 + $0x10] sm:$0xff] %vm1083_vm3, %v1069_v32  ;;  %1087 = vst.msk [vmem:[%s1997_s4 + $0x18] sm:$0xff] %vm1083_vm3, %v1070_v33  ;;  %v1071_v36 = vsel %vm1039_vm8, %v1023_v23, %v1055_v31  ;;  %vm1041_vm10 = vcmp.gt.f32.partialorder %v1025_v21, 0.0  ;;  %v1057_v38 = vmul.f32 0.2, %v1025_v21  ;;  %vm1042_vm11 = vcmp.gt.f32.partialorder %v1026_v24, 0.0 }
 0x194   : > { %1088 = vst.msk [vmem:[%s1997_s4 + $0x20] sm:$0xff] %vm1083_vm3, %v1071_v36  ;;  %v1072_v40 = vsel %vm1040_vm9, %v1024_v19, %v1056_v34  ;;  %v1058_v42 = vmul.f32 0.2, %v1026_v24  ;;  %v1027_v43 = vadd.f32 %v1884_v20, %v1005_v13  ;;  %v1028_v44 = vadd.f32 %v1884_v20, %v1006_v25 }
 0x195   : > { %1089 = vst.msk [vmem:[%s1997_s4 + $0x28] sm:$0xff] %vm1083_vm3, %v1072_v40  ;;  %v1073_v45 = vsel %vm1041_vm10, %v1025_v21, %v1057_v38  ;;  %v1029_v46 = vadd.f32 %v1884_v20, %v1007_v27  ;;  %v1030_v47 = vadd.f32 %v1884_v20, %v1008_v39  ;;  %v1031_v48 = vadd.f32 %v1884_v20, %v1009_v41 }
 0x196   : > { %1090 = vst.msk [vmem:[%s1997_s4 + $0x30] sm:$0xff] %vm1083_vm3, %v1073_v45  ;;  %v1074_v49 = vsel %vm1042_vm11, %v1026_v24, %v1058_v42  ;;  %vm1043_vm12 = vcmp.gt.f32.partialorder %v1027_v43, 0.0  ;;  %v1059_v50 = vmul.f32 0.2, %v1027_v43  ;;  %vm1044_vm13 = vcmp.gt.f32.partialorder %v1028_v44, 0.0 }
 0x197   : > { %1091 = vst.msk [vmem:[%s1997_s4 + $0x38] sm:$0xff] %vm1083_vm3, %v1074_v49  ;;  %v1060_v52 = vmul.f32 0.2, %v1028_v44  ;;  %vm1045_vm14 = vcmp.gt.f32.partialorder %v1029_v46, 0.0  ;;  %v1061_v56 = vmul.f32 0.2, %v1029_v46  ;;  %v1032_v62 = vadd.f32 %v1884_v20, %v1010_v53 }
 0x198   : > { %vm1046_vm15 = vcmp.gt.f32.partialorder %v1030_v47, 0.0  ;;  %v1075_v57 = vsel %vm1043_vm12, %v1027_v43, %v1059_v50  ;;  %v1062_v58 = vmul.f32 0.2, %v1030_v47  ;;  %vm1047_vm0 = vcmp.gt.f32.partialorder %v1031_v48, 0.0 }
 0x199   : > { %v1063_v59 = vmul.f32 0.2, %v1031_v48  ;;  %1092 = vst.msk [vmem:[%s1997_s4 + $0x40] sm:$0xff] %vm1083_vm3, %v1075_v57  ;;  %v1076_v60 = vsel %vm1044_vm13, %v1028_v44, %v1060_v52  ;;  %v1077_v61 = vsel %vm1045_vm14, %v1029_v46, %v1061_v56  ;;  %v1011_v63 = vmul.f32 %v1868_v8, %v1774_v51 }
 0x19a   : > { %1093 = vst.msk [vmem:[%s1997_s4 + $0x48] sm:$0xff] %vm1083_vm3, %v1076_v60  ;;  %1094 = vst.msk [vmem:[%s1997_s4 + $0x50] sm:$0xff] %vm1083_vm3, %v1077_v61  ;;  %v1078_v0 = vsel %vm1046_vm15, %v1030_v47, %v1062_v58  ;;  %v1012_v2 = vmul.f32 %v1868_v8, %v1776_v54  ;;  %vm1048_vm1 = vcmp.gt.f32.partialorder %v1032_v62, 0.0  ;;  %v1064_v51 = vmul.f32 0.2, %v1032_v62 }
 0x19b   : > { %v1079_v1 = vsel %vm1047_vm0, %v1031_v48, %v1063_v59  ;;  %1095 = vst.msk [vmem:[%s1997_s4 + $0x58] sm:$0xff] %vm1083_vm3, %v1078_v0  ;;  %v1033_v4 = vadd.f32 %v1884_v20, %v1011_v63 }
 0x19c   : > { %1096 = vst.msk [vmem:[%s1997_s4 + $0x60] sm:$0xff] %vm1083_vm3, %v1079_v1  ;;  %v1034_v6 = vadd.f32 %v1884_v20, %v1012_v2  ;;  %v1080_v7 = vsel %vm1048_vm1, %v1032_v62, %v1064_v51 }
 0x19d   : > { %vm1049_vm2 = vcmp.gt.f32.partialorder %v1033_v4, 0.0  ;;  %v1065_v9 = vmul.f32 0.2, %v1033_v4  ;;  %1097 = vst.msk [vmem:[%s1997_s4 + $0x68] sm:$0xff] %vm1083_vm3, %v1080_v7 }
 0x19e   : > { %vm1050_vm4 = vcmp.gt.f32.partialorder %v1034_v6, 0.0  ;;  %v1066_v54 = vmul.f32 0.2, %v1034_v6 }
 0x19f   : > { %v1081_v8 = vsel %vm1049_vm2, %v1033_v4, %v1065_v9 }
 0x1a0   : > { %1098 = vst.msk [vmem:[%s1997_s4 + $0x70] sm:$0xff] %vm1083_vm3, %v1081_v8  ;;  %v1082_v10 = vsel %vm1050_vm4, %v1034_v6, %v1066_v54 }
 0x1a1   : > { %1099 = vst.msk [vmem:[%s1997_s4 + $0x78] sm:$0xff] %vm1083_vm3, %v1082_v10 }
 0x1a2 PF: > { %s14_s17 = sadd.s32 1, %s1505_s17   ;;  %s1998_s15 = smov %s1501_s16 }
 0x1a3   : > { %p11_p7 = scmp.ge.s32.totalorder %s14_s17, 4   ;;  %s1999_s16 = smov %s2001_s18 }
 0x1a5   :  { %13 = sbr.rel (!%p11_p7) target bundleno = 2 (0x2), region = 78 }

// kernel: discriminator32_forward.6
= control target key start
LH: loop header
LB: loop body
LE: loop exit
PB: predicated region body
PF: predicated region fallthrough
CT: control target
= control target key end

     0   :  { %s1535_s15 = smov 0   ;;  %s1537_s16 = smov 0   ;;  %s1839_s0 = inlined_call_operand.vmem [shape: bf16[32,1024], index: 0, kind: input, shape index: {}]   ;;  %s1840_s1 = inlined_call_operand.vmem [shape: bf16[1024,128], index: 1, kind: input, shape index: {}]   ;;  %s1841_s2 = inlined_call_operand.vmem [shape: f32[1,128], index: 2, kind: input, shape index: {}]   ;;  %s1842_s3 = inlined_call_operand.vmem [shape: f32[1,128], index: 3, kind: input, shape index: {}]   ;;  %s1843_s4 = inlined_call_operand.vmem [shape: f32[32,128], index: 4, kind: output, shape index: {}]  }
   0x1   :  { %s1539_s17 = smov 0  }
   0x2 LB: > { %s26_s18 = sadd.s32 1, %s1503_s16  ;;  %p1193_p0 = scmp.ge.s32.totalorder %s1507_s17, 1  ;;  %s1507_s17 = sphi %s1539_s17, %s14_s17   ;;  %s1503_s16 = sphi %s1537_s16, %s1845_s16   ;;  %s1499_s15 = sphi %s1535_s15, %s1844_s15  }
   0x3   : > { %p28_p1 = scmp.ge.s32.totalorder %s26_s18, 2  ;;  %p178_p2 = scmp.lt.s32.totalorder %s1507_s17, 3 }
   0x5   : > { %s1847_s18 = smov (%p28_p1, %s26_s18), 0  ;;  %p179_p3 = pnand %p1193_p0, %p178_p2 }
   0x6   : > { %v1419_v0 = vld [vmem:[%s1840_s1 + $0x40] sm:$0xff] (!%p179_p3)   ;;  %v1423_v4 = vld [vmem:[%s1840_s1 + $0x48] sm:$0xff] (!%p179_p3)   ;;  %v1427_v8 = vld [vmem:[%s1840_s1 + $0x50] sm:$0xff] (!%p179_p3)   ;;  %p1026_p4 = scmp.eq.s32.totalorder (!%p179_p3), %s1499_s15, 0 }
   0x7   : > { %182 = sbr.rel (%p179_p3) target bundleno = 363 (0x16b), region = 36  ;;  %v1420_v1 = vld [vmem:[%s1840_s1 + $0xc0] sm:$0xff] (!%p179_p3)   ;;  %1282 = vmatprep.subr.bf16.mxu0 (!%p179_p3), %v1419_v0  ;;  %v1424_v5 = vld [vmem:[%s1840_s1 + $0xc8] sm:$0xff] (!%p179_p3)   ;;  %v1428_v9 = vld [vmem:[%s1840_s1 + $0xd0] sm:$0xff] (!%p179_p3)  }
   0x8   : > { %v1421_v2 = vld [vmem:[%s1840_s1] sm:$0xff] (!%p179_p3)   ;;  %1310 = vmatprep.subr.bf16.mxu1 (!%p179_p3), %v1420_v1  ;;  %v1425_v6 = vld [vmem:[%s1840_s1 + $0x8] sm:$0xff] (!%p179_p3)   ;;  %v1429_v10 = vld [vmem:[%s1840_s1 + $0x10] sm:$0xff] (!%p179_p3)  }
   0x9   : > { %v1422_v3 = vld [vmem:[%s1840_s1 + $0x80] sm:$0xff] (!%p179_p3)   ;;  %1283 = vmatpush3.bf16.msra.mxu0 (!%p179_p3), %v1421_v2  ;;  %v1426_v7 = vld [vmem:[%s1840_s1 + $0x88] sm:$0xff] (!%p179_p3)   ;;  %v1430_v11 = vld [vmem:[%s1840_s1 + $0x90] sm:$0xff] (!%p179_p3)  }
   0xa   : > { %1311 = vmatpush3.bf16.msra.mxu1 (!%p179_p3), %v1422_v3  ;;  %1284 = vmatprep.subr.bf16.mxu0 (!%p179_p3), %v1423_v4  ;;  %v1431_v12 = vld [vmem:[%s1840_s1 + $0x58] sm:$0xff] (!%p179_p3)   ;;  %v1435_v16 = vld [vmem:[%s1840_s1 + $0x60] sm:$0xff] (!%p179_p3)   ;;  %v1439_v20 = vld [vmem:[%s1840_s1 + $0x68] sm:$0xff] (!%p179_p3)  }
   0xb   : > { %1312 = vmatprep.subr.bf16.mxu1 (!%p179_p3), %v1424_v5  ;;  %v1432_v13 = vld [vmem:[%s1840_s1 + $0xd8] sm:$0xff] (!%p179_p3)   ;;  %v1436_v17 = vld [vmem:[%s1840_s1 + $0xe0] sm:$0xff] (!%p179_p3)   ;;  %v1440_v21 = vld [vmem:[%s1840_s1 + $0xe8] sm:$0xff] (!%p179_p3)  }
   0xc   : > { %v1433_v14 = vld [vmem:[%s1840_s1 + $0x18] sm:$0xff] (!%p179_p3)   ;;  %v1437_v18 = vld [vmem:[%s1840_s1 + $0x20] sm:$0xff] (!%p179_p3)   ;;  %v1441_v22 = vld [vmem:[%s1840_s1 + $0x28] sm:$0xff] (!%p179_p3)  }
   0xd   : > { %1285 = vmatpush3.bf16.msra.mxu0 (!%p179_p3), %v1425_v6  ;;  %v1434_v15 = vld [vmem:[%s1840_s1 + $0x98] sm:$0xff] (!%p179_p3)   ;;  %v1438_v19 = vld [vmem:[%s1840_s1 + $0xa0] sm:$0xff] (!%p179_p3)   ;;  %v1442_v23 = vld [vmem:[%s1840_s1 + $0xa8] sm:$0xff] (!%p179_p3)  }
   0xe   : > { %1313 = vmatpush3.bf16.msra.mxu1 %v1426_v7  ;;  %1286 = vmatprep.subr.bf16.mxu0 %v1427_v8  ;;  %v1443_v24 = vld [vmem:[%s1840_s1 + $0x70] sm:$0xff]   ;;  %v1447_v28 = vld [vmem:[%s1840_s1 + $0x78] sm:$0xff]   ;;  %v222_v32 = vld [vmem:[%s1839_s0] sm:$0xff] }
   0xf   : > { %1314 = vmatprep.subr.bf16.mxu1 %v1428_v9  ;;  %v1444_v25 = vld [vmem:[%s1840_s1 + $0xf0] sm:$0xff]   ;;  %v1448_v29 = vld [vmem:[%s1840_s1 + $0xf8] sm:$0xff]   ;;  %v226_v33 = vld [vmem:[%s1839_s0 + $0x20] sm:$0xff] }
  0x10   : > { %v1445_v26 = vld [vmem:[%s1840_s1 + $0x30] sm:$0xff]   ;;  %v1449_v30 = vld [vmem:[%s1840_s1 + $0x38] sm:$0xff]   ;;  %v223_v34 = vld [vmem:[%s1839_s0 + $0x8] sm:$0xff]  ;;  %v1194_v35 = vcombine.low %v222_v32, %v226_v33  ;;  %v1195_v36 = vcombine.high %v222_v32, %v226_v33 }
  0x11   : > { %1287 = vmatpush3.bf16.msra.mxu0 %v1429_v10  ;;  %v1446_v27 = vld [vmem:[%s1840_s1 + $0xb0] sm:$0xff]   ;;  %v1450_v31 = vld [vmem:[%s1840_s1 + $0xb8] sm:$0xff]   ;;  %v227_v37 = vld [vmem:[%s1839_s0 + $0x28] sm:$0xff] }
  0x12   : > { %1315 = vmatpush3.bf16.msra.mxu1 %v1430_v11  ;;  %1288 = vmatprep.subr.bf16.mxu0 %v1431_v12  ;;  %v1196_v38 = vcombine.low %v223_v34, %v227_v37  ;;  %v1197_v39 = vcombine.high %v223_v34, %v227_v37  ;;  %v1451_v40 = vld [vmem:[%s1840_s1 + $0x140] sm:$0xff]   ;;  %v1455_v44 = vld [vmem:[%s1840_s1 + $0x148] sm:$0xff]   ;;  %v1459_v48 = vld [vmem:[%s1840_s1 + $0x150] sm:$0xff]  }
  0x13   : > { %1316 = vmatprep.subr.bf16.mxu1 %v1432_v13  ;;  %862 = vmatprep.mubr.bf16.mxu0 %v1195_v36  ;;  %v1452_v41 = vld [vmem:[%s1840_s1 + $0x1c0] sm:$0xff]   ;;  %v1456_v45 = vld [vmem:[%s1840_s1 + $0x1c8] sm:$0xff]   ;;  %v1460_v49 = vld [vmem:[%s1840_s1 + $0x1d0] sm:$0xff]  }
  0x14   : > { %911 = vmatprep.mubr.bf16.mxu1 %v1197_v39  ;;  %v1453_v42 = vld [vmem:[%s1840_s1 + $0x100] sm:$0xff]   ;;  %v1457_v46 = vld [vmem:[%s1840_s1 + $0x108] sm:$0xff]   ;;  %v1461_v50 = vld [vmem:[%s1840_s1 + $0x110] sm:$0xff]  }
  0x15   : > { %1289 = vmatpush3.bf16.msra.mxu0 %v1433_v14  ;;  %v1454_v43 = vld [vmem:[%s1840_s1 + $0x180] sm:$0xff]   ;;  %v1458_v47 = vld [vmem:[%s1840_s1 + $0x188] sm:$0xff]   ;;  %v1462_v51 = vld [vmem:[%s1840_s1 + $0x190] sm:$0xff]  }
  0x16   : > { %1317 = vmatpush3.bf16.msra.mxu1 %v1434_v15  ;;  %1290 = vmatprep.subr.bf16.mxu0 %v1435_v16  ;;  %v1463_v52 = vld [vmem:[%s1840_s1 + $0x158] sm:$0xff]   ;;  %v1467_v56 = vld [vmem:[%s1840_s1 + $0x160] sm:$0xff]   ;;  %v231_v63 = vld [vmem:[%s1839_s0 + $0x48] sm:$0xff] }
  0x17   : > { %1318 = vmatprep.subr.bf16.mxu1 %v1436_v17  ;;  %v1464_v53 = vld [vmem:[%s1840_s1 + $0x1d8] sm:$0xff]   ;;  %v1468_v57 = vld [vmem:[%s1840_s1 + $0x1e0] sm:$0xff]   ;;  %v235_v0 = vld [vmem:[%s1839_s0 + $0x68] sm:$0xff] }
  0x18   : > { %v1465_v54 = vld [vmem:[%s1840_s1 + $0x118] sm:$0xff]   ;;  %v1469_v58 = vld [vmem:[%s1840_s1 + $0x120] sm:$0xff]   ;;  %v1205_v2 = vcombine.high %v231_v63, %v235_v0  ;;  %v1471_v3 = vld [vmem:[%s1840_s1 + $0x168] sm:$0xff]   ;;  %v1204_v4 = vcombine.low %v231_v63, %v235_v0 }
  0x19   : > { %1291 = vmatpush3.bf16.msra.mxu0 %v1437_v18  ;;  %v1466_v55 = vld [vmem:[%s1840_s1 + $0x198] sm:$0xff]   ;;  %v1470_v59 = vld [vmem:[%s1840_s1 + $0x1a0] sm:$0xff]   ;;  %v1472_v5 = vld [vmem:[%s1840_s1 + $0x1e8] sm:$0xff]  }
  0x1a   : > { %1319 = vmatpush3.bf16.msra.mxu1 %v1438_v19  ;;  %1292 = vmatprep.subr.bf16.mxu0 %v1439_v20  ;;  %v230_v60 = vld [vmem:[%s1839_s0 + $0x40] sm:$0xff]  ;;  %v1473_v6 = vld [vmem:[%s1840_s1 + $0x128] sm:$0xff]   ;;  %v1475_v8 = vld [vmem:[%s1840_s1 + $0x170] sm:$0xff]  }
  0x1b   : > { %1320 = vmatprep.subr.bf16.mxu1 %v1440_v21  ;;  %v234_v61 = vld [vmem:[%s1839_s0 + $0x60] sm:$0xff]  ;;  %v1474_v7 = vld [vmem:[%s1840_s1 + $0x1a8] sm:$0xff]   ;;  %v1476_v9 = vld [vmem:[%s1840_s1 + $0x1f0] sm:$0xff]  }
  0x1c   : > { %v1203_v62 = vcombine.high %v230_v60, %v234_v61  ;;  %v1202_v1 = vcombine.low %v230_v60, %v234_v61  ;;  %v1477_v10 = vld [vmem:[%s1840_s1 + $0x130] sm:$0xff]   ;;  %v1479_v12 = vld [vmem:[%s1840_s1 + $0x178] sm:$0xff]  }
  0x1d   : > { %1293 = vmatpush3.bf16.msra.mxu0 %v1441_v22  ;;  %v1478_v11 = vld [vmem:[%s1840_s1 + $0x1b0] sm:$0xff]   ;;  %v1480_v13 = vld [vmem:[%s1840_s1 + $0x1f8] sm:$0xff]  }
  0x1e   : > { %1321 = vmatpush3.bf16.msra.mxu1 %v1442_v23  ;;  %1294 = vmatprep.subr.bf16.mxu0 %v1443_v24  ;;  %v1481_v14 = vld [vmem:[%s1840_s1 + $0x138] sm:$0xff]   ;;  %v224_v16 = vld [vmem:[%s1839_s0 + $0x10] sm:$0xff] }
  0x1f   : > { %1322 = vmatprep.subr.bf16.mxu1 %v1444_v25  ;;  %v1482_v15 = vld [vmem:[%s1840_s1 + $0x1b8] sm:$0xff]   ;;  %v228_v17 = vld [vmem:[%s1839_s0 + $0x30] sm:$0xff] }
  0x20   : > { %v225_v18 = vld [vmem:[%s1839_s0 + $0x18] sm:$0xff]  ;;  %v1198_v20 = vcombine.low %v224_v16, %v228_v17  ;;  %v1199_v21 = vcombine.high %v224_v16, %v228_v17  ;;  %v232_v24 = vld [vmem:[%s1839_s0 + $0x50] sm:$0xff] }
  0x21   : > { %1295 = vmatpush3.bf16.msra.mxu0 %v1445_v26  ;;  %v229_v19 = vld [vmem:[%s1839_s0 + $0x38] sm:$0xff]  ;;  %v236_v25 = vld [vmem:[%s1839_s0 + $0x70] sm:$0xff] }
  0x22   : > { %1323 = vmatpush3.bf16.msra.mxu1 %v1446_v27  ;;  %1296 = vmatprep.subr.bf16.mxu0 %v1447_v28  ;;  %v1200_v22 = vcombine.low %v225_v18, %v229_v19  ;;  %v1201_v23 = vcombine.high %v225_v18, %v229_v19  ;;  %v233_v26 = vld [vmem:[%s1839_s0 + $0x58] sm:$0xff]  ;;  %v1207_v27 = vcombine.high %v232_v24, %v236_v25 }
  0x23   : > { %1324 = vmatprep.subr.bf16.mxu1 %v1448_v29  ;;  %v237_v28 = vld [vmem:[%s1839_s0 + $0x78] sm:$0xff] }
  0x24   : > { %v1209_v29 = vcombine.high %v233_v26, %v237_v28 }
  0x25   : > { %1297 = vmatpush3.bf16.msra.mxu0 %v1449_v30  ;;  %v1206_v30 = vcombine.low %v232_v24, %v236_v25 }
  0x26   : > { %1325 = vmatpush3.bf16.msra.mxu1 %v1450_v31  ;;  %1338 = vmatprep.subr.bf16.mxu0 %v1451_v40  ;;  %v1208_v31 = vcombine.low %v233_v26, %v237_v28  ;;  %v1509_v28 = vmov (%p1026_p4), 0.0  }
  0x27   : > { %1366 = vmatprep.subr.bf16.mxu1 %v1452_v41  ;;  %1032 = vst [vmem:[#allocation2] sm:$0x1] (%p1026_p4), %v1509_v28  ;;  %1033 = vst [vmem:[#allocation3] sm:$0x1] (%p1026_p4), %v1509_v28 }
  0x28   : > { %863 = vmatmul.mubr.bf16.vlgmr.msra.gmra.mrb[0].mxu0 %v1194_v35 }
  0x29   : > { %912 = vmatmul.mubr.bf16.vlgmr.msra.gmra.mrb[0].mxu1 %v1196_v38  ;;  %1339 = vmatpush3.bf16.msra.mxu0 %v1453_v42 }
  0x2a   : > { %1367 = vmatpush3.bf16.msra.mxu1 %v1454_v43  ;;  %1340 = vmatprep.subr.bf16.mxu0 %v1455_v44 }
  0x2b   : > { %1368 = vmatprep.subr.bf16.mxu1 %v1456_v45  ;;  %870 = vmatprep.mubr.bf16.mxu0 %v1203_v62 }
  0x2c   : > { %919 = vmatprep.mubr.bf16.mxu1 %v1205_v2 }
  0x2d   : > { %1341 = vmatpush3.bf16.msra.mxu0 %v1457_v46 }
  0x2e   : > { %1369 = vmatpush3.bf16.msra.mxu1 %v1458_v47  ;;  %1342 = vmatprep.subr.bf16.mxu0 %v1459_v48 }
  0x2f   : > { %1370 = vmatprep.subr.bf16.mxu1 %v1460_v49 }
  0x30   : > { %871 = vmatmul.mubr.bf16.gmra.mrb[4].mxu0 %v1202_v1 }
  0x31   : > { %1343 = vmatpush3.bf16.msra.mxu0 %v1461_v50  ;;  %920 = vmatmul.mubr.bf16.gmra.mrb[4].mxu1 %v1204_v4 }
  0x32   : > { %1371 = vmatpush3.bf16.msra.mxu1 %v1462_v51  ;;  %1344 = vmatprep.subr.bf16.mxu0 %v1463_v52 }
  0x33   : > { %1372 = vmatprep.subr.bf16.mxu1 %v1464_v53  ;;  %960 = vmatprep.mubr.bf16.mxu0 %v1199_v21 }
  0x34   : > { %1009 = vmatprep.mubr.bf16.mxu1 %v1201_v23 }
  0x35   : > { %1345 = vmatpush3.bf16.msra.mxu0 %v1465_v54 }
  0x36   : > { %1373 = vmatpush3.bf16.msra.mxu1 %v1466_v55  ;;  %1346 = vmatprep.subr.bf16.mxu0 %v1467_v56 }
  0x37   : > { %1374 = vmatprep.subr.bf16.mxu1 %v1468_v57 }
  0x39   : > { %1347 = vmatpush3.bf16.msra.mxu0 %v1469_v58 }
  0x3a   : > { %1375 = vmatpush3.bf16.msra.mxu1 %v1470_v59  ;;  %1348 = vmatprep.subr.bf16.mxu0 %v1471_v3 }
  0x3b   : > { %1376 = vmatprep.subr.bf16.mxu1 %v1472_v5 }
  0x3d   : > { %1349 = vmatpush3.bf16.msra.mxu0 %v1473_v6 }
  0x3e   : > { %1377 = vmatpush3.bf16.msra.mxu1 %v1474_v7  ;;  %1350 = vmatprep.subr.bf16.mxu0 %v1475_v8 }
  0x3f   : > { %1378 = vmatprep.subr.bf16.mxu1 %v1476_v9 }
  0x41   : > { %1351 = vmatpush3.bf16.msra.mxu0 %v1477_v10 }
  0x42   : > { %1379 = vmatpush3.bf16.msra.mxu1 %v1478_v11  ;;  %1352 = vmatprep.subr.bf16.mxu0 %v1479_v12 }
  0x43   : > { %1380 = vmatprep.subr.bf16.mxu1 %v1480_v13 }
  0x45   : > { %1353 = vmatpush3.bf16.msra.mxu0 %v1481_v14 }
  0x46   : > { %1381 = vmatpush3.bf16.msra.mxu1 %v1482_v15 }
  0x48   : > { %961 = vmatmul.mubr.bf16.vlgmr.msra.gmra.mrb[8].mxu0 %v1198_v20 }
  0x49   : > { %1010 = vmatmul.mubr.bf16.vlgmr.msra.gmra.mrb[8].mxu1 %v1200_v22  ;;  %968 = vmatprep.mubr.bf16.mxu0 %v1207_v27 }
  0x4a   : > { %1017 = vmatprep.mubr.bf16.mxu1 %v1209_v29 }
  0x50   : > { %969 = vmatmul.mubr.bf16.gmra.mrb[12].mxu0 %v1206_v30 }
  0x51   : > { %1018 = vmatmul.mubr.bf16.gmra.mrb[12].mxu1 %v1208_v31 }
  0xfb   : > { %v1298_v32 = vpop.f32.mrb[0].mxu0 }
  0xfc   : > { %v1326_v33 = vpop.f32.mrb[0].mxu1  ;;  %v1299_v34 = vpop.f32.mrb[1].mxu0 }
  0xfd   : > { %v1300_v35 = vadd.f32 %v1299_v34, %v1298_v32  ;;  %v1327_v36 = vpop.f32.mrb[1].mxu1  ;;  %v1301_v37 = vpop.f32.mrb[2].mxu0 }
  0xfe   : > { %v1328_v38 = vadd.f32 %v1327_v36, %v1326_v33  ;;  %v1329_v39 = vpop.f32.mrb[2].mxu1  ;;  %v1302_v40 = vpop.f32.mrb[3].mxu0 }
  0xff   : > { %v1303_v41 = vadd.f32 %v1302_v40, %v1301_v37  ;;  %v1330_v42 = vpop.f32.mrb[3].mxu1 }
 0x100   : > { %v914_v43 = vadd.f32 %v1328_v38, %v1300_v35  ;;  %v1331_v44 = vadd.f32 %v1330_v42, %v1329_v39 }
 0x102   : > { %v917_v45 = vadd.f32 %v1331_v44, %v1303_v41 }
 0x103   : > { %v1304_v46 = vpop.f32.mrb[4].mxu0 }
 0x104   : > { %v1332_v47 = vpop.f32.mrb[4].mxu1  ;;  %v1305_v48 = vpop.f32.mrb[5].mxu0 }
 0x105   : > { %v1306_v49 = vadd.f32 %v1305_v48, %v1304_v46  ;;  %v1333_v50 = vpop.f32.mrb[5].mxu1  ;;  %v1307_v51 = vpop.f32.mrb[6].mxu0 }
 0x106   : > { %v1334_v52 = vadd.f32 %v1333_v50, %v1332_v47  ;;  %v1335_v53 = vpop.f32.mrb[6].mxu1  ;;  %v1308_v54 = vpop.f32.mrb[7].mxu0 }
 0x107   : > { %v1309_v55 = vadd.f32 %v1308_v54, %v1307_v51  ;;  %v1336_v56 = vpop.f32.mrb[7].mxu1 }
 0x108   : > { %v922_v57 = vadd.f32 %v1334_v52, %v1306_v49  ;;  %v1337_v58 = vadd.f32 %v1336_v56, %v1335_v53 }
 0x10a   : > { %v925_v59 = vadd.f32 %v1337_v58, %v1309_v55 }
 0x11b   : > { %v1354_v60 = vpop.f32.mrb[8].mxu0 }
 0x11c   : > { %v1382_v61 = vpop.f32.mrb[8].mxu1  ;;  %v1355_v62 = vpop.f32.mrb[9].mxu0 }
 0x11d   : > { %v1383_v63 = vpop.f32.mrb[9].mxu1  ;;  %v1356_v0 = vadd.f32 %v1355_v62, %v1354_v60  ;;  %v1357_v2 = vpop.f32.mrb[10].mxu0 }
 0x11e   : > { %v1384_v1 = vadd.f32 %v1383_v63, %v1382_v61  ;;  %v1385_v3 = vpop.f32.mrb[10].mxu1  ;;  %v1358_v4 = vpop.f32.mrb[11].mxu0 }
 0x11f   : > { %v1386_v5 = vpop.f32.mrb[11].mxu1  ;;  %v963_v6 = vadd.f32 %v1356_v0, %v914_v43  ;;  %v1359_v7 = vadd.f32 %v1358_v4, %v1357_v2 }
 0x120   : > { %v1387_v8 = vadd.f32 %v1386_v5, %v1385_v3 }
 0x121   : > { %v1796_v9 = vadd.f32 %v1384_v1, %v963_v6  ;;  %v966_v10 = vadd.f32 %v1359_v7, %v917_v45 }
 0x123   : > { %v1798_v11 = vadd.f32 %v1387_v8, %v966_v10  ;;  %v1360_v12 = vpop.f32.mrb[12].mxu0 }
 0x124   : > { %v1388_v13 = vpop.f32.mrb[12].mxu1  ;;  %v1361_v14 = vpop.f32.mrb[13].mxu0 }
 0x125   : > { %v1389_v15 = vpop.f32.mrb[13].mxu1  ;;  %v1362_v16 = vadd.f32 %v1361_v14, %v1360_v12  ;;  %v1363_v18 = vpop.f32.mrb[14].mxu0  ;;  %1031 = sbr.rel (!%p1026_p4) target bundleno = 300 (0x12c), region = 40 }
 0x126   : > { %v1390_v17 = vadd.f32 %v1389_v15, %v1388_v13  ;;  %v1391_v19 = vpop.f32.mrb[14].mxu1  ;;  %v1364_v20 = vpop.f32.mrb[15].mxu0 }
 0x127   : > { %v1392_v21 = vpop.f32.mrb[15].mxu1  ;;  %v971_v22 = vadd.f32 %v1362_v16, %v922_v57  ;;  %v1365_v23 = vadd.f32 %v1364_v20, %v1363_v18 }
 0x128   : > { %v1393_v24 = vadd.f32 %v1392_v21, %v1391_v19 }
 0x129   : > { %v1020_v25 = vadd.f32 %v1390_v17, %v971_v22  ;;  %v974_v26 = vadd.f32 %v1365_v23, %v925_v59 }
 0x12b   : > { %v1023_v27 = vadd.f32 %v1393_v24, %v974_v26 }
 0x12c PF: > { %p1275_p5 = scmp.ne.s32.totalorder %s1499_s15, 0 }
 0x12d   : > { %v1038_v29 = vadd.f32 (!%p1275_p5), %v1798_v11, %v1796_v9  ;;  %v1050_v30 = vmul.f32 (!%p1275_p5), %v1796_v9, %v1796_v9  ;;  %v1051_v31 = vmul.f32 (!%p1275_p5), %v1798_v11, %v1798_v11  ;;  %v1052_v32 = vmul.f32 (!%p1275_p5), %v1020_v25, %v1020_v25  ;;  %v1037_v48 = vld [vmem:[#allocation2] sm:$0x1] (!%p1275_p5)  ;;  %v1049_v51 = vld [vmem:[#allocation3] sm:$0x1] (!%p1275_p5) }
 0x12e   : > { %1036 = sbr.rel (%p1275_p5) target bundleno = 324 (0x144), region = 44  ;;  %v1053_v34 = vmul.f32 (!%p1275_p5), %v1023_v27, %v1023_v27 }
 0x12f   : > { %v1039_v33 = vadd.f32 (!%p1275_p5), %v1038_v29, %v1020_v25  ;;  %v1054_v35 = vadd.f32 (!%p1275_p5), %v1051_v31, %v1050_v30 }
 0x131   : > { %v1040_v36 = vadd.f32 (!%p1275_p5), %v1039_v33, %v1023_v27  ;;  %v1055_v37 = vadd.f32 (!%p1275_p5), %v1054_v35, %v1052_v32 }
 0x133   : > { %v1041_v38 = vrot.slane (!%p1275_p5), %v1040_v36, 4  ;;  %v1056_v39 = vadd.f32 (!%p1275_p5), %v1055_v37, %v1053_v34 }
 0x135   : > { %v1042_v40 = vadd.f32 %v1041_v38, %v1040_v36  ;;  %v1057_v41 = vrot.slane %v1056_v39, 4 }
 0x137   : > { %v1043_v42 = vrot.slane %v1042_v40, 2  ;;  %v1058_v43 = vadd.f32 %v1057_v41, %v1056_v39 }
 0x139   : > { %v1044_v44 = vadd.f32 %v1043_v42, %v1042_v40  ;;  %v1059_v45 = vrot.slane %v1058_v43, 2 }
 0x13b   : > { %v1045_v46 = vrot.slane %v1044_v44, 1  ;;  %v1060_v47 = vadd.f32 %v1059_v45, %v1058_v43 }
 0x13d   : > { %v1046_v49 = vadd.f32 %v1045_v46, %v1044_v44  ;;  %v1061_v50 = vrot.slane %v1060_v47, 1 }
 0x13f   : > { %v1047_v52 = vadd.f32 %v1046_v49, %v1037_v48  ;;  %v1062_v53 = vadd.f32 %v1061_v50, %v1060_v47 }
 0x141   : > { %1048 = vst [vmem:[#allocation2] sm:$0x1] %v1047_v52  ;;  %v1063_v54 = vadd.f32 %v1062_v53, %v1049_v51 }
 0x143   : > { %1064 = vst [vmem:[#allocation3] sm:$0x1] %v1063_v54 }
 0x144 PF: > { %p1276_p6 = scmp.ne.s32.totalorder %s1499_s15, 1 }
 0x145   : > { %v1083_v62 = vlaneseq (!%p1276_p6)  ;;  %v1077_v0 = vld [vmem:[%s1841_s2] sm:$0x1] (!%p1276_p6) }
 0x146   : > { %1068 = sbr.rel (%p1276_p6) target bundleno = 363 (0x16b), region = 48  ;;  %v1079_v4 = vld [vmem:[%s1842_s3] sm:$0x1] (!%p1276_p6) }
 0x147   : > { %v1084_v63 = vshrl.u32 (!%p1276_p6), %v1083_v62, 7 }
 0x148   : > { %v1069_v55 = vld [vmem:[#allocation2] sm:$0x1] (!%p1276_p6) }
 0x149   : > { %v1070_v57 = vmul.f32 (!%p1276_p6), 0.03125, %v1069_v55  ;;  %v1085_v1 = vsub.s32 (!%p1276_p6), 0, %v1084_v63 }
 0x14a   : > { %v1071_v56 = vld [vmem:[#allocation3] sm:$0x1] (!%p1276_p6) }
 0x14b   : > { %v1072_v58 = vmul.f32 (!%p1276_p6), 0.03125, %v1071_v56  ;;  %v1073_v59 = vmul.f32 (!%p1276_p6), %v1070_v57, %v1070_v57 }
 0x14d   : > { %v1074_v60 = vsub.f32 %v1072_v58, %v1073_v59 }
 0x14f   : > { %v1075_v61 = vadd.f32 1e-05, %v1074_v60 }
 0x151   : > { %1483 = vrsqrt.f32 %v1075_v61 }
 0x15b   : > { %v1484_v2 = vpop.eup %1483 }
 0x15c   : > { %v1078_v3 = vmul.f32 %v1484_v2, %v1077_v0 }
 0x15e   : > { %v1080_v5 = vmul.f32 %v1078_v3, %v1070_v57  ;;  %v1086_v6 = vrot.slane %v1078_v3, %v1085_v1 }
 0x160   : > { %v1081_v7 = vsub.f32 %v1079_v4, %v1080_v5  ;;  %v1088_v8 = vmul.f32 %v1086_v6, %v1796_v9  ;;  %v1089_v10 = vmul.f32 %v1086_v6, %v1798_v11  ;;  %v1090_v12 = vmul.f32 %v1086_v6, %v1020_v25 }
 0x161   : > { %v1091_v13 = vmul.f32 %v1086_v6, %v1023_v27 }
 0x162   : > { %v1096_v14 = vrot.slane %v1081_v7, %v1085_v1 }
 0x164   : > { %v1098_v15 = vadd.f32 %v1096_v14, %v1088_v8  ;;  %v1099_v16 = vadd.f32 %v1096_v14, %v1089_v10  ;;  %v1100_v17 = vadd.f32 %v1096_v14, %v1090_v12  ;;  %v1101_v18 = vadd.f32 %v1096_v14, %v1091_v13 }
 0x166   : > { %vm1102_vm0 = vcmp.gt.f32.partialorder %v1098_v15, 0.0  ;;  %v1106_v19 = vmul.f32 0.2, %v1098_v15  ;;  %vm1103_vm1 = vcmp.gt.f32.partialorder %v1099_v16, 0.0  ;;  %v1107_v20 = vmul.f32 0.2, %v1099_v16 }
 0x167   : > { %vm1104_vm2 = vcmp.gt.f32.partialorder %v1100_v17, 0.0  ;;  %v1108_v21 = vmul.f32 0.2, %v1100_v17  ;;  %vm1105_vm3 = vcmp.gt.f32.partialorder %v1101_v18, 0.0  ;;  %v1109_v22 = vmul.f32 0.2, %v1101_v18 }
 0x168   : > { %v1110_v23 = vsel %vm1102_vm0, %v1098_v15, %v1106_v19  ;;  %v1111_v24 = vsel %vm1103_vm1, %v1099_v16, %v1107_v20 }
 0x169   : > { %1114 = vst [vmem:[%s1843_s4] sm:$0xff] %v1110_v23  ;;  %1115 = vst [vmem:[%s1843_s4 + $0x8] sm:$0xff] %v1111_v24  ;;  %v1112_v9 = vsel %vm1104_vm2, %v1100_v17, %v1108_v21  ;;  %v1113_v11 = vsel %vm1105_vm3, %v1101_v18, %v1109_v22 }
 0x16a   : > { %1116 = vst [vmem:[%s1843_s4 + $0x10] sm:$0xff] %v1112_v9  ;;  %1117 = vst [vmem:[%s1843_s4 + $0x18] sm:$0xff] %v1113_v11 }
 0x16b PF: > { %s14_s17 = sadd.s32 1, %s1507_s17   ;;  %s1844_s15 = smov %s1503_s16 }
 0x16c   : > { %p11_p7 = scmp.ge.s32.totalorder %s14_s17, 4   ;;  %s1845_s16 = smov %s1847_s18 }
 0x16e   :  { %13 = sbr.rel (!%p11_p7) target bundleno = 2 (0x2), region = 78 }

// kernel: discriminator32_forward.7
= control target key start
LH: loop header
LB: loop body
LE: loop exit
PB: predicated region body
PF: predicated region fallthrough
CT: control target
= control target key end

     0   :  { %v1926_v22 = vmov 1966171168   ;;  %v276_v24 = vlaneseq  ;;  %vm1480_vm0 = vcmask 1024   ;;  %s2369_s1 = inlined_call_operand.vmem [shape: bf16[2048,1], index: 1, kind: input, shape index: {}]   ;;  %s2370_s0 = inlined_call_operand.vmem [shape: bf16[2,2048], index: 0, kind: input, shape index: {}]   ;;  %s2371_s2 = inlined_call_operand.vmem [shape: f32[2,1], index: 2, kind: output, shape index: {}]  }
   0x1   :  { %v1792_v0 = vld [vmem:[%s2369_s1 + $0x40] sm:$0xff]   ;;  %v1796_v4 = vld [vmem:[%s2369_s1 + $0x48] sm:$0xff]   ;;  %v1800_v8 = vld [vmem:[%s2369_s1 + $0x50] sm:$0xff]   ;;  %v274_v23 = vunpack.c.l.s4 %v1926_v22 }
   0x2   :  { %v1793_v1 = vld [vmem:[%s2369_s1 + $0xc0] sm:$0xff]   ;;  %1615 = vmatprep.subr.bf16.mxu0 %v1792_v0  ;;  %v1797_v5 = vld [vmem:[%s2369_s1 + $0xc8] sm:$0xff]   ;;  %v1801_v9 = vld [vmem:[%s2369_s1 + $0xd0] sm:$0xff]   ;;  %v277_v30 = vshrl.u32 %v276_v24, 7 }
   0x3   :  { %v1794_v2 = vld [vmem:[%s2369_s1] sm:$0xff]   ;;  %1637 = vmatprep.subr.bf16.mxu1 %v1793_v1  ;;  %v1798_v6 = vld [vmem:[%s2369_s1 + $0x8] sm:$0xff]   ;;  %v1802_v10 = vld [vmem:[%s2369_s1 + $0x10] sm:$0xff]   ;;  %v275_v29 = vunpack.c.0.s8 %v274_v23 }
   0x4   :  { %v1795_v3 = vld [vmem:[%s2369_s1 + $0x80] sm:$0xff]   ;;  %1616 = vmatpush3.bf16.msra.mxu0 %v1794_v2  ;;  %v1799_v7 = vld [vmem:[%s2369_s1 + $0x88] sm:$0xff]   ;;  %v1803_v11 = vld [vmem:[%s2369_s1 + $0x90] sm:$0xff]  }
   0x5   :  { %1638 = vmatpush3.bf16.msra.mxu1 %v1795_v3  ;;  %1617 = vmatprep.subr.bf16.mxu0 %v1796_v4  ;;  %v1804_v12 = vld [vmem:[%s2369_s1 + $0x58] sm:$0xff]   ;;  %v1808_v16 = vld [vmem:[%s2369_s1 + $0x60] sm:$0xff]   ;;  %v1812_v20 = vld [vmem:[%s2369_s1 + $0x68] sm:$0xff]   ;;  %v2032_v35 = vsub.s32 %v275_v29, %v277_v30 }
   0x6   :  { %1639 = vmatprep.subr.bf16.mxu1 %v1797_v5  ;;  %v1805_v13 = vld [vmem:[%s2369_s1 + $0xd8] sm:$0xff]   ;;  %v1809_v17 = vld [vmem:[%s2369_s1 + $0xe0] sm:$0xff]   ;;  %v1813_v21 = vld [vmem:[%s2369_s1 + $0xe8] sm:$0xff]  }
   0x7   :  { %v1806_v14 = vld [vmem:[%s2369_s1 + $0x18] sm:$0xff]   ;;  %v1810_v18 = vld [vmem:[%s2369_s1 + $0x20] sm:$0xff]   ;;  %v1814_v25 = vld [vmem:[%s2369_s1 + $0x28] sm:$0xff]  }
   0x8   :  { %1618 = vmatpush3.bf16.msra.mxu0 %v1798_v6  ;;  %v1807_v15 = vld [vmem:[%s2369_s1 + $0x98] sm:$0xff]   ;;  %v1811_v19 = vld [vmem:[%s2369_s1 + $0xa0] sm:$0xff]   ;;  %v1815_v26 = vld [vmem:[%s2369_s1 + $0xa8] sm:$0xff]  }
   0x9   :  { %1640 = vmatpush3.bf16.msra.mxu1 %v1799_v7  ;;  %1619 = vmatprep.subr.bf16.mxu0 %v1800_v8  ;;  %v1816_v27 = vld [vmem:[%s2369_s1 + $0x70] sm:$0xff]   ;;  %v1820_v33 = vld [vmem:[%s2369_s1 + $0x78] sm:$0xff]   ;;  %v12_v38 = vld [vmem:[%s2370_s0] sm:$0xff] }
   0xa   :  { %1641 = vmatprep.subr.bf16.mxu1 %v1801_v9  ;;  %v1817_v28 = vld [vmem:[%s2369_s1 + $0xf0] sm:$0xff]   ;;  %v1821_v34 = vld [vmem:[%s2369_s1 + $0xf8] sm:$0xff]   ;;  %v272_v39 = vcombine.high %v12_v38, %v12_v38  ;;  %v279_v40 = vrot.slane %v12_v38, %v2032_v35  ;;  %v1826_v41 = vld [vmem:[%s2369_s1 + $0x140] sm:$0xff]  }
   0xb   :  { %v1818_v31 = vld [vmem:[%s2369_s1 + $0x30] sm:$0xff]   ;;  %v1822_v36 = vld [vmem:[%s2369_s1 + $0x38] sm:$0xff]   ;;  %v1827_v42 = vld [vmem:[%s2369_s1 + $0x1c0] sm:$0xff]  }
   0xc   :  { %1620 = vmatpush3.bf16.msra.mxu0 %v1802_v10  ;;  %v1819_v32 = vld [vmem:[%s2369_s1 + $0xb0] sm:$0xff]   ;;  %v1823_v37 = vld [vmem:[%s2369_s1 + $0xb8] sm:$0xff]   ;;  %v287_v43 = vcombine.high %v279_v40, %v279_v40  ;;  %v295_v44 = vrot.slane %v279_v40, %v2032_v35  ;;  %v2052_v45 = vrot.slane %v272_v39, %v2032_v35  ;;  %v1828_v47 = vld [vmem:[%s2369_s1 + $0x100] sm:$0xff]  }
   0xd   :  { %1642 = vmatpush3.bf16.msra.mxu1 %v1803_v11  ;;  %1621 = vmatprep.subr.bf16.mxu0 %v1804_v12  ;;  %v1830_v50 = vld [vmem:[%s2369_s1 + $0x148] sm:$0xff]   ;;  %v1829_v52 = vld [vmem:[%s2369_s1 + $0x180] sm:$0xff]   ;;  %v1834_v57 = vld [vmem:[%s2369_s1 + $0x150] sm:$0xff]  }
   0xe   :  { %1643 = vmatprep.subr.bf16.mxu1 %v1805_v13  ;;  %v309_v46 = vrot.slane %v287_v43, %v2032_v35  ;;  %v288_v48 = vcombine.high %v2052_v45, %v2052_v45  ;;  %v317_v49 = vcombine.high %v295_v44, %v295_v44  ;;  %v1831_v54 = vld [vmem:[%s2369_s1 + $0x1c8] sm:$0xff]   ;;  %v1835_v59 = vld [vmem:[%s2369_s1 + $0x1d0] sm:$0xff]   ;;  %v1838_v61 = vld [vmem:[%s2369_s1 + $0x158] sm:$0xff]  }
   0xf   :  { %v1832_v55 = vld [vmem:[%s2369_s1 + $0x108] sm:$0xff]   ;;  %v1836_v60 = vld [vmem:[%s2369_s1 + $0x110] sm:$0xff]   ;;  %v1839_v63 = vld [vmem:[%s2369_s1 + $0x1d8] sm:$0xff]  }
  0x10   :  { %1622 = vmatpush3.bf16.msra.mxu0 %v1806_v14  ;;  %1186 = vmatprep.mubr.bf16.mxu0 %v309_v46  ;;  %v319_v51 = vcombine.high %v309_v46, %v309_v46  ;;  %v316_v53 = vrot.slane %v288_v48, %v2032_v35  ;;  %v1833_v58 = vld [vmem:[%s2369_s1 + $0x188] sm:$0xff]   ;;  %v1837_v62 = vld [vmem:[%s2369_s1 + $0x190] sm:$0xff]   ;;  %v1840_v0 = vld [vmem:[%s2369_s1 + $0x118] sm:$0xff]  }
  0x11   :  { %1644 = vmatpush3.bf16.msra.mxu1 %v1807_v15  ;;  %1623 = vmatprep.subr.bf16.mxu0 %v1808_v16  ;;  %v1842_v1 = vld [vmem:[%s2369_s1 + $0x160] sm:$0xff]   ;;  %v1841_v2 = vld [vmem:[%s2369_s1 + $0x198] sm:$0xff]   ;;  %v2112_v5 = vld [vmem:[%s2370_s0 + $0x8] sm:$0xff] }
  0x12   :  { %1645 = vmatprep.subr.bf16.mxu1 %v1809_v17  ;;  %1226 = vmatprep.mubr.bf16.mxu1 %v319_v51  ;;  %v320_v56 = vcombine.high %v316_v53, %v316_v53  ;;  %v1843_v3 = vld [vmem:[%s2369_s1 + $0x1e0] sm:$0xff]   ;;  %v1846_v6 = vld [vmem:[%s2369_s1 + $0x168] sm:$0xff]   ;;  %v1850_v10 = vld [vmem:[%s2369_s1 + $0x170] sm:$0xff]   ;;  %v2134_v12 = vrot.slane %v2112_v5, %v2032_v35  ;;  %v321_v46 = vcombine.high %v2112_v5, %v2112_v5 }
  0x13   :  { %v1844_v4 = vld [vmem:[%s2369_s1 + $0x120] sm:$0xff]   ;;  %v1847_v8 = vld [vmem:[%s2369_s1 + $0x1e8] sm:$0xff]   ;;  %v1851_v13 = vld [vmem:[%s2369_s1 + $0x1f0] sm:$0xff]  }
  0x14   :  { %1624 = vmatpush3.bf16.msra.mxu0 %v1810_v18  ;;  %v1845_v7 = vld [vmem:[%s2369_s1 + $0x1a0] sm:$0xff]   ;;  %v1848_v9 = vld [vmem:[%s2369_s1 + $0x128] sm:$0xff]   ;;  %v1852_v14 = vld [vmem:[%s2369_s1 + $0x130] sm:$0xff]   ;;  %v336_v17 = vcombine.high %v2134_v12, %v2134_v12 }
  0x15   :  { %1646 = vmatpush3.bf16.msra.mxu1 %v1811_v19  ;;  %1625 = vmatprep.subr.bf16.mxu0 %v1812_v20  ;;  %v1849_v11 = vld [vmem:[%s2369_s1 + $0x1a8] sm:$0xff]   ;;  %v1854_v15 = vld [vmem:[%s2369_s1 + $0x178] sm:$0xff]   ;;  %v1853_v16 = vld [vmem:[%s2369_s1 + $0x1b0] sm:$0xff]   ;;  %v302_v20 = vrot.slane %v2052_v45, %v2032_v35 }
  0x16   :  { %1647 = vmatprep.subr.bf16.mxu1 %v1813_v21  ;;  %v1855_v18 = vld [vmem:[%s2369_s1 + $0x1f8] sm:$0xff]   ;;  %v1858_v21 = vld [vmem:[%s2369_s1 + $0x240] sm:$0xff]   ;;  %v358_v23 = vrot.slane %v336_v17, %v2032_v35  ;;  %v1863_v30 = vld [vmem:[%s2369_s1 + $0x2c8] sm:$0xff]  }
  0x17   :  { %v1856_v19 = vld [vmem:[%s2369_s1 + $0x138] sm:$0xff]   ;;  %v1859_v24 = vld [vmem:[%s2369_s1 + $0x2c0] sm:$0xff]   ;;  %v1869_v38 = vld [vmem:[%s2369_s1 + $0x290] sm:$0xff]  }
  0x18   :  { %1626 = vmatpush3.bf16.msra.mxu0 %v1814_v25  ;;  %v1857_v22 = vld [vmem:[%s2369_s1 + $0x1b8] sm:$0xff]   ;;  %v1860_v25 = vld [vmem:[%s2369_s1 + $0x200] sm:$0xff]   ;;  %v368_v29 = vcombine.high %v358_v23, %v358_v23  ;;  %v1878_v45 = vld [vmem:[%s2369_s1 + $0x268] sm:$0xff]  }
  0x19   :  { %1648 = vmatpush3.bf16.msra.mxu1 %v1815_v26  ;;  %1627 = vmatprep.subr.bf16.mxu0 %v1816_v27  ;;  %v318_v26 = vcombine.high %v302_v20, %v302_v20  ;;  %v1862_v27 = vld [vmem:[%s2369_s1 + $0x248] sm:$0xff]   ;;  %v1871_v39 = vld [vmem:[%s2369_s1 + $0x2d8] sm:$0xff]   ;;  %v1875_v43 = vld [vmem:[%s2369_s1 + $0x2e0] sm:$0xff]  }
  0x1a   :  { %1649 = vmatprep.subr.bf16.mxu1 %v1817_v28  ;;  %v1861_v28 = vld [vmem:[%s2369_s1 + $0x280] sm:$0xff]   ;;  %v1872_v40 = vld [vmem:[%s2369_s1 + $0x218] sm:$0xff]   ;;  %v1879_v48 = vld [vmem:[%s2369_s1 + $0x2e8] sm:$0xff]  }
  0x1b   :  { %v1881_v51 = vld [vmem:[%s2369_s1 + $0x2a8] sm:$0xff]   ;;  %v1905_v17 = vld [vmem:[%s2369_s1 + $0x398] sm:$0xff]  }
  0x1c   :  { %1628 = vmatpush3.bf16.msra.mxu0 %v1818_v31  ;;  %v1864_v31 = vld [vmem:[%s2369_s1 + $0x208] sm:$0xff]  }
  0x1d   :  { %1650 = vmatpush3.bf16.msra.mxu1 %v1819_v32  ;;  %1629 = vmatprep.subr.bf16.mxu0 %v1820_v33  ;;  %v1866_v32 = vld [vmem:[%s2369_s1 + $0x250] sm:$0xff]   ;;  %v1865_v33 = vld [vmem:[%s2369_s1 + $0x288] sm:$0xff]  }
  0x1e   :  { %1651 = vmatprep.subr.bf16.mxu1 %v1821_v34  ;;  %v1867_v34 = vld [vmem:[%s2369_s1 + $0x2d0] sm:$0xff]  }
  0x20   :  { %1630 = vmatpush3.bf16.msra.mxu0 %v1822_v36  ;;  %v1868_v36 = vld [vmem:[%s2369_s1 + $0x210] sm:$0xff]  }
  0x21   :  { %1652 = vmatpush3.bf16.msra.mxu1 %v1823_v37  ;;  %1659 = vmatprep.subr.bf16.mxu0 %v1826_v41  ;;  %v1870_v37 = vld [vmem:[%s2369_s1 + $0x258] sm:$0xff]   ;;  %v1874_v41 = vld [vmem:[%s2369_s1 + $0x260] sm:$0xff]  }
  0x22   :  { %1681 = vmatprep.subr.bf16.mxu1 %v1827_v42  ;;  %v1873_v42 = vld [vmem:[%s2369_s1 + $0x298] sm:$0xff]  }
  0x23   :  { %1187 = vmatmul.mubr.bf16.vlgmr.msra.gmra.mrb[0].mxu0 %v295_v44  ;;  %v1876_v44 = vld [vmem:[%s2369_s1 + $0x220] sm:$0xff]  }
  0x24   :  { %1660 = vmatpush3.bf16.msra.mxu0 %v1828_v47  ;;  %1227 = vmatmul.mubr.bf16.vlgmr.msra.gmra.mrb[0].mxu1 %v317_v49  ;;  %v1877_v47 = vld [vmem:[%s2369_s1 + $0x2a0] sm:$0xff]   ;;  %v1880_v49 = vld [vmem:[%s2369_s1 + $0x228] sm:$0xff]  }
  0x25   :  { %1661 = vmatprep.subr.bf16.mxu0 %v1830_v50  ;;  %1682 = vmatpush3.bf16.msra.mxu1 %v1829_v52  ;;  %v1882_v50 = vld [vmem:[%s2369_s1 + $0x270] sm:$0xff]   ;;  %v2240_v52 = vrot.slane %v321_v46, %v2032_v35 }
  0x26   :  { %1266 = vmatprep.mubr.bf16.mxu0 %v316_v53  ;;  %1683 = vmatprep.subr.bf16.mxu1 %v1831_v54  ;;  %v1883_v53 = vld [vmem:[%s2369_s1 + $0x2f0] sm:$0xff]  }
  0x27   :  { %1306 = vmatprep.mubr.bf16.mxu1 %v320_v56  ;;  %v1884_v54 = vld [vmem:[%s2369_s1 + $0x230] sm:$0xff]  }
  0x28   :  { %1662 = vmatpush3.bf16.msra.mxu0 %v1832_v55  ;;  %v1886_v55 = vld [vmem:[%s2369_s1 + $0x278] sm:$0xff]   ;;  %v1885_v56 = vld [vmem:[%s2369_s1 + $0x2b0] sm:$0xff]  }
  0x29   :  { %1663 = vmatprep.subr.bf16.mxu0 %v1834_v57  ;;  %1684 = vmatpush3.bf16.msra.mxu1 %v1833_v58  ;;  %v337_v57 = vcombine.high %v2240_v52, %v2240_v52  ;;  %v1887_v58 = vld [vmem:[%s2369_s1 + $0x2f8] sm:$0xff]  }
  0x2a   :  { %1685 = vmatprep.subr.bf16.mxu1 %v1835_v59  ;;  %v1888_v59 = vld [vmem:[%s2369_s1 + $0x238] sm:$0xff]  }
  0x2c   :  { %1664 = vmatpush3.bf16.msra.mxu0 %v1836_v60  ;;  %v344_v60 = vrot.slane %v2134_v12, %v2032_v35  ;;  %v1902_v12 = vld [vmem:[%s2369_s1 + $0x358] sm:$0xff]  }
  0x2d   :  { %1665 = vmatprep.subr.bf16.mxu0 %v1838_v61  ;;  %1686 = vmatpush3.bf16.msra.mxu1 %v1837_v62  ;;  %v1890_v61 = vld [vmem:[%s2369_s1 + $0x340] sm:$0xff]   ;;  %v1889_v62 = vld [vmem:[%s2369_s1 + $0x2b8] sm:$0xff]  }
  0x2e   :  { %1687 = vmatprep.subr.bf16.mxu1 %v1839_v63  ;;  %v365_v63 = vrot.slane %v337_v57, %v2032_v35 }
  0x30   :  { %1666 = vmatpush3.bf16.msra.mxu0 %v1840_v0  ;;  %v1891_v0 = vld [vmem:[%s2369_s1 + $0x3c0] sm:$0xff]   ;;  %v369_v5 = vcombine.high %v365_v63, %v365_v63 }
  0x31   :  { %1667 = vmatprep.subr.bf16.mxu0 %v1842_v1  ;;  %1688 = vmatpush3.bf16.msra.mxu1 %v1841_v2  ;;  %v1892_v1 = vld [vmem:[%s2369_s1 + $0x300] sm:$0xff]   ;;  %v366_v2 = vcombine.high %v344_v60, %v344_v60 }
  0x32   :  { %1689 = vmatprep.subr.bf16.mxu1 %v1843_v3  ;;  %v1894_v3 = vld [vmem:[%s2369_s1 + $0x348] sm:$0xff]  }
  0x34   :  { %1668 = vmatpush3.bf16.msra.mxu0 %v1844_v4  ;;  %v1893_v4 = vld [vmem:[%s2369_s1 + $0x380] sm:$0xff]  }
  0x35   :  { %1669 = vmatprep.subr.bf16.mxu0 %v1846_v6  ;;  %1690 = vmatpush3.bf16.msra.mxu1 %v1845_v7  ;;  %v1895_v6 = vld [vmem:[%s2369_s1 + $0x3c8] sm:$0xff]  }
  0x36   :  { %1691 = vmatprep.subr.bf16.mxu1 %v1847_v8  ;;  %v1896_v7 = vld [vmem:[%s2369_s1 + $0x308] sm:$0xff]   ;;  %v1898_v8 = vld [vmem:[%s2369_s1 + $0x350] sm:$0xff]  }
  0x38   :  { %1670 = vmatpush3.bf16.msra.mxu0 %v1848_v9  ;;  %v1897_v9 = vld [vmem:[%s2369_s1 + $0x388] sm:$0xff]  }
  0x39   :  { %1671 = vmatprep.subr.bf16.mxu0 %v1850_v10  ;;  %1692 = vmatpush3.bf16.msra.mxu1 %v1849_v11  ;;  %v1899_v10 = vld [vmem:[%s2369_s1 + $0x3d0] sm:$0xff]  }
  0x3a   :  { %1693 = vmatprep.subr.bf16.mxu1 %v1851_v13  ;;  %v1900_v11 = vld [vmem:[%s2369_s1 + $0x310] sm:$0xff]  }
  0x3b   :  { %v1901_v13 = vld [vmem:[%s2369_s1 + $0x390] sm:$0xff]  }
  0x3c   :  { %1672 = vmatpush3.bf16.msra.mxu0 %v1852_v14  ;;  %v1903_v14 = vld [vmem:[%s2369_s1 + $0x3d8] sm:$0xff]  }
  0x3d   :  { %1673 = vmatprep.subr.bf16.mxu0 %v1854_v15  ;;  %1694 = vmatpush3.bf16.msra.mxu1 %v1853_v16  ;;  %v1904_v15 = vld [vmem:[%s2369_s1 + $0x318] sm:$0xff]   ;;  %v1906_v16 = vld [vmem:[%s2369_s1 + $0x360] sm:$0xff]  }
  0x3e   :  { %1695 = vmatprep.subr.bf16.mxu1 %v1855_v18  ;;  %v1907_v18 = vld [vmem:[%s2369_s1 + $0x3e0] sm:$0xff]  }
  0x40   :  { %1674 = vmatpush3.bf16.msra.mxu0 %v1856_v19  ;;  %v1908_v19 = vld [vmem:[%s2369_s1 + $0x320] sm:$0xff]  }
  0x41   :  { %1703 = vmatprep.subr.bf16.mxu0 %v1858_v21  ;;  %1696 = vmatpush3.bf16.msra.mxu1 %v1857_v22  ;;  %v1909_v21 = vld [vmem:[%s2369_s1 + $0x3a0] sm:$0xff]   ;;  %v1911_v22 = vld [vmem:[%s2369_s1 + $0x3e8] sm:$0xff]  }
  0x42   :  { %1725 = vmatprep.subr.bf16.mxu1 %v1859_v24  ;;  %v1914_v24 = vld [vmem:[%s2369_s1 + $0x370] sm:$0xff]  }
  0x43   :  { %1267 = vmatmul.mubr.bf16.vlgmr.msra.gmra.mrb[4].mxu0 %v302_v20  ;;  %v1910_v20 = vld [vmem:[%s2369_s1 + $0x368] sm:$0xff]  }
  0x44   :  { %1704 = vmatpush3.bf16.msra.mxu0 %v1860_v25  ;;  %1346 = vmatprep.mubr.bf16.mxu0 %v358_v23  ;;  %v1912_v23 = vld [vmem:[%s2369_s1 + $0x328] sm:$0xff]  }
  0x45   :  { %1307 = vmatmul.mubr.bf16.vlgmr.msra.gmra.mrb[4].mxu1 %v318_v26  ;;  %1705 = vmatprep.subr.bf16.mxu0 %v1862_v27  ;;  %v1913_v25 = vld [vmem:[%s2369_s1 + $0x3a8] sm:$0xff]   ;;  %v1915_v26 = vld [vmem:[%s2369_s1 + $0x3f0] sm:$0xff]  }
  0x46   :  { %1726 = vmatpush3.bf16.msra.mxu1 %v1861_v28  ;;  %1386 = vmatprep.mubr.bf16.mxu1 %v368_v29  ;;  %v1916_v27 = vld [vmem:[%s2369_s1 + $0x330] sm:$0xff]   ;;  %v1918_v28 = vld [vmem:[%s2369_s1 + $0x378] sm:$0xff]  }
  0x47   :  { %1727 = vmatprep.subr.bf16.mxu1 %v1863_v30  ;;  %v1917_v29 = vld [vmem:[%s2369_s1 + $0x3b0] sm:$0xff]   ;;  %v1919_v30 = vld [vmem:[%s2369_s1 + $0x3f8] sm:$0xff]  }
  0x48   :  { %1706 = vmatpush3.bf16.msra.mxu0 %v1864_v31  ;;  %v1920_v31 = vld [vmem:[%s2369_s1 + $0x338] sm:$0xff]  }
  0x49   :  { %1707 = vmatprep.subr.bf16.mxu0 %v1866_v32  ;;  %v351_v32 = vrot.slane %v2240_v52, %v2032_v35 }
  0x4a   :  { %1728 = vmatpush3.bf16.msra.mxu1 %v1865_v33  ;;  %v1921_v33 = vld [vmem:[%s2369_s1 + $0x3b8] sm:$0xff]  }
  0x4b   :  { %1729 = vmatprep.subr.bf16.mxu1 %v1867_v34  ;;  %v367_v34 = vcombine.high %v351_v32, %v351_v32 }
  0x4c   :  { %1708 = vmatpush3.bf16.msra.mxu0 %v1868_v36 }
  0x4d   :  { %1709 = vmatprep.subr.bf16.mxu0 %v1870_v37 }
  0x4e   :  { %1730 = vmatpush3.bf16.msra.mxu1 %v1869_v38 }
  0x4f   :  { %1731 = vmatprep.subr.bf16.mxu1 %v1871_v39 }
  0x50   :  { %1710 = vmatpush3.bf16.msra.mxu0 %v1872_v40 }
  0x51   :  { %1711 = vmatprep.subr.bf16.mxu0 %v1874_v41 }
  0x52   :  { %1732 = vmatpush3.bf16.msra.mxu1 %v1873_v42 }
  0x53   :  { %1733 = vmatprep.subr.bf16.mxu1 %v1875_v43 }
  0x54   :  { %1712 = vmatpush3.bf16.msra.mxu0 %v1876_v44 }
  0x55   :  { %1713 = vmatprep.subr.bf16.mxu0 %v1878_v45 }
  0x56   :  { %1734 = vmatpush3.bf16.msra.mxu1 %v1877_v47 }
  0x57   :  { %1735 = vmatprep.subr.bf16.mxu1 %v1879_v48 }
  0x58   :  { %1714 = vmatpush3.bf16.msra.mxu0 %v1880_v49 }
  0x59   :  { %1715 = vmatprep.subr.bf16.mxu0 %v1882_v50 }
  0x5a   :  { %1736 = vmatpush3.bf16.msra.mxu1 %v1881_v51 }
  0x5b   :  { %1737 = vmatprep.subr.bf16.mxu1 %v1883_v53 }
  0x5c   :  { %1716 = vmatpush3.bf16.msra.mxu0 %v1884_v54 }
  0x5d   :  { %1717 = vmatprep.subr.bf16.mxu0 %v1886_v55 }
  0x5e   :  { %1738 = vmatpush3.bf16.msra.mxu1 %v1885_v56 }
  0x5f   :  { %1739 = vmatprep.subr.bf16.mxu1 %v1887_v58 }
  0x60   :  { %1718 = vmatpush3.bf16.msra.mxu0 %v1888_v59 }
  0x61   :  { %1747 = vmatprep.subr.bf16.mxu0 %v1890_v61 }
  0x62   :  { %1740 = vmatpush3.bf16.msra.mxu1 %v1889_v62 }
  0x63   :  { %1347 = vmatmul.mubr.bf16.vlgmr.msra.gmra.mrb[8].mxu0 %v344_v60  ;;  %1769 = vmatprep.subr.bf16.mxu1 %v1891_v0 }
  0x64   :  { %1748 = vmatpush3.bf16.msra.mxu0 %v1892_v1  ;;  %1426 = vmatprep.mubr.bf16.mxu0 %v365_v63 }
  0x65   :  { %1387 = vmatmul.mubr.bf16.vlgmr.msra.gmra.mrb[8].mxu1 %v366_v2  ;;  %1749 = vmatprep.subr.bf16.mxu0 %v1894_v3 }
  0x66   :  { %1770 = vmatpush3.bf16.msra.mxu1 %v1893_v4  ;;  %1466 = vmatprep.mubr.bf16.mxu1 %v369_v5 }
  0x67   :  { %1771 = vmatprep.subr.bf16.mxu1 %v1895_v6 }
  0x68   :  { %1750 = vmatpush3.bf16.msra.mxu0 %v1896_v7 }
  0x69   :  { %1751 = vmatprep.subr.bf16.mxu0 %v1898_v8 }
  0x6a   :  { %1772 = vmatpush3.bf16.msra.mxu1 %v1897_v9 }
  0x6b   :  { %1773 = vmatprep.subr.bf16.mxu1 %v1899_v10 }
  0x6c   :  { %1752 = vmatpush3.bf16.msra.mxu0 %v1900_v11 }
  0x6d   :  { %1753 = vmatprep.subr.bf16.mxu0 %v1902_v12 }
  0x6e   :  { %1774 = vmatpush3.bf16.msra.mxu1 %v1901_v13 }
  0x6f   :  { %1775 = vmatprep.subr.bf16.mxu1 %v1903_v14 }
  0x70   :  { %1754 = vmatpush3.bf16.msra.mxu0 %v1904_v15 }
  0x71   :  { %1755 = vmatprep.subr.bf16.mxu0 %v1906_v16 }
  0x72   :  { %1776 = vmatpush3.bf16.msra.mxu1 %v1905_v17 }
  0x73   :  { %1777 = vmatprep.subr.bf16.mxu1 %v1907_v18 }
  0x74   :  { %1756 = vmatpush3.bf16.msra.mxu0 %v1908_v19 }
  0x75   :  { %1757 = vmatprep.subr.bf16.mxu0 %v1910_v20 }
  0x76   :  { %1778 = vmatpush3.bf16.msra.mxu1 %v1909_v21 }
  0x77   :  { %1779 = vmatprep.subr.bf16.mxu1 %v1911_v22 }
  0x78   :  { %1758 = vmatpush3.bf16.msra.mxu0 %v1912_v23 }
  0x79   :  { %1759 = vmatprep.subr.bf16.mxu0 %v1914_v24 }
  0x7a   :  { %1780 = vmatpush3.bf16.msra.mxu1 %v1913_v25 }
  0x7b   :  { %1781 = vmatprep.subr.bf16.mxu1 %v1915_v26 }
  0x7c   :  { %1760 = vmatpush3.bf16.msra.mxu0 %v1916_v27 }
  0x7d   :  { %1761 = vmatprep.subr.bf16.mxu0 %v1918_v28 }
  0x7e   :  { %1782 = vmatpush3.bf16.msra.mxu1 %v1917_v29 }
  0x7f   :  { %1783 = vmatprep.subr.bf16.mxu1 %v1919_v30 }
  0x80   :  { %1762 = vmatpush3.bf16.msra.mxu0 %v1920_v31 }
  0x82   :  { %1784 = vmatpush3.bf16.msra.mxu1 %v1921_v33 }
  0x83   :  { %1427 = vmatmul.mubr.bf16.vlgmr.msra.gmra.mrb[12].mxu0 %v351_v32 }
  0x85   :  { %1467 = vmatmul.mubr.bf16.vlgmr.msra.gmra.mrb[12].mxu1 %v367_v34 }
  0xf6   :  { %v1631_v36 = vpop.f32.mrb[0].mxu0 }
  0xf7   :  { %v1632_v37 = vpop.f32.mrb[1].mxu0  ;;  %v1653_v38 = vpop.f32.mrb[0].mxu1 }
  0xf8   :  { %v1633_v39 = vadd.f32 %v1632_v37, %v1631_v36  ;;  %v1634_v40 = vpop.f32.mrb[2].mxu0  ;;  %v1654_v41 = vpop.f32.mrb[1].mxu1 }
  0xf9   :  { %v1635_v42 = vpop.f32.mrb[3].mxu0  ;;  %v1655_v43 = vadd.f32 %v1654_v41, %v1653_v38  ;;  %v1656_v35 = vpop.f32.mrb[2].mxu1 }
  0xfa   :  { %v1657_v44 = vpop.f32.mrb[3].mxu1 }
  0xfb   :  { %v1229_v45 = vadd.f32 %v1655_v43, %v1633_v39 }
 0x116   :  { %v1675_v46 = vpop.f32.mrb[4].mxu0 }
 0x117   :  { %v1676_v47 = vpop.f32.mrb[5].mxu0 }
 0x118   :  { %v1697_v48 = vpop.f32.mrb[4].mxu1  ;;  %v1677_v49 = vadd.f32 %v1676_v47, %v1675_v46  ;;  %v1678_v50 = vpop.f32.mrb[6].mxu0 }
 0x119   :  { %v1698_v51 = vpop.f32.mrb[5].mxu1  ;;  %v1679_v52 = vpop.f32.mrb[7].mxu0 }
 0x11a   :  { %v1269_v53 = vadd.f32 %v1677_v49, %v1229_v45  ;;  %v1699_v54 = vadd.f32 %v1698_v51, %v1697_v48  ;;  %v1700_v55 = vpop.f32.mrb[6].mxu1 }
 0x11b   :  { %v1701_v56 = vpop.f32.mrb[7].mxu1 }
 0x11c   :  { %v1309_v57 = vadd.f32 %v1699_v54, %v1269_v53 }
 0x136   :  { %v1719_v58 = vpop.f32.mrb[8].mxu0 }
 0x137   :  { %v1720_v59 = vpop.f32.mrb[9].mxu0 }
 0x138   :  { %v1741_v60 = vpop.f32.mrb[8].mxu1  ;;  %v1721_v61 = vadd.f32 %v1720_v59, %v1719_v58  ;;  %v1722_v62 = vpop.f32.mrb[10].mxu0 }
 0x139   :  { %v1742_v63 = vpop.f32.mrb[9].mxu1  ;;  %v1723_v0 = vpop.f32.mrb[11].mxu0 }
 0x13a   :  { %v1349_v1 = vadd.f32 %v1721_v61, %v1309_v57  ;;  %v1743_v2 = vadd.f32 %v1742_v63, %v1741_v60  ;;  %v1744_v3 = vpop.f32.mrb[10].mxu1 }
 0x13b   :  { %v1745_v4 = vpop.f32.mrb[11].mxu1 }
 0x13c   :  { %v1389_v5 = vadd.f32 %v1743_v2, %v1349_v1 }
 0x156   :  { %v1763_v6 = vpop.f32.mrb[12].mxu0 }
 0x157   :  { %v1764_v7 = vpop.f32.mrb[13].mxu0 }
 0x158   :  { %v1785_v8 = vpop.f32.mrb[12].mxu1  ;;  %v1765_v9 = vadd.f32 %v1764_v7, %v1763_v6  ;;  %v1766_v10 = vpop.f32.mrb[14].mxu0 }
 0x159   :  { %v1786_v11 = vpop.f32.mrb[13].mxu1  ;;  %v1767_v12 = vpop.f32.mrb[15].mxu0 }
 0x15a   :  { %v1429_v13 = vadd.f32 %v1765_v9, %v1389_v5  ;;  %v1787_v14 = vadd.f32 %v1786_v11, %v1785_v8  ;;  %v1788_v15 = vpop.f32.mrb[14].mxu1 }
 0x15b   :  { %v1789_v16 = vpop.f32.mrb[15].mxu1 }
 0x15c   :  { %v1469_v17 = vadd.f32 %v1787_v14, %v1429_v13 }
 0x15e   :  { %v1614_v18 = vmul.f32 -1.442695, %v1469_v17 }
 0x160   :  { %1922 = vpow2.f32 %v1614_v18 }
 0x16a   :  { %v1923_v19 = vpop.eup %1922 }
 0x16b   :  { %v1477_v20 = vadd.f32 1.0, %v1923_v19 }
 0x16d   :  { %1924 = vrcp.f32 %v1477_v20 }
 0x177   :  { %v1925_v21 = vpop.eup %1924 }
 0x178   :  { %1481 = vst.msk [vmem:[%s2371_s2] sm:$0x3] %vm1480_vm0, %v1925_v21 }

</bundles_post_ra>
